<compile_context>
chip_gen: v7x
topology: tpu7x:2x2x1
jax: 0.10.0
libtpu: 0.0.40
codegen_flags: <defaults>
</compile_context>

<pallas_src>
import functools

import jax
import jax.numpy as jnp
import numpy as np
from jax.experimental import pallas as pl
from jax.experimental.pallas import tpu as pltpu

# ----------------------------------------------------------------------------
# Small configuration (constructor arguments of Model, scaled down)
# ----------------------------------------------------------------------------
SHORT, MIDDLE, LONG = 20, 80, 160          # window sizes
STRIDE = SHORT // 2                        # 10
N_ENC = 32                                 # speech_encoder_out_channels
SPK_H = 16                                 # speaker_encoder_hidden_channels
SPK_OUT = 24                               # speaker_encoder_out_channels
TCN_IN = 32                                # tcn_input_channels
TCN_H = 48                                 # tcn_hidden_channels
N_STACKS = 2
N_BLOCKS = 2
EPS = 1e-8                                 # GroupNorm eps (matches reference 1e-08)

B = 2
L_MIX = 320                                # mixture length -> T = (L-2)/10 + 1 = 32
T_REF = 16                                 # reference length


# ----------------------------------------------------------------------------
# Constant helper matrices (numpy -> baked device constants, built once)
# ----------------------------------------------------------------------------
def _scatter_np(T, r):
    """Per-sample overlap-add scatter matrices: out_chunk[u] += frame[u-j] (piece j)."""
    U = T + r - 1
    u = np.arange(U)[:, None]
    t = np.arange(T)[None, :]
    return np.stack([((u - t) == j).astype(np.float32) for j in range(r)], axis=0)


# ----------------------------------------------------------------------------
# In-kernel helpers
# ----------------------------------------------------------------------------
def _gln(y, g, b, eps):
    """GroupNorm(1, C) over the per-sample (T, C) tile, channels-last, f32."""
    inv_n = 1.0 / float(y.shape[0] * y.shape[1])
    mu = jnp.sum(jnp.sum(y, axis=1, keepdims=True), axis=0, keepdims=True) * inv_n
    yc = y - mu
    var = jnp.sum(jnp.sum(yc * yc, axis=1, keepdims=True), axis=0, keepdims=True) * inv_n
    return yc * jax.lax.rsqrt(var + eps) * g + b


# ----------------------------------------------------------------------------
# The single fused Pallas kernel (one grid step == one batch sample)
# ----------------------------------------------------------------------------
def _spex_kernel(patches_ref, spk_ref,
                 wenc_ref, encg_ref, encb_ref, wext_ref, bext_ref,
                 w1xs_ref, w1ps_ref, b1s_ref, a1s_ref, g1s_ref, be1s_ref,
                 wds_ref, bds_ref, a2s_ref, g2s_ref, be2s_ref,
                 w2s_ref, b2s_ref,
                 wmask_ref, bmask_ref, wproj_ref,
                 scs_ref, scm_ref, scl_ref,
                 outs_ref, outm_ref, outl_ref,
                 *, t_len, n_blocks_total, n_blocks, eps):
    T = t_len
    bf16 = jnp.bfloat16
    f32 = jnp.float32

    # ---------------- multi-scale encoder (stacked weights, one MXU matmul) ----
    emb = jnp.dot(patches_ref[...].astype(bf16), wenc_ref[...],
                  preferred_element_type=f32)                          # (T, 3*N_ENC)
    emb = jnp.maximum(emb, 0.0)                                        # ReLU (kept for decoder)
    xn = _gln(emb, encg_ref[...], encb_ref[...], eps)
    x = jnp.dot(xn.astype(bf16), wext_ref[...],
                preferred_element_type=f32) + bext_ref[...]            # (T, TCN_IN)

    # speaker embedding row for this sample (broadcast happens via the add below)
    spk_bf = spk_ref[0].astype(bf16)                                   # (1, SPK_OUT)

    H = w1xs_ref.shape[2]
    row_ids = jax.lax.broadcasted_iota(jnp.int32, (T, H), 0)           # hoisted

    # ---------------- TCN blocks (fully unrolled, all VMEM/vreg resident) ------
    for i in range(n_blocks_total):
        t_pos = i % n_blocks
        d = 2 ** t_pos

        # 1x1 conv: concat([x, spk]) @ W1  ==  x @ W1_x  +  spk @ W1_spk
        y = jnp.dot(x.astype(bf16), w1xs_ref[i],
                    preferred_element_type=f32) + b1s_ref[i]
        if t_pos == 0:
            y = y + jnp.dot(spk_bf, w1ps_ref[i], preferred_element_type=f32)
        y = jnp.where(y >= 0.0, y, a1s_ref[i] * y)                     # PReLU
        y = _gln(y, g1s_ref[i], be1s_ref[i], eps)

        # depthwise dilated conv (k=3) via XLU sublane rolls + boundary masks
        wd = wds_ref[i]                                                # (3, H) f32
        y_m = jnp.where(row_ids >= d, pltpu.roll(y, d, axis=0), 0.0)       # y[t-d]
        y_p = jnp.where(row_ids < T - d, pltpu.roll(y, T - d, axis=0), 0.0)  # y[t+d]
        z = y_m * wd[0:1, :] + y * wd[1:2, :] + y_p * wd[2:3, :] + bds_ref[i]
        z = jnp.where(z >= 0.0, z, a2s_ref[i] * z)                     # PReLU
        z = _gln(z, g2s_ref[i], be2s_ref[i], eps)

        out = jnp.dot(z.astype(bf16), w2s_ref[i],
                      preferred_element_type=f32) + b2s_ref[i]
        if t_pos != 0:
            out = out + x                                              # residual
        x = out

    # ---------------- fused decoder --------------------------------------------
    mask = jax.nn.sigmoid(
        jnp.dot(x.astype(bf16), wmask_ref[...],
                preferred_element_type=f32) + bmask_ref[...])          # (T, 3*N_ENC)
    masked = mask * emb
    frames = jnp.dot(masked.astype(bf16), wproj_ref[...],
                     preferred_element_type=f32)                       # (T, 260)

    def _overlap_add(sc_ref, base, out_ref):
        r = sc_ref.shape[0]
        acc = None
        for j in range(r):
            piece = frames[:, base + j * STRIDE: base + (j + 1) * STRIDE].astype(bf16)
            term = jnp.dot(sc_ref[j], piece, preferred_element_type=f32)
            acc = term if acc is None else acc + term
        out_ref[...] = acc[None]                                       # (1, U, STRIDE)

    _overlap_add(scs_ref, 0, outs_ref)
    _overlap_add(scm_ref, SHORT, outm_ref)
    _overlap_add(scl_ref, SHORT + MIDDLE, outl_ref)


# ----------------------------------------------------------------------------
# One-time weight preparation (hoisted out of the per-forward path)
# ----------------------------------------------------------------------------
def prepare_params(p, t_len):
    f32, bf16 = jnp.float32, jnp.bfloat16
    prep = {}

    # stacked multi-scale encoder weights (short/mid embedded inside the long window)
    off_s = LONG // 2 - 1 - (SHORT // 2 - 1)       # 70
    off_m = LONG // 2 - 1 - (MIDDLE // 2 - 1)      # 40
    ws = jnp.pad(p["enc_short_w"].T, ((off_s, LONG - off_s - SHORT), (0, 0)))
    wm = jnp.pad(p["enc_mid_w"].T, ((off_m, LONG - off_m - MIDDLE), (0, 0)))
    wl = p["enc_long_w"].T
    prep["wenc"] = jnp.concatenate([ws, wm, wl], axis=1).astype(bf16)      # (160, 96)
    prep["encg"] = p["gn_g"].reshape(1, -1).astype(f32)
    prep["encb"] = p["gn_b"].reshape(1, -1).astype(f32)
    prep["wext"] = p["ext_enc_w"].T.astype(bf16)                           # (96, 32)
    prep["bext"] = p["ext_enc_b"].reshape(1, -1).astype(f32)

    H = TCN_H
    w1x, w1p, b1, a1, g1, be1 = [], [], [], [], [], []
    wd, bd, a2, g2, be2, w2, b2 = [], [], [], [], [], [], []
    for i, blk in enumerate(p["tcn"]):
        w1t = blk["w1"].T                                                  # (cin, H)
        if i % N_BLOCKS == 0:
            w1x.append(w1t[:TCN_IN])
            w1p.append(w1t[TCN_IN:])
        else:
            w1x.append(w1t)
            w1p.append(jnp.zeros((SPK_OUT, H), f32))                       # unused
        b1.append(blk["b1"].reshape(1, H))
        a1.append(jnp.broadcast_to(blk["a1"].reshape(1, 1), (1, H)))
        g1.append(blk["g1"].reshape(1, H))
        be1.append(blk["be1"].reshape(1, H))
        wd.append(blk["wd"].T)                                             # (3, H)
        bd.append(blk["bd"].reshape(1, H))
        a2.append(jnp.broadcast_to(blk["a2"].reshape(1, 1), (1, H)))
        g2.append(blk["g2"].reshape(1, H))
        be2.append(blk["be2"].reshape(1, H))
        w2.append(blk["w2"].T)                                             # (H, TCN_IN)
        b2.append(blk["b2"].reshape(1, TCN_IN))
    prep["w1xs"] = jnp.stack(w1x).astype(bf16)        # (4, 32, 48)
    prep["w1ps"] = jnp.stack(w1p).astype(bf16)        # (4, 24, 48)
    prep["b1s"] = jnp.stack(b1).astype(f32)
    prep["a1s"] = jnp.stack(a1).astype(f32)
    prep["g1s"] = jnp.stack(g1).astype(f32)
    prep["be1s"] = jnp.stack(be1).astype(f32)
    prep["wds"] = jnp.stack(wd).astype(f32)           # elementwise use -> keep f32
    prep["bds"] = jnp.stack(bd).astype(f32)
    prep["a2s"] = jnp.stack(a2).astype(f32)
    prep["g2s"] = jnp.stack(g2).astype(f32)
    prep["be2s"] = jnp.stack(be2).astype(f32)
    prep["w2s"] = jnp.stack(w2).astype(bf16)          # (4, 48, 32)
    prep["b2s"] = jnp.stack(b2).astype(f32)

    # stacked mask conv + block-diagonal frame projection
    prep["wmask"] = jnp.concatenate(
        [p["mask_short_w"].T, p["mask_mid_w"].T, p["mask_long_w"].T],
        axis=1).astype(bf16)                                               # (32, 96)
    prep["bmask"] = jnp.concatenate(
        [p["mask_short_b"], p["mask_mid_b"], p["mask_long_b"]]).reshape(1, -1).astype(f32)
    z32 = functools.partial(jnp.zeros, dtype=f32)
    prep["wproj"] = jnp.concatenate([
        jnp.concatenate([p["dec_short_w"], z32((N_ENC, MIDDLE + LONG))], axis=1),
        jnp.concatenate([z32((N_ENC, SHORT)), p["dec_mid_w"], z32((N_ENC, LONG))], axis=1),
        jnp.concatenate([z32((N_ENC, SHORT + MIDDLE)), p["dec_long_w"]], axis=1),
    ], axis=0).astype(bf16)                                                # (96, 260)

    # per-sample overlap-add scatter stacks (0/1 matrices, exact in bf16)
    prep["scs"] = jnp.asarray(_scatter_np(t_len, SHORT // STRIDE)).astype(bf16)
    prep["scm"] = jnp.asarray(_scatter_np(t_len, MIDDLE // STRIDE)).astype(bf16)
    prep["scl"] = jnp.asarray(_scatter_np(t_len, LONG // STRIDE)).astype(bf16)

    # speaker encoder (kept in plain XLA)
    prep["spk_w"] = p["spk_lin_w"].T.astype(f32)
    prep["spk_b"] = p["spk_lin_b"].reshape(1, -1).astype(f32)
    prep["lstm"] = p["lstm"]
    return prep


# ----------------------------------------------------------------------------
# JAX glue (layout-only / sequential parts)
# ----------------------------------------------------------------------------
def lstm_bidirectional(x, p):
    """x:[B,T,1] -> [B,T,2H].  PyTorch gate order i,f,g,o."""
    # TODO(synk): LSTM recurrence kept in plain JAX (lax.scan) -- sequential dependency.
    Bn, T, _ = x.shape
    H = p["w_hh_f"].shape[1]

    def run(xseq, w_ih, w_hh, bias):
        def step(carry, xt):
            h, c = carry
            gates = xt @ w_ih.T + h @ w_hh.T + bias
            i = jax.nn.sigmoid(gates[:, 0 * H:1 * H])
            f = jax.nn.sigmoid(gates[:, 1 * H:2 * H])
            g = jnp.tanh(gates[:, 2 * H:3 * H])
            o = jax.nn.sigmoid(gates[:, 3 * H:4 * H])
            c = f * c + i * g
            h = o * jnp.tanh(c)
            return (h, c), h

        h0 = jnp.zeros((Bn, H), jnp.float32)
        c0 = jnp.zeros((Bn, H), jnp.float32)
        _, hs = jax.lax.scan(step, (h0, c0), jnp.transpose(xseq, (1, 0, 2)))
        return jnp.transpose(hs, (1, 0, 2))

    fwd = run(x, p["w_ih_f"], p["w_hh_f"], p["b_f"])
    bwd = run(x[:, ::-1, :], p["w_ih_b"], p["w_hh_b"], p["b_b"])[:, ::-1, :]
    return jnp.concatenate([fwd, bwd], axis=-1)


# ----------------------------------------------------------------------------
# Full forward pass (one pallas_call)
# ----------------------------------------------------------------------------
def spex_forward(prep, mixture, reference):
    Bn, _, L = mixture.shape
    s = STRIDE
    T = (L - 2) // s + 1                              # identical for all 3 scales
    r_long = LONG // s

    # --- shared im2col over the long window (static slices; input-dependent) ---
    p_long = LONG // 2 - 1
    xp = jnp.pad(mixture[:, 0, :], ((0, 0), (p_long, p_long)))
    need = (r_long - 1) * s + T * s
    if xp.shape[1] < need:
        xp = jnp.pad(xp, ((0, 0), (0, need - xp.shape[1])))
    segs = [xp[:, o * s:o * s + T * s].reshape(Bn, T, s) for o in range(r_long)]
    patches = jnp.concatenate(segs, axis=2).reshape(Bn * T, LONG)     # (B*T, 160)

    # --- speaker encoder: LSTM scan + mean(ReLU) + tiny Linear (plain XLA) ---
    ref_seq = jnp.transpose(reference, (0, 2, 1))                     # [B, Tr, 1]
    h = lstm_bidirectional(ref_seq, prep["lstm"])                     # [B, Tr, 2H]
    hmean = jnp.mean(jnp.maximum(h, 0.0), axis=1)                     # [B, 2H]
    spk = hmean @ prep["spk_w"] + prep["spk_b"]                       # [B, SPK_OUT]
    spk_cache = spk

    # --- single fused Pallas kernel: encoder + 4 TCN blocks + decoder + OLA ---
    U_s = T + SHORT // s - 1
    U_m = T + MIDDLE // s - 1
    U_l = T + LONG // s - 1

    w_names = ["wenc", "encg", "encb", "wext", "bext",
               "w1xs", "w1ps", "b1s", "a1s", "g1s", "be1s",
               "wds", "bds", "a2s", "g2s", "be2s", "w2s", "b2s",
               "wmask", "bmask", "wproj", "scs", "scm", "scl"]
    w_args = [prep[k] for k in w_names]

    def _full(a):
        nd = a.ndim
        return pl.BlockSpec(a.shape, lambda b, nd=nd: (0,) * nd)

    in_specs = ([pl.BlockSpec((T, LONG), lambda b: (b, 0)),
                 pl.BlockSpec((1, 1, SPK_OUT), lambda b: (b, 0, 0))]
                + [_full(a) for a in w_args])
    out_specs = (pl.BlockSpec((1, U_s, s), lambda b: (b, 0, 0)),
                 pl.BlockSpec((1, U_m, s), lambda b: (b, 0, 0)),
                 pl.BlockSpec((1, U_l, s), lambda b: (b, 0, 0)))
    out_shape = (jax.ShapeDtypeStruct((Bn, U_s, s), jnp.float32),
                 jax.ShapeDtypeStruct((Bn, U_m, s), jnp.float32),
                 jax.ShapeDtypeStruct((Bn, U_l, s), jnp.float32))

    kern = functools.partial(_spex_kernel, t_len=T,
                             n_blocks_total=N_STACKS * N_BLOCKS,
                             n_blocks=N_BLOCKS, eps=EPS)
    ch_s, ch_m, ch_l = pl.pallas_call(
        kern,
        grid=(Bn,),
        in_specs=in_specs,
        out_specs=out_specs,
        out_shape=out_shape,
        compiler_params=pltpu.CompilerParams(
            dimension_semantics=("parallel",)),       # shard samples across TCs (v7x)
    )(patches, spk[:, None, :], *w_args)

    def finish(chunks, k):
        """Flatten overlap-add chunks and crop the ConvTranspose1d padding."""
        p_dec = k // 2 - 5
        full = chunks.reshape(Bn, -1)
        return full[:, p_dec:p_dec + L][:, None, :]

    return finish(ch_s, SHORT), finish(ch_m, MIDDLE), finish(ch_l, LONG), spk_cache


# ----------------------------------------------------------------------------
# Deterministic parameter initialization (PyTorch-layout params)
# ----------------------------------------------------------------------------
def init_params(key):
    keys = iter(jax.random.split(key, 256))

    def nrm(shape, scale=0.1):
        return (scale * jax.random.normal(next(keys), shape)).astype(jnp.float32)

    p = {}
    p["enc_short_w"] = nrm((N_ENC, SHORT))
    p["enc_mid_w"] = nrm((N_ENC, MIDDLE))
    p["enc_long_w"] = nrm((N_ENC, LONG))

    p["gn_g"] = jnp.ones((3 * N_ENC,), jnp.float32)
    p["gn_b"] = jnp.zeros((3 * N_ENC,), jnp.float32)
    p["ext_enc_w"] = nrm((TCN_IN, 3 * N_ENC))
    p["ext_enc_b"] = nrm((TCN_IN,), 0.01)

    p["lstm"] = dict(
        w_ih_f=nrm((4 * SPK_H, 1)), w_hh_f=nrm((4 * SPK_H, SPK_H)), b_f=nrm((4 * SPK_H,), 0.01),
        w_ih_b=nrm((4 * SPK_H, 1)), w_hh_b=nrm((4 * SPK_H, SPK_H)), b_b=nrm((4 * SPK_H,), 0.01),
    )
    p["spk_lin_w"] = nrm((SPK_OUT, 2 * SPK_H))
    p["spk_lin_b"] = nrm((SPK_OUT,), 0.01)

    tcn = []
    for i in range(N_STACKS * N_BLOCKS):
        cin = TCN_IN + SPK_OUT if (i % N_BLOCKS == 0) else TCN_IN
        tcn.append(dict(
            w1=nrm((TCN_H, cin)), b1=nrm((TCN_H,), 0.01),
            a1=jnp.full((1,), 0.25, jnp.float32),
            g1=jnp.ones((TCN_H,), jnp.float32), be1=jnp.zeros((TCN_H,), jnp.float32),
            wd=nrm((TCN_H, 3)), bd=nrm((TCN_H,), 0.01),
            a2=jnp.full((1,), 0.25, jnp.float32),
            g2=jnp.ones((TCN_H,), jnp.float32), be2=jnp.zeros((TCN_H,), jnp.float32),
            w2=nrm((TCN_IN, TCN_H)), b2=nrm((TCN_IN,), 0.01),
        ))
    p["tcn"] = tcn

    for name in ("short", "mid", "long"):
        p[f"mask_{name}_w"] = nrm((N_ENC, TCN_IN))
        p[f"mask_{name}_b"] = nrm((N_ENC,), 0.01)
    p["dec_short_w"] = nrm((N_ENC, SHORT))
    p["dec_mid_w"] = nrm((N_ENC, MIDDLE))
    p["dec_long_w"] = nrm((N_ENC, LONG))
    return p


# ----------------------------------------------------------------------------
if __name__ == "__main__":
    key = jax.random.PRNGKey(0)
    kp, km, kr = jax.random.split(key, 3)
    params = init_params(kp)

    T_frames = (L_MIX - 2) // STRIDE + 1
    prep = prepare_params(params, T_frames)           # one-time weight preparation

    mixture = jax.random.normal(km, (B, 1, L_MIX), jnp.float32)
    reference = jax.random.normal(kr, (B, 1, T_REF), jnp.float32)

    fwd = jax.jit(spex_forward)
    short_out, middle_out, long_out, spk_cache = fwd(prep, mixture, reference)
    jax.block_until_ready((short_out, middle_out, long_out, spk_cache))

    assert short_out.shape == (B, 1, L_MIX), short_out.shape
    assert middle_out.shape == (B, 1, L_MIX), middle_out.shape
    assert long_out.shape == (B, 1, L_MIX), long_out.shape
    assert spk_cache.shape == (B, SPK_OUT), spk_cache.shape
    assert all(bool(jnp.all(jnp.isfinite(o))) for o in
               (short_out, middle_out, long_out, spk_cache))
    print("KERNEL_OK")
</pallas_src>

<mosaic_0001>
module attributes {stable_mosaic.version = 11 : i64} {
  func.func @_spex_kernel(%arg0: i32, %arg1: memref<32x160xf32, #tpu.memory_space<vmem>>, %arg2: memref<1x1x24xf32, #tpu.memory_space<vmem>>, %arg3: memref<160x96xbf16, #tpu.memory_space<vmem>>, %arg4: memref<1x96xf32, #tpu.memory_space<vmem>>, %arg5: memref<1x96xf32, #tpu.memory_space<vmem>>, %arg6: memref<96x32xbf16, #tpu.memory_space<vmem>>, %arg7: memref<1x32xf32, #tpu.memory_space<vmem>>, %arg8: memref<4x32x48xbf16, #tpu.memory_space<vmem>>, %arg9: memref<4x24x48xbf16, #tpu.memory_space<vmem>>, %arg10: memref<4x1x48xf32, #tpu.memory_space<vmem>>, %arg11: memref<4x1x48xf32, #tpu.memory_space<vmem>>, %arg12: memref<4x1x48xf32, #tpu.memory_space<vmem>>, %arg13: memref<4x1x48xf32, #tpu.memory_space<vmem>>, %arg14: memref<4x3x48xf32, #tpu.memory_space<vmem>>, %arg15: memref<4x1x48xf32, #tpu.memory_space<vmem>>, %arg16: memref<4x1x48xf32, #tpu.memory_space<vmem>>, %arg17: memref<4x1x48xf32, #tpu.memory_space<vmem>>, %arg18: memref<4x1x48xf32, #tpu.memory_space<vmem>>, %arg19: memref<4x48x32xbf16, #tpu.memory_space<vmem>>, %arg20: memref<4x1x32xf32, #tpu.memory_space<vmem>>, %arg21: memref<32x96xbf16, #tpu.memory_space<vmem>>, %arg22: memref<1x96xf32, #tpu.memory_space<vmem>>, %arg23: memref<96x260xbf16, #tpu.memory_space<vmem>>, %arg24: memref<2x33x32xbf16, #tpu.memory_space<vmem>>, %arg25: memref<8x39x32xbf16, #tpu.memory_space<vmem>>, %arg26: memref<16x47x32xbf16, #tpu.memory_space<vmem>>, %arg27: memref<1x33x10xf32, #tpu.memory_space<vmem>>, %arg28: memref<1x39x10xf32, #tpu.memory_space<vmem>>, %arg29: memref<1x47x10xf32, #tpu.memory_space<vmem>>) attributes {dimension_semantics = [#tpu.dimension_semantics<parallel>], iteration_bounds = array<i64: 2>, scalar_prefetch = 0 : i64, scratch_operands = 0 : i64, tpu.core_type = #tpu.core_type<tc>, window_params = [{transform_indices = @transform_0, window_bounds = array<i64: 32, 160>}, {transform_indices = @transform_1, window_bounds = array<i64: 1, 1, 24>}, {pipeline_mode = #tpu.pipeline_mode<synchronous>, transform_indices = @transform_2, window_bounds = array<i64: 160, 96>}, {pipeline_mode = #tpu.pipeline_mode<synchronous>, transform_indices = @transform_3, window_bounds = array<i64: 1, 96>}, {pipeline_mode = #tpu.pipeline_mode<synchronous>, transform_indices = @transform_4, window_bounds = array<i64: 1, 96>}, {pipeline_mode = #tpu.pipeline_mode<synchronous>, transform_indices = @transform_5, window_bounds = array<i64: 96, 32>}, {pipeline_mode = #tpu.pipeline_mode<synchronous>, transform_indices = @transform_6, window_bounds = array<i64: 1, 32>}, {pipeline_mode = #tpu.pipeline_mode<synchronous>, transform_indices = @transform_7, window_bounds = array<i64: 4, 32, 48>}, {pipeline_mode = #tpu.pipeline_mode<synchronous>, transform_indices = @transform_8, window_bounds = array<i64: 4, 24, 48>}, {pipeline_mode = #tpu.pipeline_mode<synchronous>, transform_indices = @transform_9, window_bounds = array<i64: 4, 1, 48>}, {pipeline_mode = #tpu.pipeline_mode<synchronous>, transform_indices = @transform_10, window_bounds = array<i64: 4, 1, 48>}, {pipeline_mode = #tpu.pipeline_mode<synchronous>, transform_indices = @transform_11, window_bounds = array<i64: 4, 1, 48>}, {pipeline_mode = #tpu.pipeline_mode<synchronous>, transform_indices = @transform_12, window_bounds = array<i64: 4, 1, 48>}, {pipeline_mode = #tpu.pipeline_mode<synchronous>, transform_indices = @transform_13, window_bounds = array<i64: 4, 3, 48>}, {pipeline_mode = #tpu.pipeline_mode<synchronous>, transform_indices = @transform_14, window_bounds = array<i64: 4, 1, 48>}, {pipeline_mode = #tpu.pipeline_mode<synchronous>, transform_indices = @transform_15, window_bounds = array<i64: 4, 1, 48>}, {pipeline_mode = #tpu.pipeline_mode<synchronous>, transform_indices = @transform_16, window_bounds = array<i64: 4, 1, 48>}, {pipeline_mode = #tpu.pipeline_mode<synchronous>, transform_indices = @transform_17, window_bounds = array<i64: 4, 1, 48>}, {pipeline_mode = #tpu.pipeline_mode<synchronous>, transform_indices = @transform_18, window_bounds = array<i64: 4, 48, 32>}, {pipeline_mode = #tpu.pipeline_mode<synchronous>, transform_indices = @transform_19, window_bounds = array<i64: 4, 1, 32>}, {pipeline_mode = #tpu.pipeline_mode<synchronous>, transform_indices = @transform_20, window_bounds = array<i64: 32, 96>}, {pipeline_mode = #tpu.pipeline_mode<synchronous>, transform_indices = @transform_21, window_bounds = array<i64: 1, 96>}, {pipeline_mode = #tpu.pipeline_mode<synchronous>, transform_indices = @transform_22, window_bounds = array<i64: 96, 260>}, {pipeline_mode = #tpu.pipeline_mode<synchronous>, transform_indices = @transform_23, window_bounds = array<i64: 2, 33, 32>}, {pipeline_mode = #tpu.pipeline_mode<synchronous>, transform_indices = @transform_24, window_bounds = array<i64: 8, 39, 32>}, {pipeline_mode = #tpu.pipeline_mode<synchronous>, transform_indices = @transform_25, window_bounds = array<i64: 16, 47, 32>}, {transform_indices = @transform_26, window_bounds = array<i64: 1, 33, 10>}, {transform_indices = @transform_27, window_bounds = array<i64: 1, 39, 10>}, {transform_indices = @transform_28, window_bounds = array<i64: 1, 47, 10>}]} {
    %c0 = arith.constant 0 : index
    %c0_0 = arith.constant 0 : index
    %0 = vector.load %arg1[%c0, %c0_0] : memref<32x160xf32, #tpu.memory_space<vmem>>, vector<32x160xf32>
    %1 = arith.truncf %0 : vector<32x160xf32> to vector<32x160xbf16>
    %c0_1 = arith.constant 0 : index
    %c0_2 = arith.constant 0 : index
    %2 = vector.load %arg3[%c0_1, %c0_2] : memref<160x96xbf16, #tpu.memory_space<vmem>>, vector<160x96xbf16>
    %cst = arith.constant dense<0.000000e+00> : vector<32x96xf32>
    %3 = tpu.matmul %1, %2, %cst {dimension_numbers = #tpu.dot_dimension_numbers<[1], [0], [0], [1], [0, 0, 1, 1], [], []>} : vector<32x160xbf16>, vector<160x96xbf16>, vector<32x96xf32> -> vector<32x96xf32>
    %cst_3 = arith.constant 0.000000e+00 : f32
    %4 = vector.broadcast %cst_3 : f32 to vector<32x96xf32>
    %5 = arith.maximumf %3, %4 : vector<32x96xf32>
    %c0_4 = arith.constant 0 : index
    %c0_5 = arith.constant 0 : index
    %6 = vector.load %arg4[%c0_4, %c0_5] : memref<1x96xf32, #tpu.memory_space<vmem>>, vector<1x96xf32>
    %c0_6 = arith.constant 0 : index
    %c0_7 = arith.constant 0 : index
    %7 = vector.load %arg5[%c0_6, %c0_7] : memref<1x96xf32, #tpu.memory_space<vmem>>, vector<1x96xf32>
    %cst_8 = arith.constant dense<0.000000e+00> : vector<32xf32>
    %8 = vector.multi_reduction <add>, %5, %cst_8 [1] : vector<32x96xf32> to vector<32xf32>
    %9 = vector.shape_cast %8 : vector<32xf32> to vector<32x1xf32>
    %cst_9 = arith.constant dense<0.000000e+00> : vector<1xf32>
    %10 = vector.multi_reduction <add>, %9, %cst_9 [0] : vector<32x1xf32> to vector<1xf32>
    %11 = vector.shape_cast %10 : vector<1xf32> to vector<1x1xf32>
    %cst_10 = arith.constant 3.25520843E-4 : f32
    %12 = vector.broadcast %cst_10 : f32 to vector<1x1xf32>
    %13 = arith.mulf %11, %12 : vector<1x1xf32>
    %14 = vector.broadcast %13 : vector<1x1xf32> to vector<32x96xf32>
    %15 = arith.subf %5, %14 : vector<32x96xf32>
    %16 = arith.mulf %15, %15 : vector<32x96xf32>
    %cst_11 = arith.constant dense<0.000000e+00> : vector<32xf32>
    %17 = vector.multi_reduction <add>, %16, %cst_11 [1] : vector<32x96xf32> to vector<32xf32>
    %18 = vector.shape_cast %17 : vector<32xf32> to vector<32x1xf32>
    %cst_12 = arith.constant dense<0.000000e+00> : vector<1xf32>
    %19 = vector.multi_reduction <add>, %18, %cst_12 [0] : vector<32x1xf32> to vector<1xf32>
    %20 = vector.shape_cast %19 : vector<1xf32> to vector<1x1xf32>
    %cst_13 = arith.constant 3.25520843E-4 : f32
    %21 = vector.broadcast %cst_13 : f32 to vector<1x1xf32>
    %22 = arith.mulf %20, %21 : vector<1x1xf32>
    %cst_14 = arith.constant 9.99999993E-9 : f32
    %23 = vector.broadcast %cst_14 : f32 to vector<1x1xf32>
    %24 = arith.addf %22, %23 : vector<1x1xf32>
    %25 = math.rsqrt %24 : vector<1x1xf32>
    %26 = vector.broadcast %25 : vector<1x1xf32> to vector<32x96xf32>
    %27 = arith.mulf %15, %26 : vector<32x96xf32>
    %28 = vector.broadcast %6 : vector<1x96xf32> to vector<32x96xf32>
    %29 = arith.mulf %27, %28 : vector<32x96xf32>
    %30 = vector.broadcast %7 : vector<1x96xf32> to vector<32x96xf32>
    %31 = arith.addf %29, %30 : vector<32x96xf32>
    %32 = arith.truncf %31 : vector<32x96xf32> to vector<32x96xbf16>
    %c0_15 = arith.constant 0 : index
    %c0_16 = arith.constant 0 : index
    %33 = vector.load %arg6[%c0_15, %c0_16] : memref<96x32xbf16, #tpu.memory_space<vmem>>, vector<96x32xbf16>
    %cst_17 = arith.constant dense<0.000000e+00> : vector<32x32xf32>
    %34 = tpu.matmul %32, %33, %cst_17 {dimension_numbers = #tpu.dot_dimension_numbers<[1], [0], [0], [1], [0, 0, 1, 1], [], []>} : vector<32x96xbf16>, vector<96x32xbf16>, vector<32x32xf32> -> vector<32x32xf32>
    %c0_18 = arith.constant 0 : index
    %c0_19 = arith.constant 0 : index
    %35 = vector.load %arg7[%c0_18, %c0_19] : memref<1x32xf32, #tpu.memory_space<vmem>>, vector<1x32xf32>
    %36 = vector.broadcast %35 : vector<1x32xf32> to vector<32x32xf32>
    %37 = arith.addf %34, %36 : vector<32x32xf32>
    %c0_20 = arith.constant 0 : index
    %c0_21 = arith.constant 0 : index
    %c0_22 = arith.constant 0 : index
    %38 = vector.load %arg2[%c0_20, %c0_21, %c0_22] : memref<1x1x24xf32, #tpu.memory_space<vmem>>, vector<1x1x24xf32>
    %39 = vector.shape_cast %38 : vector<1x1x24xf32> to vector<1x24xf32>
    %40 = arith.truncf %39 : vector<1x24xf32> to vector<1x24xbf16>
    %41 = tpu.iota {dimensions = array<i32: 0>} : vector<32x48xi32>
    %42 = arith.truncf %37 : vector<32x32xf32> to vector<32x32xbf16>
    %c0_23 = arith.constant 0 : index
    %c0_24 = arith.constant 0 : index
    %c0_25 = arith.constant 0 : index
    %43 = vector.load %arg8[%c0_23, %c0_24, %c0_25] : memref<4x32x48xbf16, #tpu.memory_space<vmem>>, vector<1x32x48xbf16>
    %44 = vector.shape_cast %43 : vector<1x32x48xbf16> to vector<32x48xbf16>
    %cst_26 = arith.constant dense<0.000000e+00> : vector<32x48xf32>
    %45 = tpu.matmul %42, %44, %cst_26 {dimension_numbers = #tpu.dot_dimension_numbers<[1], [0], [0], [1], [0, 0, 1, 1], [], []>} : vector<32x32xbf16>, vector<32x48xbf16>, vector<32x48xf32> -> vector<32x48xf32>
    %c0_27 = arith.constant 0 : index
    %c0_28 = arith.constant 0 : index
    %c0_29 = arith.constant 0 : index
    %46 = vector.load %arg10[%c0_27, %c0_28, %c0_29] : memref<4x1x48xf32, #tpu.memory_space<vmem>>, vector<1x1x48xf32>
    %47 = vector.shape_cast %46 : vector<1x1x48xf32> to vector<1x48xf32>
    %48 = vector.broadcast %47 : vector<1x48xf32> to vector<32x48xf32>
    %49 = arith.addf %45, %48 : vector<32x48xf32>
    %c0_30 = arith.constant 0 : index
    %c0_31 = arith.constant 0 : index
    %c0_32 = arith.constant 0 : index
    %50 = vector.load %arg9[%c0_30, %c0_31, %c0_32] : memref<4x24x48xbf16, #tpu.memory_space<vmem>>, vector<1x24x48xbf16>
    %51 = vector.shape_cast %50 : vector<1x24x48xbf16> to vector<24x48xbf16>
    %cst_33 = arith.constant dense<0.000000e+00> : vector<1x48xf32>
    %52 = tpu.matmul %40, %51, %cst_33 {dimension_numbers = #tpu.dot_dimension_numbers<[1], [0], [0], [1], [0, 0, 1, 1], [], []>} : vector<1x24xbf16>, vector<24x48xbf16>, vector<1x48xf32> -> vector<1x48xf32>
    %53 = vector.broadcast %52 : vector<1x48xf32> to vector<32x48xf32>
    %54 = arith.addf %49, %53 : vector<32x48xf32>
    %cst_34 = arith.constant 0.000000e+00 : f32
    %55 = vector.broadcast %cst_34 : f32 to vector<32x48xf32>
    %56 = arith.cmpf oge, %54, %55 : vector<32x48xf32>
    %c0_35 = arith.constant 0 : index
    %c0_36 = arith.constant 0 : index
    %c0_37 = arith.constant 0 : index
    %57 = vector.load %arg11[%c0_35, %c0_36, %c0_37] : memref<4x1x48xf32, #tpu.memory_space<vmem>>, vector<1x1x48xf32>
    %58 = vector.shape_cast %57 : vector<1x1x48xf32> to vector<1x48xf32>
    %59 = vector.broadcast %58 : vector<1x48xf32> to vector<32x48xf32>
    %60 = arith.mulf %59, %54 : vector<32x48xf32>
    %61 = arith.select %56, %54, %60 : vector<32x48xi1>, vector<32x48xf32>
    %c0_38 = arith.constant 0 : index
    %c0_39 = arith.constant 0 : index
    %c0_40 = arith.constant 0 : index
    %62 = vector.load %arg12[%c0_38, %c0_39, %c0_40] : memref<4x1x48xf32, #tpu.memory_space<vmem>>, vector<1x1x48xf32>
    %63 = vector.shape_cast %62 : vector<1x1x48xf32> to vector<1x48xf32>
    %c0_41 = arith.constant 0 : index
    %c0_42 = arith.constant 0 : index
    %c0_43 = arith.constant 0 : index
    %64 = vector.load %arg13[%c0_41, %c0_42, %c0_43] : memref<4x1x48xf32, #tpu.memory_space<vmem>>, vector<1x1x48xf32>
    %65 = vector.shape_cast %64 : vector<1x1x48xf32> to vector<1x48xf32>
    %cst_44 = arith.constant dense<0.000000e+00> : vector<32xf32>
    %66 = vector.multi_reduction <add>, %61, %cst_44 [1] : vector<32x48xf32> to vector<32xf32>
    %67 = vector.shape_cast %66 : vector<32xf32> to vector<32x1xf32>
    %cst_45 = arith.constant dense<0.000000e+00> : vector<1xf32>
    %68 = vector.multi_reduction <add>, %67, %cst_45 [0] : vector<32x1xf32> to vector<1xf32>
    %69 = vector.shape_cast %68 : vector<1xf32> to vector<1x1xf32>
    %cst_46 = arith.constant 6.51041686E-4 : f32
    %70 = vector.broadcast %cst_46 : f32 to vector<1x1xf32>
    %71 = arith.mulf %69, %70 : vector<1x1xf32>
    %72 = vector.broadcast %71 : vector<1x1xf32> to vector<32x48xf32>
    %73 = arith.subf %61, %72 : vector<32x48xf32>
    %74 = arith.mulf %73, %73 : vector<32x48xf32>
    %cst_47 = arith.constant dense<0.000000e+00> : vector<32xf32>
    %75 = vector.multi_reduction <add>, %74, %cst_47 [1] : vector<32x48xf32> to vector<32xf32>
    %76 = vector.shape_cast %75 : vector<32xf32> to vector<32x1xf32>
    %cst_48 = arith.constant dense<0.000000e+00> : vector<1xf32>
    %77 = vector.multi_reduction <add>, %76, %cst_48 [0] : vector<32x1xf32> to vector<1xf32>
    %78 = vector.shape_cast %77 : vector<1xf32> to vector<1x1xf32>
    %cst_49 = arith.constant 6.51041686E-4 : f32
    %79 = vector.broadcast %cst_49 : f32 to vector<1x1xf32>
    %80 = arith.mulf %78, %79 : vector<1x1xf32>
    %cst_50 = arith.constant 9.99999993E-9 : f32
    %81 = vector.broadcast %cst_50 : f32 to vector<1x1xf32>
    %82 = arith.addf %80, %81 : vector<1x1xf32>
    %83 = math.rsqrt %82 : vector<1x1xf32>
    %84 = vector.broadcast %83 : vector<1x1xf32> to vector<32x48xf32>
    %85 = arith.mulf %73, %84 : vector<32x48xf32>
    %86 = vector.broadcast %63 : vector<1x48xf32> to vector<32x48xf32>
    %87 = arith.mulf %85, %86 : vector<32x48xf32>
    %88 = vector.broadcast %65 : vector<1x48xf32> to vector<32x48xf32>
    %89 = arith.addf %87, %88 : vector<32x48xf32>
    %c0_51 = arith.constant 0 : index
    %c0_52 = arith.constant 0 : index
    %c0_53 = arith.constant 0 : index
    %90 = vector.load %arg14[%c0_51, %c0_52, %c0_53] : memref<4x3x48xf32, #tpu.memory_space<vmem>>, vector<1x3x48xf32>
    %91 = vector.shape_cast %90 : vector<1x3x48xf32> to vector<3x48xf32>
    %c1_i32 = arith.constant 1 : i32
    %92 = vector.broadcast %c1_i32 : i32 to vector<32x48xi32>
    %93 = arith.cmpi sge, %41, %92 : vector<32x48xi32>
    %c1_i32_54 = arith.constant 1 : i32
    %94 = tpu.dynamic_rotate %89 by %c1_i32_54 dim 0 : vector<32x48xf32>, i32 -> vector<32x48xf32>
    %cst_55 = arith.constant 0.000000e+00 : f32
    %95 = vector.broadcast %cst_55 : f32 to vector<32x48xf32>
    %96 = arith.select %93, %94, %95 : vector<32x48xi1>, vector<32x48xf32>
    %c31_i32 = arith.constant 31 : i32
    %97 = vector.broadcast %c31_i32 : i32 to vector<32x48xi32>
    %98 = arith.cmpi slt, %41, %97 : vector<32x48xi32>
    %c31_i32_56 = arith.constant 31 : i32
    %99 = tpu.dynamic_rotate %89 by %c31_i32_56 dim 0 : vector<32x48xf32>, i32 -> vector<32x48xf32>
    %cst_57 = arith.constant 0.000000e+00 : f32
    %100 = vector.broadcast %cst_57 : f32 to vector<32x48xf32>
    %101 = arith.select %98, %99, %100 : vector<32x48xi1>, vector<32x48xf32>
    %102 = vector.extract_strided_slice %91 {offsets = [0, 0], sizes = [1, 48], strides = [1, 1]} : vector<3x48xf32> to vector<1x48xf32>
    %103 = vector.broadcast %102 : vector<1x48xf32> to vector<32x48xf32>
    %104 = arith.mulf %96, %103 : vector<32x48xf32>
    %105 = vector.extract_strided_slice %91 {offsets = [1, 0], sizes = [1, 48], strides = [1, 1]} : vector<3x48xf32> to vector<1x48xf32>
    %106 = vector.broadcast %105 : vector<1x48xf32> to vector<32x48xf32>
    %107 = arith.mulf %89, %106 : vector<32x48xf32>
    %108 = arith.addf %104, %107 : vector<32x48xf32>
    %109 = vector.extract_strided_slice %91 {offsets = [2, 0], sizes = [1, 48], strides = [1, 1]} : vector<3x48xf32> to vector<1x48xf32>
    %110 = vector.broadcast %109 : vector<1x48xf32> to vector<32x48xf32>
    %111 = arith.mulf %101, %110 : vector<32x48xf32>
    %112 = arith.addf %108, %111 : vector<32x48xf32>
    %c0_58 = arith.constant 0 : index
    %c0_59 = arith.constant 0 : index
    %c0_60 = arith.constant 0 : index
    %113 = vector.load %arg15[%c0_58, %c0_59, %c0_60] : memref<4x1x48xf32, #tpu.memory_space<vmem>>, vector<1x1x48xf32>
    %114 = vector.shape_cast %113 : vector<1x1x48xf32> to vector<1x48xf32>
    %115 = vector.broadcast %114 : vector<1x48xf32> to vector<32x48xf32>
    %116 = arith.addf %112, %115 : vector<32x48xf32>
    %cst_61 = arith.constant 0.000000e+00 : f32
    %117 = vector.broadcast %cst_61 : f32 to vector<32x48xf32>
    %118 = arith.cmpf oge, %116, %117 : vector<32x48xf32>
    %c0_62 = arith.constant 0 : index
    %c0_63 = arith.constant 0 : index
    %c0_64 = arith.constant 0 : index
    %119 = vector.load %arg16[%c0_62, %c0_63, %c0_64] : memref<4x1x48xf32, #tpu.memory_space<vmem>>, vector<1x1x48xf32>
    %120 = vector.shape_cast %119 : vector<1x1x48xf32> to vector<1x48xf32>
    %121 = vector.broadcast %120 : vector<1x48xf32> to vector<32x48xf32>
    %122 = arith.mulf %121, %116 : vector<32x48xf32>
    %123 = arith.select %118, %116, %122 : vector<32x48xi1>, vector<32x48xf32>
    %c0_65 = arith.constant 0 : index
    %c0_66 = arith.constant 0 : index
    %c0_67 = arith.constant 0 : index
    %124 = vector.load %arg17[%c0_65, %c0_66, %c0_67] : memref<4x1x48xf32, #tpu.memory_space<vmem>>, vector<1x1x48xf32>
    %125 = vector.shape_cast %124 : vector<1x1x48xf32> to vector<1x48xf32>
    %c0_68 = arith.constant 0 : index
    %c0_69 = arith.constant 0 : index
    %c0_70 = arith.constant 0 : index
    %126 = vector.load %arg18[%c0_68, %c0_69, %c0_70] : memref<4x1x48xf32, #tpu.memory_space<vmem>>, vector<1x1x48xf32>
    %127 = vector.shape_cast %126 : vector<1x1x48xf32> to vector<1x48xf32>
    %cst_71 = arith.constant dense<0.000000e+00> : vector<32xf32>
    %128 = vector.multi_reduction <add>, %123, %cst_71 [1] : vector<32x48xf32> to vector<32xf32>
    %129 = vector.shape_cast %128 : vector<32xf32> to vector<32x1xf32>
    %cst_72 = arith.constant dense<0.000000e+00> : vector<1xf32>
    %130 = vector.multi_reduction <add>, %129, %cst_72 [0] : vector<32x1xf32> to vector<1xf32>
    %131 = vector.shape_cast %130 : vector<1xf32> to vector<1x1xf32>
    %cst_73 = arith.constant 6.51041686E-4 : f32
    %132 = vector.broadcast %cst_73 : f32 to vector<1x1xf32>
    %133 = arith.mulf %131, %132 : vector<1x1xf32>
    %134 = vector.broadcast %133 : vector<1x1xf32> to vector<32x48xf32>
    %135 = arith.subf %123, %134 : vector<32x48xf32>
    %136 = arith.mulf %135, %135 : vector<32x48xf32>
    %cst_74 = arith.constant dense<0.000000e+00> : vector<32xf32>
    %137 = vector.multi_reduction <add>, %136, %cst_74 [1] : vector<32x48xf32> to vector<32xf32>
    %138 = vector.shape_cast %137 : vector<32xf32> to vector<32x1xf32>
    %cst_75 = arith.constant dense<0.000000e+00> : vector<1xf32>
    %139 = vector.multi_reduction <add>, %138, %cst_75 [0] : vector<32x1xf32> to vector<1xf32>
    %140 = vector.shape_cast %139 : vector<1xf32> to vector<1x1xf32>
    %cst_76 = arith.constant 6.51041686E-4 : f32
    %141 = vector.broadcast %cst_76 : f32 to vector<1x1xf32>
    %142 = arith.mulf %140, %141 : vector<1x1xf32>
    %cst_77 = arith.constant 9.99999993E-9 : f32
    %143 = vector.broadcast %cst_77 : f32 to vector<1x1xf32>
    %144 = arith.addf %142, %143 : vector<1x1xf32>
    %145 = math.rsqrt %144 : vector<1x1xf32>
    %146 = vector.broadcast %145 : vector<1x1xf32> to vector<32x48xf32>
    %147 = arith.mulf %135, %146 : vector<32x48xf32>
    %148 = vector.broadcast %125 : vector<1x48xf32> to vector<32x48xf32>
    %149 = arith.mulf %147, %148 : vector<32x48xf32>
    %150 = vector.broadcast %127 : vector<1x48xf32> to vector<32x48xf32>
    %151 = arith.addf %149, %150 : vector<32x48xf32>
    %152 = arith.truncf %151 : vector<32x48xf32> to vector<32x48xbf16>
    %c0_78 = arith.constant 0 : index
    %c0_79 = arith.constant 0 : index
    %c0_80 = arith.constant 0 : index
    %153 = vector.load %arg19[%c0_78, %c0_79, %c0_80] : memref<4x48x32xbf16, #tpu.memory_space<vmem>>, vector<1x48x32xbf16>
    %154 = vector.shape_cast %153 : vector<1x48x32xbf16> to vector<48x32xbf16>
    %cst_81 = arith.constant dense<0.000000e+00> : vector<32x32xf32>
    %155 = tpu.matmul %152, %154, %cst_81 {dimension_numbers = #tpu.dot_dimension_numbers<[1], [0], [0], [1], [0, 0, 1, 1], [], []>} : vector<32x48xbf16>, vector<48x32xbf16>, vector<32x32xf32> -> vector<32x32xf32>
    %c0_82 = arith.constant 0 : index
    %c0_83 = arith.constant 0 : index
    %c0_84 = arith.constant 0 : index
    %156 = vector.load %arg20[%c0_82, %c0_83, %c0_84] : memref<4x1x32xf32, #tpu.memory_space<vmem>>, vector<1x1x32xf32>
    %157 = vector.shape_cast %156 : vector<1x1x32xf32> to vector<1x32xf32>
    %158 = vector.broadcast %157 : vector<1x32xf32> to vector<32x32xf32>
    %159 = arith.addf %155, %158 : vector<32x32xf32>
    %160 = arith.truncf %159 : vector<32x32xf32> to vector<32x32xbf16>
    %c1 = arith.constant 1 : index
    %c0_85 = arith.constant 0 : index
    %c0_86 = arith.constant 0 : index
    %161 = vector.load %arg8[%c1, %c0_85, %c0_86] : memref<4x32x48xbf16, #tpu.memory_space<vmem>>, vector<1x32x48xbf16>
    %162 = vector.shape_cast %161 : vector<1x32x48xbf16> to vector<32x48xbf16>
    %cst_87 = arith.constant dense<0.000000e+00> : vector<32x48xf32>
    %163 = tpu.matmul %160, %162, %cst_87 {dimension_numbers = #tpu.dot_dimension_numbers<[1], [0], [0], [1], [0, 0, 1, 1], [], []>} : vector<32x32xbf16>, vector<32x48xbf16>, vector<32x48xf32> -> vector<32x48xf32>
    %c1_88 = arith.constant 1 : index
    %c0_89 = arith.constant 0 : index
    %c0_90 = arith.constant 0 : index
    %164 = vector.load %arg10[%c1_88, %c0_89, %c0_90] : memref<4x1x48xf32, #tpu.memory_space<vmem>>, vector<1x1x48xf32>
    %165 = vector.shape_cast %164 : vector<1x1x48xf32> to vector<1x48xf32>
    %166 = vector.broadcast %165 : vector<1x48xf32> to vector<32x48xf32>
    %167 = arith.addf %163, %166 : vector<32x48xf32>
    %cst_91 = arith.constant 0.000000e+00 : f32
    %168 = vector.broadcast %cst_91 : f32 to vector<32x48xf32>
    %169 = arith.cmpf oge, %167, %168 : vector<32x48xf32>
    %c1_92 = arith.constant 1 : index
    %c0_93 = arith.constant 0 : index
    %c0_94 = arith.constant 0 : index
    %170 = vector.load %arg11[%c1_92, %c0_93, %c0_94] : memref<4x1x48xf32, #tpu.memory_space<vmem>>, vector<1x1x48xf32>
    %171 = vector.shape_cast %170 : vector<1x1x48xf32> to vector<1x48xf32>
    %172 = vector.broadcast %171 : vector<1x48xf32> to vector<32x48xf32>
    %173 = arith.mulf %172, %167 : vector<32x48xf32>
    %174 = arith.select %169, %167, %173 : vector<32x48xi1>, vector<32x48xf32>
    %c1_95 = arith.constant 1 : index
    %c0_96 = arith.constant 0 : index
    %c0_97 = arith.constant 0 : index
    %175 = vector.load %arg12[%c1_95, %c0_96, %c0_97] : memref<4x1x48xf32, #tpu.memory_space<vmem>>, vector<1x1x48xf32>
    %176 = vector.shape_cast %175 : vector<1x1x48xf32> to vector<1x48xf32>
    %c1_98 = arith.constant 1 : index
    %c0_99 = arith.constant 0 : index
    %c0_100 = arith.constant 0 : index
    %177 = vector.load %arg13[%c1_98, %c0_99, %c0_100] : memref<4x1x48xf32, #tpu.memory_space<vmem>>, vector<1x1x48xf32>
    %178 = vector.shape_cast %177 : vector<1x1x48xf32> to vector<1x48xf32>
    %cst_101 = arith.constant dense<0.000000e+00> : vector<32xf32>
    %179 = vector.multi_reduction <add>, %174, %cst_101 [1] : vector<32x48xf32> to vector<32xf32>
    %180 = vector.shape_cast %179 : vector<32xf32> to vector<32x1xf32>
    %cst_102 = arith.constant dense<0.000000e+00> : vector<1xf32>
    %181 = vector.multi_reduction <add>, %180, %cst_102 [0] : vector<32x1xf32> to vector<1xf32>
    %182 = vector.shape_cast %181 : vector<1xf32> to vector<1x1xf32>
    %cst_103 = arith.constant 6.51041686E-4 : f32
    %183 = vector.broadcast %cst_103 : f32 to vector<1x1xf32>
    %184 = arith.mulf %182, %183 : vector<1x1xf32>
    %185 = vector.broadcast %184 : vector<1x1xf32> to vector<32x48xf32>
    %186 = arith.subf %174, %185 : vector<32x48xf32>
    %187 = arith.mulf %186, %186 : vector<32x48xf32>
    %cst_104 = arith.constant dense<0.000000e+00> : vector<32xf32>
    %188 = vector.multi_reduction <add>, %187, %cst_104 [1] : vector<32x48xf32> to vector<32xf32>
    %189 = vector.shape_cast %188 : vector<32xf32> to vector<32x1xf32>
    %cst_105 = arith.constant dense<0.000000e+00> : vector<1xf32>
    %190 = vector.multi_reduction <add>, %189, %cst_105 [0] : vector<32x1xf32> to vector<1xf32>
    %191 = vector.shape_cast %190 : vector<1xf32> to vector<1x1xf32>
    %cst_106 = arith.constant 6.51041686E-4 : f32
    %192 = vector.broadcast %cst_106 : f32 to vector<1x1xf32>
    %193 = arith.mulf %191, %192 : vector<1x1xf32>
    %cst_107 = arith.constant 9.99999993E-9 : f32
    %194 = vector.broadcast %cst_107 : f32 to vector<1x1xf32>
    %195 = arith.addf %193, %194 : vector<1x1xf32>
    %196 = math.rsqrt %195 : vector<1x1xf32>
    %197 = vector.broadcast %196 : vector<1x1xf32> to vector<32x48xf32>
    %198 = arith.mulf %186, %197 : vector<32x48xf32>
    %199 = vector.broadcast %176 : vector<1x48xf32> to vector<32x48xf32>
    %200 = arith.mulf %198, %199 : vector<32x48xf32>
    %201 = vector.broadcast %178 : vector<1x48xf32> to vector<32x48xf32>
    %202 = arith.addf %200, %201 : vector<32x48xf32>
    %c1_108 = arith.constant 1 : index
    %c0_109 = arith.constant 0 : index
    %c0_110 = arith.constant 0 : index
    %203 = vector.load %arg14[%c1_108, %c0_109, %c0_110] : memref<4x3x48xf32, #tpu.memory_space<vmem>>, vector<1x3x48xf32>
    %204 = vector.shape_cast %203 : vector<1x3x48xf32> to vector<3x48xf32>
    %c2_i32 = arith.constant 2 : i32
    %205 = vector.broadcast %c2_i32 : i32 to vector<32x48xi32>
    %206 = arith.cmpi sge, %41, %205 : vector<32x48xi32>
    %c2_i32_111 = arith.constant 2 : i32
    %207 = tpu.dynamic_rotate %202 by %c2_i32_111 dim 0 : vector<32x48xf32>, i32 -> vector<32x48xf32>
    %cst_112 = arith.constant 0.000000e+00 : f32
    %208 = vector.broadcast %cst_112 : f32 to vector<32x48xf32>
    %209 = arith.select %206, %207, %208 : vector<32x48xi1>, vector<32x48xf32>
    %c30_i32 = arith.constant 30 : i32
    %210 = vector.broadcast %c30_i32 : i32 to vector<32x48xi32>
    %211 = arith.cmpi slt, %41, %210 : vector<32x48xi32>
    %c30_i32_113 = arith.constant 30 : i32
    %212 = tpu.dynamic_rotate %202 by %c30_i32_113 dim 0 : vector<32x48xf32>, i32 -> vector<32x48xf32>
    %cst_114 = arith.constant 0.000000e+00 : f32
    %213 = vector.broadcast %cst_114 : f32 to vector<32x48xf32>
    %214 = arith.select %211, %212, %213 : vector<32x48xi1>, vector<32x48xf32>
    %215 = vector.extract_strided_slice %204 {offsets = [0, 0], sizes = [1, 48], strides = [1, 1]} : vector<3x48xf32> to vector<1x48xf32>
    %216 = vector.broadcast %215 : vector<1x48xf32> to vector<32x48xf32>
    %217 = arith.mulf %209, %216 : vector<32x48xf32>
    %218 = vector.extract_strided_slice %204 {offsets = [1, 0], sizes = [1, 48], strides = [1, 1]} : vector<3x48xf32> to vector<1x48xf32>
    %219 = vector.broadcast %218 : vector<1x48xf32> to vector<32x48xf32>
    %220 = arith.mulf %202, %219 : vector<32x48xf32>
    %221 = arith.addf %217, %220 : vector<32x48xf32>
    %222 = vector.extract_strided_slice %204 {offsets = [2, 0], sizes = [1, 48], strides = [1, 1]} : vector<3x48xf32> to vector<1x48xf32>
    %223 = vector.broadcast %222 : vector<1x48xf32> to vector<32x48xf32>
    %224 = arith.mulf %214, %223 : vector<32x48xf32>
    %225 = arith.addf %221, %224 : vector<32x48xf32>
    %c1_115 = arith.constant 1 : index
    %c0_116 = arith.constant 0 : index
    %c0_117 = arith.constant 0 : index
    %226 = vector.load %arg15[%c1_115, %c0_116, %c0_117] : memref<4x1x48xf32, #tpu.memory_space<vmem>>, vector<1x1x48xf32>
    %227 = vector.shape_cast %226 : vector<1x1x48xf32> to vector<1x48xf32>
    %228 = vector.broadcast %227 : vector<1x48xf32> to vector<32x48xf32>
    %229 = arith.addf %225, %228 : vector<32x48xf32>
    %cst_118 = arith.constant 0.000000e+00 : f32
    %230 = vector.broadcast %cst_118 : f32 to vector<32x48xf32>
    %231 = arith.cmpf oge, %229, %230 : vector<32x48xf32>
    %c1_119 = arith.constant 1 : index
    %c0_120 = arith.constant 0 : index
    %c0_121 = arith.constant 0 : index
    %232 = vector.load %arg16[%c1_119, %c0_120, %c0_121] : memref<4x1x48xf32, #tpu.memory_space<vmem>>, vector<1x1x48xf32>
    %233 = vector.shape_cast %232 : vector<1x1x48xf32> to vector<1x48xf32>
    %234 = vector.broadcast %233 : vector<1x48xf32> to vector<32x48xf32>
    %235 = arith.mulf %234, %229 : vector<32x48xf32>
    %236 = arith.select %231, %229, %235 : vector<32x48xi1>, vector<32x48xf32>
    %c1_122 = arith.constant 1 : index
    %c0_123 = arith.constant 0 : index
    %c0_124 = arith.constant 0 : index
    %237 = vector.load %arg17[%c1_122, %c0_123, %c0_124] : memref<4x1x48xf32, #tpu.memory_space<vmem>>, vector<1x1x48xf32>
    %238 = vector.shape_cast %237 : vector<1x1x48xf32> to vector<1x48xf32>
    %c1_125 = arith.constant 1 : index
    %c0_126 = arith.constant 0 : index
    %c0_127 = arith.constant 0 : index
    %239 = vector.load %arg18[%c1_125, %c0_126, %c0_127] : memref<4x1x48xf32, #tpu.memory_space<vmem>>, vector<1x1x48xf32>
    %240 = vector.shape_cast %239 : vector<1x1x48xf32> to vector<1x48xf32>
    %cst_128 = arith.constant dense<0.000000e+00> : vector<32xf32>
    %241 = vector.multi_reduction <add>, %236, %cst_128 [1] : vector<32x48xf32> to vector<32xf32>
    %242 = vector.shape_cast %241 : vector<32xf32> to vector<32x1xf32>
    %cst_129 = arith.constant dense<0.000000e+00> : vector<1xf32>
    %243 = vector.multi_reduction <add>, %242, %cst_129 [0] : vector<32x1xf32> to vector<1xf32>
    %244 = vector.shape_cast %243 : vector<1xf32> to vector<1x1xf32>
    %cst_130 = arith.constant 6.51041686E-4 : f32
    %245 = vector.broadcast %cst_130 : f32 to vector<1x1xf32>
    %246 = arith.mulf %244, %245 : vector<1x1xf32>
    %247 = vector.broadcast %246 : vector<1x1xf32> to vector<32x48xf32>
    %248 = arith.subf %236, %247 : vector<32x48xf32>
    %249 = arith.mulf %248, %248 : vector<32x48xf32>
    %cst_131 = arith.constant dense<0.000000e+00> : vector<32xf32>
    %250 = vector.multi_reduction <add>, %249, %cst_131 [1] : vector<32x48xf32> to vector<32xf32>
    %251 = vector.shape_cast %250 : vector<32xf32> to vector<32x1xf32>
    %cst_132 = arith.constant dense<0.000000e+00> : vector<1xf32>
    %252 = vector.multi_reduction <add>, %251, %cst_132 [0] : vector<32x1xf32> to vector<1xf32>
    %253 = vector.shape_cast %252 : vector<1xf32> to vector<1x1xf32>
    %cst_133 = arith.constant 6.51041686E-4 : f32
    %254 = vector.broadcast %cst_133 : f32 to vector<1x1xf32>
    %255 = arith.mulf %253, %254 : vector<1x1xf32>
    %cst_134 = arith.constant 9.99999993E-9 : f32
    %256 = vector.broadcast %cst_134 : f32 to vector<1x1xf32>
    %257 = arith.addf %255, %256 : vector<1x1xf32>
    %258 = math.rsqrt %257 : vector<1x1xf32>
    %259 = vector.broadcast %258 : vector<1x1xf32> to vector<32x48xf32>
    %260 = arith.mulf %248, %259 : vector<32x48xf32>
    %261 = vector.broadcast %238 : vector<1x48xf32> to vector<32x48xf32>
    %262 = arith.mulf %260, %261 : vector<32x48xf32>
    %263 = vector.broadcast %240 : vector<1x48xf32> to vector<32x48xf32>
    %264 = arith.addf %262, %263 : vector<32x48xf32>
    %265 = arith.truncf %264 : vector<32x48xf32> to vector<32x48xbf16>
    %c1_135 = arith.constant 1 : index
    %c0_136 = arith.constant 0 : index
    %c0_137 = arith.constant 0 : index
    %266 = vector.load %arg19[%c1_135, %c0_136, %c0_137] : memref<4x48x32xbf16, #tpu.memory_space<vmem>>, vector<1x48x32xbf16>
    %267 = vector.shape_cast %266 : vector<1x48x32xbf16> to vector<48x32xbf16>
    %cst_138 = arith.constant dense<0.000000e+00> : vector<32x32xf32>
    %268 = tpu.matmul %265, %267, %cst_138 {dimension_numbers = #tpu.dot_dimension_numbers<[1], [0], [0], [1], [0, 0, 1, 1], [], []>} : vector<32x48xbf16>, vector<48x32xbf16>, vector<32x32xf32> -> vector<32x32xf32>
    %c1_139 = arith.constant 1 : index
    %c0_140 = arith.constant 0 : index
    %c0_141 = arith.constant 0 : index
    %269 = vector.load %arg20[%c1_139, %c0_140, %c0_141] : memref<4x1x32xf32, #tpu.memory_space<vmem>>, vector<1x1x32xf32>
    %270 = vector.shape_cast %269 : vector<1x1x32xf32> to vector<1x32xf32>
    %271 = vector.broadcast %270 : vector<1x32xf32> to vector<32x32xf32>
    %272 = arith.addf %268, %271 : vector<32x32xf32>
    %273 = arith.addf %272, %159 : vector<32x32xf32>
    %274 = arith.truncf %273 : vector<32x32xf32> to vector<32x32xbf16>
    %c2 = arith.constant 2 : index
    %c0_142 = arith.constant 0 : index
    %c0_143 = arith.constant 0 : index
    %275 = vector.load %arg8[%c2, %c0_142, %c0_143] : memref<4x32x48xbf16, #tpu.memory_space<vmem>>, vector<1x32x48xbf16>
    %276 = vector.shape_cast %275 : vector<1x32x48xbf16> to vector<32x48xbf16>
    %cst_144 = arith.constant dense<0.000000e+00> : vector<32x48xf32>
    %277 = tpu.matmul %274, %276, %cst_144 {dimension_numbers = #tpu.dot_dimension_numbers<[1], [0], [0], [1], [0, 0, 1, 1], [], []>} : vector<32x32xbf16>, vector<32x48xbf16>, vector<32x48xf32> -> vector<32x48xf32>
    %c2_145 = arith.constant 2 : index
    %c0_146 = arith.constant 0 : index
    %c0_147 = arith.constant 0 : index
    %278 = vector.load %arg10[%c2_145, %c0_146, %c0_147] : memref<4x1x48xf32, #tpu.memory_space<vmem>>, vector<1x1x48xf32>
    %279 = vector.shape_cast %278 : vector<1x1x48xf32> to vector<1x48xf32>
    %280 = vector.broadcast %279 : vector<1x48xf32> to vector<32x48xf32>
    %281 = arith.addf %277, %280 : vector<32x48xf32>
    %c2_148 = arith.constant 2 : index
    %c0_149 = arith.constant 0 : index
    %c0_150 = arith.constant 0 : index
    %282 = vector.load %arg9[%c2_148, %c0_149, %c0_150] : memref<4x24x48xbf16, #tpu.memory_space<vmem>>, vector<1x24x48xbf16>
    %283 = vector.shape_cast %282 : vector<1x24x48xbf16> to vector<24x48xbf16>
    %cst_151 = arith.constant dense<0.000000e+00> : vector<1x48xf32>
    %284 = tpu.matmul %40, %283, %cst_151 {dimension_numbers = #tpu.dot_dimension_numbers<[1], [0], [0], [1], [0, 0, 1, 1], [], []>} : vector<1x24xbf16>, vector<24x48xbf16>, vector<1x48xf32> -> vector<1x48xf32>
    %285 = vector.broadcast %284 : vector<1x48xf32> to vector<32x48xf32>
    %286 = arith.addf %281, %285 : vector<32x48xf32>
    %cst_152 = arith.constant 0.000000e+00 : f32
    %287 = vector.broadcast %cst_152 : f32 to vector<32x48xf32>
    %288 = arith.cmpf oge, %286, %287 : vector<32x48xf32>
    %c2_153 = arith.constant 2 : index
    %c0_154 = arith.constant 0 : index
    %c0_155 = arith.constant 0 : index
    %289 = vector.load %arg11[%c2_153, %c0_154, %c0_155] : memref<4x1x48xf32, #tpu.memory_space<vmem>>, vector<1x1x48xf32>
    %290 = vector.shape_cast %289 : vector<1x1x48xf32> to vector<1x48xf32>
    %291 = vector.broadcast %290 : vector<1x48xf32> to vector<32x48xf32>
    %292 = arith.mulf %291, %286 : vector<32x48xf32>
    %293 = arith.select %288, %286, %292 : vector<32x48xi1>, vector<32x48xf32>
    %c2_156 = arith.constant 2 : index
    %c0_157 = arith.constant 0 : index
    %c0_158 = arith.constant 0 : index
    %294 = vector.load %arg12[%c2_156, %c0_157, %c0_158] : memref<4x1x48xf32, #tpu.memory_space<vmem>>, vector<1x1x48xf32>
    %295 = vector.shape_cast %294 : vector<1x1x48xf32> to vector<1x48xf32>
    %c2_159 = arith.constant 2 : index
    %c0_160 = arith.constant 0 : index
    %c0_161 = arith.constant 0 : index
    %296 = vector.load %arg13[%c2_159, %c0_160, %c0_161] : memref<4x1x48xf32, #tpu.memory_space<vmem>>, vector<1x1x48xf32>
    %297 = vector.shape_cast %296 : vector<1x1x48xf32> to vector<1x48xf32>
    %cst_162 = arith.constant dense<0.000000e+00> : vector<32xf32>
    %298 = vector.multi_reduction <add>, %293, %cst_162 [1] : vector<32x48xf32> to vector<32xf32>
    %299 = vector.shape_cast %298 : vector<32xf32> to vector<32x1xf32>
    %cst_163 = arith.constant dense<0.000000e+00> : vector<1xf32>
    %300 = vector.multi_reduction <add>, %299, %cst_163 [0] : vector<32x1xf32> to vector<1xf32>
    %301 = vector.shape_cast %300 : vector<1xf32> to vector<1x1xf32>
    %cst_164 = arith.constant 6.51041686E-4 : f32
    %302 = vector.broadcast %cst_164 : f32 to vector<1x1xf32>
    %303 = arith.mulf %301, %302 : vector<1x1xf32>
    %304 = vector.broadcast %303 : vector<1x1xf32> to vector<32x48xf32>
    %305 = arith.subf %293, %304 : vector<32x48xf32>
    %306 = arith.mulf %305, %305 : vector<32x48xf32>
    %cst_165 = arith.constant dense<0.000000e+00> : vector<32xf32>
    %307 = vector.multi_reduction <add>, %306, %cst_165 [1] : vector<32x48xf32> to vector<32xf32>
    %308 = vector.shape_cast %307 : vector<32xf32> to vector<32x1xf32>
    %cst_166 = arith.constant dense<0.000000e+00> : vector<1xf32>
    %309 = vector.multi_reduction <add>, %308, %cst_166 [0] : vector<32x1xf32> to vector<1xf32>
    %310 = vector.shape_cast %309 : vector<1xf32> to vector<1x1xf32>
    %cst_167 = arith.constant 6.51041686E-4 : f32
    %311 = vector.broadcast %cst_167 : f32 to vector<1x1xf32>
    %312 = arith.mulf %310, %311 : vector<1x1xf32>
    %cst_168 = arith.constant 9.99999993E-9 : f32
    %313 = vector.broadcast %cst_168 : f32 to vector<1x1xf32>
    %314 = arith.addf %312, %313 : vector<1x1xf32>
    %315 = math.rsqrt %314 : vector<1x1xf32>
    %316 = vector.broadcast %315 : vector<1x1xf32> to vector<32x48xf32>
    %317 = arith.mulf %305, %316 : vector<32x48xf32>
    %318 = vector.broadcast %295 : vector<1x48xf32> to vector<32x48xf32>
    %319 = arith.mulf %317, %318 : vector<32x48xf32>
    %320 = vector.broadcast %297 : vector<1x48xf32> to vector<32x48xf32>
    %321 = arith.addf %319, %320 : vector<32x48xf32>
    %c2_169 = arith.constant 2 : index
    %c0_170 = arith.constant 0 : index
    %c0_171 = arith.constant 0 : index
    %322 = vector.load %arg14[%c2_169, %c0_170, %c0_171] : memref<4x3x48xf32, #tpu.memory_space<vmem>>, vector<1x3x48xf32>
    %323 = vector.shape_cast %322 : vector<1x3x48xf32> to vector<3x48xf32>
    %c1_i32_172 = arith.constant 1 : i32
    %324 = vector.broadcast %c1_i32_172 : i32 to vector<32x48xi32>
    %325 = arith.cmpi sge, %41, %324 : vector<32x48xi32>
    %c1_i32_173 = arith.constant 1 : i32
    %326 = tpu.dynamic_rotate %321 by %c1_i32_173 dim 0 : vector<32x48xf32>, i32 -> vector<32x48xf32>
    %cst_174 = arith.constant 0.000000e+00 : f32
    %327 = vector.broadcast %cst_174 : f32 to vector<32x48xf32>
    %328 = arith.select %325, %326, %327 : vector<32x48xi1>, vector<32x48xf32>
    %c31_i32_175 = arith.constant 31 : i32
    %329 = vector.broadcast %c31_i32_175 : i32 to vector<32x48xi32>
    %330 = arith.cmpi slt, %41, %329 : vector<32x48xi32>
    %c31_i32_176 = arith.constant 31 : i32
    %331 = tpu.dynamic_rotate %321 by %c31_i32_176 dim 0 : vector<32x48xf32>, i32 -> vector<32x48xf32>
    %cst_177 = arith.constant 0.000000e+00 : f32
    %332 = vector.broadcast %cst_177 : f32 to vector<32x48xf32>
    %333 = arith.select %330, %331, %332 : vector<32x48xi1>, vector<32x48xf32>
    %334 = vector.extract_strided_slice %323 {offsets = [0, 0], sizes = [1, 48], strides = [1, 1]} : vector<3x48xf32> to vector<1x48xf32>
    %335 = vector.broadcast %334 : vector<1x48xf32> to vector<32x48xf32>
    %336 = arith.mulf %328, %335 : vector<32x48xf32>
    %337 = vector.extract_strided_slice %323 {offsets = [1, 0], sizes = [1, 48], strides = [1, 1]} : vector<3x48xf32> to vector<1x48xf32>
    %338 = vector.broadcast %337 : vector<1x48xf32> to vector<32x48xf32>
    %339 = arith.mulf %321, %338 : vector<32x48xf32>
    %340 = arith.addf %336, %339 : vector<32x48xf32>
    %341 = vector.extract_strided_slice %323 {offsets = [2, 0], sizes = [1, 48], strides = [1, 1]} : vector<3x48xf32> to vector<1x48xf32>
    %342 = vector.broadcast %341 : vector<1x48xf32> to vector<32x48xf32>
    %343 = arith.mulf %333, %342 : vector<32x48xf32>
    %344 = arith.addf %340, %343 : vector<32x48xf32>
    %c2_178 = arith.constant 2 : index
    %c0_179 = arith.constant 0 : index
    %c0_180 = arith.constant 0 : index
    %345 = vector.load %arg15[%c2_178, %c0_179, %c0_180] : memref<4x1x48xf32, #tpu.memory_space<vmem>>, vector<1x1x48xf32>
    %346 = vector.shape_cast %345 : vector<1x1x48xf32> to vector<1x48xf32>
    %347 = vector.broadcast %346 : vector<1x48xf32> to vector<32x48xf32>
    %348 = arith.addf %344, %347 : vector<32x48xf32>
    %cst_181 = arith.constant 0.000000e+00 : f32
    %349 = vector.broadcast %cst_181 : f32 to vector<32x48xf32>
    %350 = arith.cmpf oge, %348, %349 : vector<32x48xf32>
    %c2_182 = arith.constant 2 : index
    %c0_183 = arith.constant 0 : index
    %c0_184 = arith.constant 0 : index
    %351 = vector.load %arg16[%c2_182, %c0_183, %c0_184] : memref<4x1x48xf32, #tpu.memory_space<vmem>>, vector<1x1x48xf32>
    %352 = vector.shape_cast %351 : vector<1x1x48xf32> to vector<1x48xf32>
    %353 = vector.broadcast %352 : vector<1x48xf32> to vector<32x48xf32>
    %354 = arith.mulf %353, %348 : vector<32x48xf32>
    %355 = arith.select %350, %348, %354 : vector<32x48xi1>, vector<32x48xf32>
    %c2_185 = arith.constant 2 : index
    %c0_186 = arith.constant 0 : index
    %c0_187 = arith.constant 0 : index
    %356 = vector.load %arg17[%c2_185, %c0_186, %c0_187] : memref<4x1x48xf32, #tpu.memory_space<vmem>>, vector<1x1x48xf32>
    %357 = vector.shape_cast %356 : vector<1x1x48xf32> to vector<1x48xf32>
    %c2_188 = arith.constant 2 : index
    %c0_189 = arith.constant 0 : index
    %c0_190 = arith.constant 0 : index
    %358 = vector.load %arg18[%c2_188, %c0_189, %c0_190] : memref<4x1x48xf32, #tpu.memory_space<vmem>>, vector<1x1x48xf32>
    %359 = vector.shape_cast %358 : vector<1x1x48xf32> to vector<1x48xf32>
    %cst_191 = arith.constant dense<0.000000e+00> : vector<32xf32>
    %360 = vector.multi_reduction <add>, %355, %cst_191 [1] : vector<32x48xf32> to vector<32xf32>
    %361 = vector.shape_cast %360 : vector<32xf32> to vector<32x1xf32>
    %cst_192 = arith.constant dense<0.000000e+00> : vector<1xf32>
    %362 = vector.multi_reduction <add>, %361, %cst_192 [0] : vector<32x1xf32> to vector<1xf32>
    %363 = vector.shape_cast %362 : vector<1xf32> to vector<1x1xf32>
    %cst_193 = arith.constant 6.51041686E-4 : f32
    %364 = vector.broadcast %cst_193 : f32 to vector<1x1xf32>
    %365 = arith.mulf %363, %364 : vector<1x1xf32>
    %366 = vector.broadcast %365 : vector<1x1xf32> to vector<32x48xf32>
    %367 = arith.subf %355, %366 : vector<32x48xf32>
    %368 = arith.mulf %367, %367 : vector<32x48xf32>
    %cst_194 = arith.constant dense<0.000000e+00> : vector<32xf32>
    %369 = vector.multi_reduction <add>, %368, %cst_194 [1] : vector<32x48xf32> to vector<32xf32>
    %370 = vector.shape_cast %369 : vector<32xf32> to vector<32x1xf32>
    %cst_195 = arith.constant dense<0.000000e+00> : vector<1xf32>
    %371 = vector.multi_reduction <add>, %370, %cst_195 [0] : vector<32x1xf32> to vector<1xf32>
    %372 = vector.shape_cast %371 : vector<1xf32> to vector<1x1xf32>
    %cst_196 = arith.constant 6.51041686E-4 : f32
    %373 = vector.broadcast %cst_196 : f32 to vector<1x1xf32>
    %374 = arith.mulf %372, %373 : vector<1x1xf32>
    %cst_197 = arith.constant 9.99999993E-9 : f32
    %375 = vector.broadcast %cst_197 : f32 to vector<1x1xf32>
    %376 = arith.addf %374, %375 : vector<1x1xf32>
    %377 = math.rsqrt %376 : vector<1x1xf32>
    %378 = vector.broadcast %377 : vector<1x1xf32> to vector<32x48xf32>
    %379 = arith.mulf %367, %378 : vector<32x48xf32>
    %380 = vector.broadcast %357 : vector<1x48xf32> to vector<32x48xf32>
    %381 = arith.mulf %379, %380 : vector<32x48xf32>
    %382 = vector.broadcast %359 : vector<1x48xf32> to vector<32x48xf32>
    %383 = arith.addf %381, %382 : vector<32x48xf32>
    %384 = arith.truncf %383 : vector<32x48xf32> to vector<32x48xbf16>
    %c2_198 = arith.constant 2 : index
    %c0_199 = arith.constant 0 : index
    %c0_200 = arith.constant 0 : index
    %385 = vector.load %arg19[%c2_198, %c0_199, %c0_200] : memref<4x48x32xbf16, #tpu.memory_space<vmem>>, vector<1x48x32xbf16>
    %386 = vector.shape_cast %385 : vector<1x48x32xbf16> to vector<48x32xbf16>
    %cst_201 = arith.constant dense<0.000000e+00> : vector<32x32xf32>
    %387 = tpu.matmul %384, %386, %cst_201 {dimension_numbers = #tpu.dot_dimension_numbers<[1], [0], [0], [1], [0, 0, 1, 1], [], []>} : vector<32x48xbf16>, vector<48x32xbf16>, vector<32x32xf32> -> vector<32x32xf32>
    %c2_202 = arith.constant 2 : index
    %c0_203 = arith.constant 0 : index
    %c0_204 = arith.constant 0 : index
    %388 = vector.load %arg20[%c2_202, %c0_203, %c0_204] : memref<4x1x32xf32, #tpu.memory_space<vmem>>, vector<1x1x32xf32>
    %389 = vector.shape_cast %388 : vector<1x1x32xf32> to vector<1x32xf32>
    %390 = vector.broadcast %389 : vector<1x32xf32> to vector<32x32xf32>
    %391 = arith.addf %387, %390 : vector<32x32xf32>
    %392 = arith.truncf %391 : vector<32x32xf32> to vector<32x32xbf16>
    %c3 = arith.constant 3 : index
    %c0_205 = arith.constant 0 : index
    %c0_206 = arith.constant 0 : index
    %393 = vector.load %arg8[%c3, %c0_205, %c0_206] : memref<4x32x48xbf16, #tpu.memory_space<vmem>>, vector<1x32x48xbf16>
    %394 = vector.shape_cast %393 : vector<1x32x48xbf16> to vector<32x48xbf16>
    %cst_207 = arith.constant dense<0.000000e+00> : vector<32x48xf32>
    %395 = tpu.matmul %392, %394, %cst_207 {dimension_numbers = #tpu.dot_dimension_numbers<[1], [0], [0], [1], [0, 0, 1, 1], [], []>} : vector<32x32xbf16>, vector<32x48xbf16>, vector<32x48xf32> -> vector<32x48xf32>
    %c3_208 = arith.constant 3 : index
    %c0_209 = arith.constant 0 : index
    %c0_210 = arith.constant 0 : index
    %396 = vector.load %arg10[%c3_208, %c0_209, %c0_210] : memref<4x1x48xf32, #tpu.memory_space<vmem>>, vector<1x1x48xf32>
    %397 = vector.shape_cast %396 : vector<1x1x48xf32> to vector<1x48xf32>
    %398 = vector.broadcast %397 : vector<1x48xf32> to vector<32x48xf32>
    %399 = arith.addf %395, %398 : vector<32x48xf32>
    %cst_211 = arith.constant 0.000000e+00 : f32
    %400 = vector.broadcast %cst_211 : f32 to vector<32x48xf32>
    %401 = arith.cmpf oge, %399, %400 : vector<32x48xf32>
    %c3_212 = arith.constant 3 : index
    %c0_213 = arith.constant 0 : index
    %c0_214 = arith.constant 0 : index
    %402 = vector.load %arg11[%c3_212, %c0_213, %c0_214] : memref<4x1x48xf32, #tpu.memory_space<vmem>>, vector<1x1x48xf32>
    %403 = vector.shape_cast %402 : vector<1x1x48xf32> to vector<1x48xf32>
    %404 = vector.broadcast %403 : vector<1x48xf32> to vector<32x48xf32>
    %405 = arith.mulf %404, %399 : vector<32x48xf32>
    %406 = arith.select %401, %399, %405 : vector<32x48xi1>, vector<32x48xf32>
    %c3_215 = arith.constant 3 : index
    %c0_216 = arith.constant 0 : index
    %c0_217 = arith.constant 0 : index
    %407 = vector.load %arg12[%c3_215, %c0_216, %c0_217] : memref<4x1x48xf32, #tpu.memory_space<vmem>>, vector<1x1x48xf32>
    %408 = vector.shape_cast %407 : vector<1x1x48xf32> to vector<1x48xf32>
    %c3_218 = arith.constant 3 : index
    %c0_219 = arith.constant 0 : index
    %c0_220 = arith.constant 0 : index
    %409 = vector.load %arg13[%c3_218, %c0_219, %c0_220] : memref<4x1x48xf32, #tpu.memory_space<vmem>>, vector<1x1x48xf32>
    %410 = vector.shape_cast %409 : vector<1x1x48xf32> to vector<1x48xf32>
    %cst_221 = arith.constant dense<0.000000e+00> : vector<32xf32>
    %411 = vector.multi_reduction <add>, %406, %cst_221 [1] : vector<32x48xf32> to vector<32xf32>
    %412 = vector.shape_cast %411 : vector<32xf32> to vector<32x1xf32>
    %cst_222 = arith.constant dense<0.000000e+00> : vector<1xf32>
    %413 = vector.multi_reduction <add>, %412, %cst_222 [0] : vector<32x1xf32> to vector<1xf32>
    %414 = vector.shape_cast %413 : vector<1xf32> to vector<1x1xf32>
    %cst_223 = arith.constant 6.51041686E-4 : f32
    %415 = vector.broadcast %cst_223 : f32 to vector<1x1xf32>
    %416 = arith.mulf %414, %415 : vector<1x1xf32>
    %417 = vector.broadcast %416 : vector<1x1xf32> to vector<32x48xf32>
    %418 = arith.subf %406, %417 : vector<32x48xf32>
    %419 = arith.mulf %418, %418 : vector<32x48xf32>
    %cst_224 = arith.constant dense<0.000000e+00> : vector<32xf32>
    %420 = vector.multi_reduction <add>, %419, %cst_224 [1] : vector<32x48xf32> to vector<32xf32>
    %421 = vector.shape_cast %420 : vector<32xf32> to vector<32x1xf32>
    %cst_225 = arith.constant dense<0.000000e+00> : vector<1xf32>
    %422 = vector.multi_reduction <add>, %421, %cst_225 [0] : vector<32x1xf32> to vector<1xf32>
    %423 = vector.shape_cast %422 : vector<1xf32> to vector<1x1xf32>
    %cst_226 = arith.constant 6.51041686E-4 : f32
    %424 = vector.broadcast %cst_226 : f32 to vector<1x1xf32>
    %425 = arith.mulf %423, %424 : vector<1x1xf32>
    %cst_227 = arith.constant 9.99999993E-9 : f32
    %426 = vector.broadcast %cst_227 : f32 to vector<1x1xf32>
    %427 = arith.addf %425, %426 : vector<1x1xf32>
    %428 = math.rsqrt %427 : vector<1x1xf32>
    %429 = vector.broadcast %428 : vector<1x1xf32> to vector<32x48xf32>
    %430 = arith.mulf %418, %429 : vector<32x48xf32>
    %431 = vector.broadcast %408 : vector<1x48xf32> to vector<32x48xf32>
    %432 = arith.mulf %430, %431 : vector<32x48xf32>
    %433 = vector.broadcast %410 : vector<1x48xf32> to vector<32x48xf32>
    %434 = arith.addf %432, %433 : vector<32x48xf32>
    %c3_228 = arith.constant 3 : index
    %c0_229 = arith.constant 0 : index
    %c0_230 = arith.constant 0 : index
    %435 = vector.load %arg14[%c3_228, %c0_229, %c0_230] : memref<4x3x48xf32, #tpu.memory_space<vmem>>, vector<1x3x48xf32>
    %436 = vector.shape_cast %435 : vector<1x3x48xf32> to vector<3x48xf32>
    %c2_i32_231 = arith.constant 2 : i32
    %437 = vector.broadcast %c2_i32_231 : i32 to vector<32x48xi32>
    %438 = arith.cmpi sge, %41, %437 : vector<32x48xi32>
    %c2_i32_232 = arith.constant 2 : i32
    %439 = tpu.dynamic_rotate %434 by %c2_i32_232 dim 0 : vector<32x48xf32>, i32 -> vector<32x48xf32>
    %cst_233 = arith.constant 0.000000e+00 : f32
    %440 = vector.broadcast %cst_233 : f32 to vector<32x48xf32>
    %441 = arith.select %438, %439, %440 : vector<32x48xi1>, vector<32x48xf32>
    %c30_i32_234 = arith.constant 30 : i32
    %442 = vector.broadcast %c30_i32_234 : i32 to vector<32x48xi32>
    %443 = arith.cmpi slt, %41, %442 : vector<32x48xi32>
    %c30_i32_235 = arith.constant 30 : i32
    %444 = tpu.dynamic_rotate %434 by %c30_i32_235 dim 0 : vector<32x48xf32>, i32 -> vector<32x48xf32>
    %cst_236 = arith.constant 0.000000e+00 : f32
    %445 = vector.broadcast %cst_236 : f32 to vector<32x48xf32>
    %446 = arith.select %443, %444, %445 : vector<32x48xi1>, vector<32x48xf32>
    %447 = vector.extract_strided_slice %436 {offsets = [0, 0], sizes = [1, 48], strides = [1, 1]} : vector<3x48xf32> to vector<1x48xf32>
    %448 = vector.broadcast %447 : vector<1x48xf32> to vector<32x48xf32>
    %449 = arith.mulf %441, %448 : vector<32x48xf32>
    %450 = vector.extract_strided_slice %436 {offsets = [1, 0], sizes = [1, 48], strides = [1, 1]} : vector<3x48xf32> to vector<1x48xf32>
    %451 = vector.broadcast %450 : vector<1x48xf32> to vector<32x48xf32>
    %452 = arith.mulf %434, %451 : vector<32x48xf32>
    %453 = arith.addf %449, %452 : vector<32x48xf32>
    %454 = vector.extract_strided_slice %436 {offsets = [2, 0], sizes = [1, 48], strides = [1, 1]} : vector<3x48xf32> to vector<1x48xf32>
    %455 = vector.broadcast %454 : vector<1x48xf32> to vector<32x48xf32>
    %456 = arith.mulf %446, %455 : vector<32x48xf32>
    %457 = arith.addf %453, %456 : vector<32x48xf32>
    %c3_237 = arith.constant 3 : index
    %c0_238 = arith.constant 0 : index
    %c0_239 = arith.constant 0 : index
    %458 = vector.load %arg15[%c3_237, %c0_238, %c0_239] : memref<4x1x48xf32, #tpu.memory_space<vmem>>, vector<1x1x48xf32>
    %459 = vector.shape_cast %458 : vector<1x1x48xf32> to vector<1x48xf32>
    %460 = vector.broadcast %459 : vector<1x48xf32> to vector<32x48xf32>
    %461 = arith.addf %457, %460 : vector<32x48xf32>
    %cst_240 = arith.constant 0.000000e+00 : f32
    %462 = vector.broadcast %cst_240 : f32 to vector<32x48xf32>
    %463 = arith.cmpf oge, %461, %462 : vector<32x48xf32>
    %c3_241 = arith.constant 3 : index
    %c0_242 = arith.constant 0 : index
    %c0_243 = arith.constant 0 : index
    %464 = vector.load %arg16[%c3_241, %c0_242, %c0_243] : memref<4x1x48xf32, #tpu.memory_space<vmem>>, vector<1x1x48xf32>
    %465 = vector.shape_cast %464 : vector<1x1x48xf32> to vector<1x48xf32>
    %466 = vector.broadcast %465 : vector<1x48xf32> to vector<32x48xf32>
    %467 = arith.mulf %466, %461 : vector<32x48xf32>
    %468 = arith.select %463, %461, %467 : vector<32x48xi1>, vector<32x48xf32>
    %c3_244 = arith.constant 3 : index
    %c0_245 = arith.constant 0 : index
    %c0_246 = arith.constant 0 : index
    %469 = vector.load %arg17[%c3_244, %c0_245, %c0_246] : memref<4x1x48xf32, #tpu.memory_space<vmem>>, vector<1x1x48xf32>
    %470 = vector.shape_cast %469 : vector<1x1x48xf32> to vector<1x48xf32>
    %c3_247 = arith.constant 3 : index
    %c0_248 = arith.constant 0 : index
    %c0_249 = arith.constant 0 : index
    %471 = vector.load %arg18[%c3_247, %c0_248, %c0_249] : memref<4x1x48xf32, #tpu.memory_space<vmem>>, vector<1x1x48xf32>
    %472 = vector.shape_cast %471 : vector<1x1x48xf32> to vector<1x48xf32>
    %cst_250 = arith.constant dense<0.000000e+00> : vector<32xf32>
    %473 = vector.multi_reduction <add>, %468, %cst_250 [1] : vector<32x48xf32> to vector<32xf32>
    %474 = vector.shape_cast %473 : vector<32xf32> to vector<32x1xf32>
    %cst_251 = arith.constant dense<0.000000e+00> : vector<1xf32>
    %475 = vector.multi_reduction <add>, %474, %cst_251 [0] : vector<32x1xf32> to vector<1xf32>
    %476 = vector.shape_cast %475 : vector<1xf32> to vector<1x1xf32>
    %cst_252 = arith.constant 6.51041686E-4 : f32
    %477 = vector.broadcast %cst_252 : f32 to vector<1x1xf32>
    %478 = arith.mulf %476, %477 : vector<1x1xf32>
    %479 = vector.broadcast %478 : vector<1x1xf32> to vector<32x48xf32>
    %480 = arith.subf %468, %479 : vector<32x48xf32>
    %481 = arith.mulf %480, %480 : vector<32x48xf32>
    %cst_253 = arith.constant dense<0.000000e+00> : vector<32xf32>
    %482 = vector.multi_reduction <add>, %481, %cst_253 [1] : vector<32x48xf32> to vector<32xf32>
    %483 = vector.shape_cast %482 : vector<32xf32> to vector<32x1xf32>
    %cst_254 = arith.constant dense<0.000000e+00> : vector<1xf32>
    %484 = vector.multi_reduction <add>, %483, %cst_254 [0] : vector<32x1xf32> to vector<1xf32>
    %485 = vector.shape_cast %484 : vector<1xf32> to vector<1x1xf32>
    %cst_255 = arith.constant 6.51041686E-4 : f32
    %486 = vector.broadcast %cst_255 : f32 to vector<1x1xf32>
    %487 = arith.mulf %485, %486 : vector<1x1xf32>
    %cst_256 = arith.constant 9.99999993E-9 : f32
    %488 = vector.broadcast %cst_256 : f32 to vector<1x1xf32>
    %489 = arith.addf %487, %488 : vector<1x1xf32>
    %490 = math.rsqrt %489 : vector<1x1xf32>
    %491 = vector.broadcast %490 : vector<1x1xf32> to vector<32x48xf32>
    %492 = arith.mulf %480, %491 : vector<32x48xf32>
    %493 = vector.broadcast %470 : vector<1x48xf32> to vector<32x48xf32>
    %494 = arith.mulf %492, %493 : vector<32x48xf32>
    %495 = vector.broadcast %472 : vector<1x48xf32> to vector<32x48xf32>
    %496 = arith.addf %494, %495 : vector<32x48xf32>
    %497 = arith.truncf %496 : vector<32x48xf32> to vector<32x48xbf16>
    %c3_257 = arith.constant 3 : index
    %c0_258 = arith.constant 0 : index
    %c0_259 = arith.constant 0 : index
    %498 = vector.load %arg19[%c3_257, %c0_258, %c0_259] : memref<4x48x32xbf16, #tpu.memory_space<vmem>>, vector<1x48x32xbf16>
    %499 = vector.shape_cast %498 : vector<1x48x32xbf16> to vector<48x32xbf16>
    %cst_260 = arith.constant dense<0.000000e+00> : vector<32x32xf32>
    %500 = tpu.matmul %497, %499, %cst_260 {dimension_numbers = #tpu.dot_dimension_numbers<[1], [0], [0], [1], [0, 0, 1, 1], [], []>} : vector<32x48xbf16>, vector<48x32xbf16>, vector<32x32xf32> -> vector<32x32xf32>
    %c3_261 = arith.constant 3 : index
    %c0_262 = arith.constant 0 : index
    %c0_263 = arith.constant 0 : index
    %501 = vector.load %arg20[%c3_261, %c0_262, %c0_263] : memref<4x1x32xf32, #tpu.memory_space<vmem>>, vector<1x1x32xf32>
    %502 = vector.shape_cast %501 : vector<1x1x32xf32> to vector<1x32xf32>
    %503 = vector.broadcast %502 : vector<1x32xf32> to vector<32x32xf32>
    %504 = arith.addf %500, %503 : vector<32x32xf32>
    %505 = arith.addf %504, %391 : vector<32x32xf32>
    %506 = arith.truncf %505 : vector<32x32xf32> to vector<32x32xbf16>
    %c0_264 = arith.constant 0 : index
    %c0_265 = arith.constant 0 : index
    %507 = vector.load %arg21[%c0_264, %c0_265] : memref<32x96xbf16, #tpu.memory_space<vmem>>, vector<32x96xbf16>
    %cst_266 = arith.constant dense<0.000000e+00> : vector<32x96xf32>
    %508 = tpu.matmul %506, %507, %cst_266 {dimension_numbers = #tpu.dot_dimension_numbers<[1], [0], [0], [1], [0, 0, 1, 1], [], []>} : vector<32x32xbf16>, vector<32x96xbf16>, vector<32x96xf32> -> vector<32x96xf32>
    %c0_267 = arith.constant 0 : index
    %c0_268 = arith.constant 0 : index
    %509 = vector.load %arg22[%c0_267, %c0_268] : memref<1x96xf32, #tpu.memory_space<vmem>>, vector<1x96xf32>
    %510 = vector.broadcast %509 : vector<1x96xf32> to vector<32x96xf32>
    %511 = arith.addf %508, %510 : vector<32x96xf32>
    %512 = arith.negf %511 : vector<32x96xf32>
    %513 = math.exp %512 : vector<32x96xf32>
    %cst_269 = arith.constant 1.000000e+00 : f32
    %514 = vector.broadcast %cst_269 : f32 to vector<32x96xf32>
    %515 = arith.addf %514, %513 : vector<32x96xf32>
    %516 = arith.divf %514, %515 : vector<32x96xf32>
    %517 = arith.mulf %516, %5 : vector<32x96xf32>
    %518 = arith.truncf %517 : vector<32x96xf32> to vector<32x96xbf16>
    %c0_270 = arith.constant 0 : index
    %c0_271 = arith.constant 0 : index
    %519 = vector.load %arg23[%c0_270, %c0_271] : memref<96x260xbf16, #tpu.memory_space<vmem>>, vector<96x260xbf16>
    %cst_272 = arith.constant dense<0.000000e+00> : vector<32x260xf32>
    %520 = tpu.matmul %518, %519, %cst_272 {dimension_numbers = #tpu.dot_dimension_numbers<[1], [0], [0], [1], [0, 0, 1, 1], [], []>} : vector<32x96xbf16>, vector<96x260xbf16>, vector<32x260xf32> -> vector<32x260xf32>
    %521 = vector.extract_strided_slice %520 {offsets = [0, 0], sizes = [32, 10], strides = [1, 1]} : vector<32x260xf32> to vector<32x10xf32>
    %522 = arith.truncf %521 : vector<32x10xf32> to vector<32x10xbf16>
    %c0_273 = arith.constant 0 : index
    %c0_274 = arith.constant 0 : index
    %c0_275 = arith.constant 0 : index
    %523 = vector.load %arg24[%c0_273, %c0_274, %c0_275] : memref<2x33x32xbf16, #tpu.memory_space<vmem>>, vector<1x33x32xbf16>
    %524 = vector.shape_cast %523 : vector<1x33x32xbf16> to vector<33x32xbf16>
    %cst_276 = arith.constant dense<0.000000e+00> : vector<33x10xf32>
    %525 = tpu.matmul %524, %522, %cst_276 {dimension_numbers = #tpu.dot_dimension_numbers<[1], [0], [0], [1], [0, 0, 1, 1], [], []>} : vector<33x32xbf16>, vector<32x10xbf16>, vector<33x10xf32> -> vector<33x10xf32>
    %526 = vector.extract_strided_slice %520 {offsets = [0, 10], sizes = [32, 10], strides = [1, 1]} : vector<32x260xf32> to vector<32x10xf32>
    %527 = arith.truncf %526 : vector<32x10xf32> to vector<32x10xbf16>
    %c1_277 = arith.constant 1 : index
    %c0_278 = arith.constant 0 : index
    %c0_279 = arith.constant 0 : index
    %528 = vector.load %arg24[%c1_277, %c0_278, %c0_279] : memref<2x33x32xbf16, #tpu.memory_space<vmem>>, vector<1x33x32xbf16>
    %529 = vector.shape_cast %528 : vector<1x33x32xbf16> to vector<33x32xbf16>
    %cst_280 = arith.constant dense<0.000000e+00> : vector<33x10xf32>
    %530 = tpu.matmul %529, %527, %cst_280 {dimension_numbers = #tpu.dot_dimension_numbers<[1], [0], [0], [1], [0, 0, 1, 1], [], []>} : vector<33x32xbf16>, vector<32x10xbf16>, vector<33x10xf32> -> vector<33x10xf32>
    %531 = arith.addf %525, %530 : vector<33x10xf32>
    %532 = vector.shape_cast %531 : vector<33x10xf32> to vector<1x33x10xf32>
    %c0_281 = arith.constant 0 : index
    %c0_282 = arith.constant 0 : index
    %c0_283 = arith.constant 0 : index
    %533 = vector.load %arg27[%c0_281, %c0_282, %c0_283] : memref<1x33x10xf32, #tpu.memory_space<vmem>>, vector<1x33x10xf32>
    tpu.vector_store %arg27[%c0_281, %c0_282, %c0_283], %532 {strides = array<i32>} : memref<1x33x10xf32, #tpu.memory_space<vmem>>, vector<1x33x10xf32>,
    %534 = vector.extract_strided_slice %520 {offsets = [0, 20], sizes = [32, 10], strides = [1, 1]} : vector<32x260xf32> to vector<32x10xf32>
    %535 = arith.truncf %534 : vector<32x10xf32> to vector<32x10xbf16>
    %c0_284 = arith.constant 0 : index
    %c0_285 = arith.constant 0 : index
    %c0_286 = arith.constant 0 : index
    %536 = vector.load %arg25[%c0_284, %c0_285, %c0_286] : memref<8x39x32xbf16, #tpu.memory_space<vmem>>, vector<1x39x32xbf16>
    %537 = vector.shape_cast %536 : vector<1x39x32xbf16> to vector<39x32xbf16>
    %cst_287 = arith.constant dense<0.000000e+00> : vector<39x10xf32>
    %538 = tpu.matmul %537, %535, %cst_287 {dimension_numbers = #tpu.dot_dimension_numbers<[1], [0], [0], [1], [0, 0, 1, 1], [], []>} : vector<39x32xbf16>, vector<32x10xbf16>, vector<39x10xf32> -> vector<39x10xf32>
    %539 = vector.extract_strided_slice %520 {offsets = [0, 30], sizes = [32, 10], strides = [1, 1]} : vector<32x260xf32> to vector<32x10xf32>
    %540 = arith.truncf %539 : vector<32x10xf32> to vector<32x10xbf16>
    %c1_288 = arith.constant 1 : index
    %c0_289 = arith.constant 0 : index
    %c0_290 = arith.constant 0 : index
    %541 = vector.load %arg25[%c1_288, %c0_289, %c0_290] : memref<8x39x32xbf16, #tpu.memory_space<vmem>>, vector<1x39x32xbf16>
    %542 = vector.shape_cast %541 : vector<1x39x32xbf16> to vector<39x32xbf16>
    %cst_291 = arith.constant dense<0.000000e+00> : vector<39x10xf32>
    %543 = tpu.matmul %542, %540, %cst_291 {dimension_numbers = #tpu.dot_dimension_numbers<[1], [0], [0], [1], [0, 0, 1, 1], [], []>} : vector<39x32xbf16>, vector<32x10xbf16>, vector<39x10xf32> -> vector<39x10xf32>
    %544 = arith.addf %538, %543 : vector<39x10xf32>
    %545 = vector.extract_strided_slice %520 {offsets = [0, 40], sizes = [32, 10], strides = [1, 1]} : vector<32x260xf32> to vector<32x10xf32>
    %546 = arith.truncf %545 : vector<32x10xf32> to vector<32x10xbf16>
    %c2_292 = arith.constant 2 : index
    %c0_293 = arith.constant 0 : index
    %c0_294 = arith.constant 0 : index
    %547 = vector.load %arg25[%c2_292, %c0_293, %c0_294] : memref<8x39x32xbf16, #tpu.memory_space<vmem>>, vector<1x39x32xbf16>
    %548 = vector.shape_cast %547 : vector<1x39x32xbf16> to vector<39x32xbf16>
    %cst_295 = arith.constant dense<0.000000e+00> : vector<39x10xf32>
    %549 = tpu.matmul %548, %546, %cst_295 {dimension_numbers = #tpu.dot_dimension_numbers<[1], [0], [0], [1], [0, 0, 1, 1], [], []>} : vector<39x32xbf16>, vector<32x10xbf16>, vector<39x10xf32> -> vector<39x10xf32>
    %550 = arith.addf %544, %549 : vector<39x10xf32>
    %551 = vector.extract_strided_slice %520 {offsets = [0, 50], sizes = [32, 10], strides = [1, 1]} : vector<32x260xf32> to vector<32x10xf32>
    %552 = arith.truncf %551 : vector<32x10xf32> to vector<32x10xbf16>
    %c3_296 = arith.constant 3 : index
    %c0_297 = arith.constant 0 : index
    %c0_298 = arith.constant 0 : index
    %553 = vector.load %arg25[%c3_296, %c0_297, %c0_298] : memref<8x39x32xbf16, #tpu.memory_space<vmem>>, vector<1x39x32xbf16>
    %554 = vector.shape_cast %553 : vector<1x39x32xbf16> to vector<39x32xbf16>
    %cst_299 = arith.constant dense<0.000000e+00> : vector<39x10xf32>
    %555 = tpu.matmul %554, %552, %cst_299 {dimension_numbers = #tpu.dot_dimension_numbers<[1], [0], [0], [1], [0, 0, 1, 1], [], []>} : vector<39x32xbf16>, vector<32x10xbf16>, vector<39x10xf32> -> vector<39x10xf32>
    %556 = arith.addf %550, %555 : vector<39x10xf32>
    %557 = vector.extract_strided_slice %520 {offsets = [0, 60], sizes = [32, 10], strides = [1, 1]} : vector<32x260xf32> to vector<32x10xf32>
    %558 = arith.truncf %557 : vector<32x10xf32> to vector<32x10xbf16>
    %c4 = arith.constant 4 : index
    %c0_300 = arith.constant 0 : index
    %c0_301 = arith.constant 0 : index
    %559 = vector.load %arg25[%c4, %c0_300, %c0_301] : memref<8x39x32xbf16, #tpu.memory_space<vmem>>, vector<1x39x32xbf16>
    %560 = vector.shape_cast %559 : vector<1x39x32xbf16> to vector<39x32xbf16>
    %cst_302 = arith.constant dense<0.000000e+00> : vector<39x10xf32>
    %561 = tpu.matmul %560, %558, %cst_302 {dimension_numbers = #tpu.dot_dimension_numbers<[1], [0], [0], [1], [0, 0, 1, 1], [], []>} : vector<39x32xbf16>, vector<32x10xbf16>, vector<39x10xf32> -> vector<39x10xf32>
    %562 = arith.addf %556, %561 : vector<39x10xf32>
    %563 = vector.extract_strided_slice %520 {offsets = [0, 70], sizes = [32, 10], strides = [1, 1]} : vector<32x260xf32> to vector<32x10xf32>
    %564 = arith.truncf %563 : vector<32x10xf32> to vector<32x10xbf16>
    %c5 = arith.constant 5 : index
    %c0_303 = arith.constant 0 : index
    %c0_304 = arith.constant 0 : index
    %565 = vector.load %arg25[%c5, %c0_303, %c0_304] : memref<8x39x32xbf16, #tpu.memory_space<vmem>>, vector<1x39x32xbf16>
    %566 = vector.shape_cast %565 : vector<1x39x32xbf16> to vector<39x32xbf16>
    %cst_305 = arith.constant dense<0.000000e+00> : vector<39x10xf32>
    %567 = tpu.matmul %566, %564, %cst_305 {dimension_numbers = #tpu.dot_dimension_numbers<[1], [0], [0], [1], [0, 0, 1, 1], [], []>} : vector<39x32xbf16>, vector<32x10xbf16>, vector<39x10xf32> -> vector<39x10xf32>
    %568 = arith.addf %562, %567 : vector<39x10xf32>
    %569 = vector.extract_strided_slice %520 {offsets = [0, 80], sizes = [32, 10], strides = [1, 1]} : vector<32x260xf32> to vector<32x10xf32>
    %570 = arith.truncf %569 : vector<32x10xf32> to vector<32x10xbf16>
    %c6 = arith.constant 6 : index
    %c0_306 = arith.constant 0 : index
    %c0_307 = arith.constant 0 : index
    %571 = vector.load %arg25[%c6, %c0_306, %c0_307] : memref<8x39x32xbf16, #tpu.memory_space<vmem>>, vector<1x39x32xbf16>
    %572 = vector.shape_cast %571 : vector<1x39x32xbf16> to vector<39x32xbf16>
    %cst_308 = arith.constant dense<0.000000e+00> : vector<39x10xf32>
    %573 = tpu.matmul %572, %570, %cst_308 {dimension_numbers = #tpu.dot_dimension_numbers<[1], [0], [0], [1], [0, 0, 1, 1], [], []>} : vector<39x32xbf16>, vector<32x10xbf16>, vector<39x10xf32> -> vector<39x10xf32>
    %574 = arith.addf %568, %573 : vector<39x10xf32>
    %575 = vector.extract_strided_slice %520 {offsets = [0, 90], sizes = [32, 10], strides = [1, 1]} : vector<32x260xf32> to vector<32x10xf32>
    %576 = arith.truncf %575 : vector<32x10xf32> to vector<32x10xbf16>
    %c7 = arith.constant 7 : index
    %c0_309 = arith.constant 0 : index
    %c0_310 = arith.constant 0 : index
    %577 = vector.load %arg25[%c7, %c0_309, %c0_310] : memref<8x39x32xbf16, #tpu.memory_space<vmem>>, vector<1x39x32xbf16>
    %578 = vector.shape_cast %577 : vector<1x39x32xbf16> to vector<39x32xbf16>
    %cst_311 = arith.constant dense<0.000000e+00> : vector<39x10xf32>
    %579 = tpu.matmul %578, %576, %cst_311 {dimension_numbers = #tpu.dot_dimension_numbers<[1], [0], [0], [1], [0, 0, 1, 1], [], []>} : vector<39x32xbf16>, vector<32x10xbf16>, vector<39x10xf32> -> vector<39x10xf32>
    %580 = arith.addf %574, %579 : vector<39x10xf32>
    %581 = vector.shape_cast %580 : vector<39x10xf32> to vector<1x39x10xf32>
    %c0_312 = arith.constant 0 : index
    %c0_313 = arith.constant 0 : index
    %c0_314 = arith.constant 0 : index
    %582 = vector.load %arg28[%c0_312, %c0_313, %c0_314] : memref<1x39x10xf32, #tpu.memory_space<vmem>>, vector<1x39x10xf32>
    tpu.vector_store %arg28[%c0_312, %c0_313, %c0_314], %581 {strides = array<i32>} : memref<1x39x10xf32, #tpu.memory_space<vmem>>, vector<1x39x10xf32>,
    %583 = vector.extract_strided_slice %520 {offsets = [0, 100], sizes = [32, 10], strides = [1, 1]} : vector<32x260xf32> to vector<32x10xf32>
    %584 = arith.truncf %583 : vector<32x10xf32> to vector<32x10xbf16>
    %c0_315 = arith.constant 0 : index
    %c0_316 = arith.constant 0 : index
    %c0_317 = arith.constant 0 : index
    %585 = vector.load %arg26[%c0_315, %c0_316, %c0_317] : memref<16x47x32xbf16, #tpu.memory_space<vmem>>, vector<1x47x32xbf16>
    %586 = vector.shape_cast %585 : vector<1x47x32xbf16> to vector<47x32xbf16>
    %cst_318 = arith.constant dense<0.000000e+00> : vector<47x10xf32>
    %587 = tpu.matmul %586, %584, %cst_318 {dimension_numbers = #tpu.dot_dimension_numbers<[1], [0], [0], [1], [0, 0, 1, 1], [], []>} : vector<47x32xbf16>, vector<32x10xbf16>, vector<47x10xf32> -> vector<47x10xf32>
    %588 = vector.extract_strided_slice %520 {offsets = [0, 110], sizes = [32, 10], strides = [1, 1]} : vector<32x260xf32> to vector<32x10xf32>
    %589 = arith.truncf %588 : vector<32x10xf32> to vector<32x10xbf16>
    %c1_319 = arith.constant 1 : index
    %c0_320 = arith.constant 0 : index
    %c0_321 = arith.constant 0 : index
    %590 = vector.load %arg26[%c1_319, %c0_320, %c0_321] : memref<16x47x32xbf16, #tpu.memory_space<vmem>>, vector<1x47x32xbf16>
    %591 = vector.shape_cast %590 : vector<1x47x32xbf16> to vector<47x32xbf16>
    %cst_322 = arith.constant dense<0.000000e+00> : vector<47x10xf32>
    %592 = tpu.matmul %591, %589, %cst_322 {dimension_numbers = #tpu.dot_dimension_numbers<[1], [0], [0], [1], [0, 0, 1, 1], [], []>} : vector<47x32xbf16>, vector<32x10xbf16>, vector<47x10xf32> -> vector<47x10xf32>
    %593 = arith.addf %587, %592 : vector<47x10xf32>
    %594 = vector.extract_strided_slice %520 {offsets = [0, 120], sizes = [32, 10], strides = [1, 1]} : vector<32x260xf32> to vector<32x10xf32>
    %595 = arith.truncf %594 : vector<32x10xf32> to vector<32x10xbf16>
    %c2_323 = arith.constant 2 : index
    %c0_324 = arith.constant 0 : index
    %c0_325 = arith.constant 0 : index
    %596 = vector.load %arg26[%c2_323, %c0_324, %c0_325] : memref<16x47x32xbf16, #tpu.memory_space<vmem>>, vector<1x47x32xbf16>
    %597 = vector.shape_cast %596 : vector<1x47x32xbf16> to vector<47x32xbf16>
    %cst_326 = arith.constant dense<0.000000e+00> : vector<47x10xf32>
    %598 = tpu.matmul %597, %595, %cst_326 {dimension_numbers = #tpu.dot_dimension_numbers<[1], [0], [0], [1], [0, 0, 1, 1], [], []>} : vector<47x32xbf16>, vector<32x10xbf16>, vector<47x10xf32> -> vector<47x10xf32>
    %599 = arith.addf %593, %598 : vector<47x10xf32>
    %600 = vector.extract_strided_slice %520 {offsets = [0, 130], sizes = [32, 10], strides = [1, 1]} : vector<32x260xf32> to vector<32x10xf32>
    %601 = arith.truncf %600 : vector<32x10xf32> to vector<32x10xbf16>
    %c3_327 = arith.constant 3 : index
    %c0_328 = arith.constant 0 : index
    %c0_329 = arith.constant 0 : index
    %602 = vector.load %arg26[%c3_327, %c0_328, %c0_329] : memref<16x47x32xbf16, #tpu.memory_space<vmem>>, vector<1x47x32xbf16>
    %603 = vector.shape_cast %602 : vector<1x47x32xbf16> to vector<47x32xbf16>
    %cst_330 = arith.constant dense<0.000000e+00> : vector<47x10xf32>
    %604 = tpu.matmul %603, %601, %cst_330 {dimension_numbers = #tpu.dot_dimension_numbers<[1], [0], [0], [1], [0, 0, 1, 1], [], []>} : vector<47x32xbf16>, vector<32x10xbf16>, vector<47x10xf32> -> vector<47x10xf32>
    %605 = arith.addf %599, %604 : vector<47x10xf32>
    %606 = vector.extract_strided_slice %520 {offsets = [0, 140], sizes = [32, 10], strides = [1, 1]} : vector<32x260xf32> to vector<32x10xf32>
    %607 = arith.truncf %606 : vector<32x10xf32> to vector<32x10xbf16>
    %c4_331 = arith.constant 4 : index
    %c0_332 = arith.constant 0 : index
    %c0_333 = arith.constant 0 : index
    %608 = vector.load %arg26[%c4_331, %c0_332, %c0_333] : memref<16x47x32xbf16, #tpu.memory_space<vmem>>, vector<1x47x32xbf16>
    %609 = vector.shape_cast %608 : vector<1x47x32xbf16> to vector<47x32xbf16>
    %cst_334 = arith.constant dense<0.000000e+00> : vector<47x10xf32>
    %610 = tpu.matmul %609, %607, %cst_334 {dimension_numbers = #tpu.dot_dimension_numbers<[1], [0], [0], [1], [0, 0, 1, 1], [], []>} : vector<47x32xbf16>, vector<32x10xbf16>, vector<47x10xf32> -> vector<47x10xf32>
    %611 = arith.addf %605, %610 : vector<47x10xf32>
    %612 = vector.extract_strided_slice %520 {offsets = [0, 150], sizes = [32, 10], strides = [1, 1]} : vector<32x260xf32> to vector<32x10xf32>
    %613 = arith.truncf %612 : vector<32x10xf32> to vector<32x10xbf16>
    %c5_335 = arith.constant 5 : index
    %c0_336 = arith.constant 0 : index
    %c0_337 = arith.constant 0 : index
    %614 = vector.load %arg26[%c5_335, %c0_336, %c0_337] : memref<16x47x32xbf16, #tpu.memory_space<vmem>>, vector<1x47x32xbf16>
    %615 = vector.shape_cast %614 : vector<1x47x32xbf16> to vector<47x32xbf16>
    %cst_338 = arith.constant dense<0.000000e+00> : vector<47x10xf32>
    %616 = tpu.matmul %615, %613, %cst_338 {dimension_numbers = #tpu.dot_dimension_numbers<[1], [0], [0], [1], [0, 0, 1, 1], [], []>} : vector<47x32xbf16>, vector<32x10xbf16>, vector<47x10xf32> -> vector<47x10xf32>
    %617 = arith.addf %611, %616 : vector<47x10xf32>
    %618 = vector.extract_strided_slice %520 {offsets = [0, 160], sizes = [32, 10], strides = [1, 1]} : vector<32x260xf32> to vector<32x10xf32>
    %619 = arith.truncf %618 : vector<32x10xf32> to vector<32x10xbf16>
    %c6_339 = arith.constant 6 : index
    %c0_340 = arith.constant 0 : index
    %c0_341 = arith.constant 0 : index
    %620 = vector.load %arg26[%c6_339, %c0_340, %c0_341] : memref<16x47x32xbf16, #tpu.memory_space<vmem>>, vector<1x47x32xbf16>
    %621 = vector.shape_cast %620 : vector<1x47x32xbf16> to vector<47x32xbf16>
    %cst_342 = arith.constant dense<0.000000e+00> : vector<47x10xf32>
    %622 = tpu.matmul %621, %619, %cst_342 {dimension_numbers = #tpu.dot_dimension_numbers<[1], [0], [0], [1], [0, 0, 1, 1], [], []>} : vector<47x32xbf16>, vector<32x10xbf16>, vector<47x10xf32> -> vector<47x10xf32>
    %623 = arith.addf %617, %622 : vector<47x10xf32>
    %624 = vector.extract_strided_slice %520 {offsets = [0, 170], sizes = [32, 10], strides = [1, 1]} : vector<32x260xf32> to vector<32x10xf32>
    %625 = arith.truncf %624 : vector<32x10xf32> to vector<32x10xbf16>
    %c7_343 = arith.constant 7 : index
    %c0_344 = arith.constant 0 : index
    %c0_345 = arith.constant 0 : index
    %626 = vector.load %arg26[%c7_343, %c0_344, %c0_345] : memref<16x47x32xbf16, #tpu.memory_space<vmem>>, vector<1x47x32xbf16>
    %627 = vector.shape_cast %626 : vector<1x47x32xbf16> to vector<47x32xbf16>
    %cst_346 = arith.constant dense<0.000000e+00> : vector<47x10xf32>
    %628 = tpu.matmul %627, %625, %cst_346 {dimension_numbers = #tpu.dot_dimension_numbers<[1], [0], [0], [1], [0, 0, 1, 1], [], []>} : vector<47x32xbf16>, vector<32x10xbf16>, vector<47x10xf32> -> vector<47x10xf32>
    %629 = arith.addf %623, %628 : vector<47x10xf32>
    %630 = vector.extract_strided_slice %520 {offsets = [0, 180], sizes = [32, 10], strides = [1, 1]} : vector<32x260xf32> to vector<32x10xf32>
    %631 = arith.truncf %630 : vector<32x10xf32> to vector<32x10xbf16>
    %c8 = arith.constant 8 : index
    %c0_347 = arith.constant 0 : index
    %c0_348 = arith.constant 0 : index
    %632 = vector.load %arg26[%c8, %c0_347, %c0_348] : memref<16x47x32xbf16, #tpu.memory_space<vmem>>, vector<1x47x32xbf16>
    %633 = vector.shape_cast %632 : vector<1x47x32xbf16> to vector<47x32xbf16>
    %cst_349 = arith.constant dense<0.000000e+00> : vector<47x10xf32>
    %634 = tpu.matmul %633, %631, %cst_349 {dimension_numbers = #tpu.dot_dimension_numbers<[1], [0], [0], [1], [0, 0, 1, 1], [], []>} : vector<47x32xbf16>, vector<32x10xbf16>, vector<47x10xf32> -> vector<47x10xf32>
    %635 = arith.addf %629, %634 : vector<47x10xf32>
    %636 = vector.extract_strided_slice %520 {offsets = [0, 190], sizes = [32, 10], strides = [1, 1]} : vector<32x260xf32> to vector<32x10xf32>
    %637 = arith.truncf %636 : vector<32x10xf32> to vector<32x10xbf16>
    %c9 = arith.constant 9 : index
    %c0_350 = arith.constant 0 : index
    %c0_351 = arith.constant 0 : index
    %638 = vector.load %arg26[%c9, %c0_350, %c0_351] : memref<16x47x32xbf16, #tpu.memory_space<vmem>>, vector<1x47x32xbf16>
    %639 = vector.shape_cast %638 : vector<1x47x32xbf16> to vector<47x32xbf16>
    %cst_352 = arith.constant dense<0.000000e+00> : vector<47x10xf32>
    %640 = tpu.matmul %639, %637, %cst_352 {dimension_numbers = #tpu.dot_dimension_numbers<[1], [0], [0], [1], [0, 0, 1, 1], [], []>} : vector<47x32xbf16>, vector<32x10xbf16>, vector<47x10xf32> -> vector<47x10xf32>
    %641 = arith.addf %635, %640 : vector<47x10xf32>
    %642 = vector.extract_strided_slice %520 {offsets = [0, 200], sizes = [32, 10], strides = [1, 1]} : vector<32x260xf32> to vector<32x10xf32>
    %643 = arith.truncf %642 : vector<32x10xf32> to vector<32x10xbf16>
    %c10 = arith.constant 10 : index
    %c0_353 = arith.constant 0 : index
    %c0_354 = arith.constant 0 : index
    %644 = vector.load %arg26[%c10, %c0_353, %c0_354] : memref<16x47x32xbf16, #tpu.memory_space<vmem>>, vector<1x47x32xbf16>
    %645 = vector.shape_cast %644 : vector<1x47x32xbf16> to vector<47x32xbf16>
    %cst_355 = arith.constant dense<0.000000e+00> : vector<47x10xf32>
    %646 = tpu.matmul %645, %643, %cst_355 {dimension_numbers = #tpu.dot_dimension_numbers<[1], [0], [0], [1], [0, 0, 1, 1], [], []>} : vector<47x32xbf16>, vector<32x10xbf16>, vector<47x10xf32> -> vector<47x10xf32>
    %647 = arith.addf %641, %646 : vector<47x10xf32>
    %648 = vector.extract_strided_slice %520 {offsets = [0, 210], sizes = [32, 10], strides = [1, 1]} : vector<32x260xf32> to vector<32x10xf32>
    %649 = arith.truncf %648 : vector<32x10xf32> to vector<32x10xbf16>
    %c11 = arith.constant 11 : index
    %c0_356 = arith.constant 0 : index
    %c0_357 = arith.constant 0 : index
    %650 = vector.load %arg26[%c11, %c0_356, %c0_357] : memref<16x47x32xbf16, #tpu.memory_space<vmem>>, vector<1x47x32xbf16>
    %651 = vector.shape_cast %650 : vector<1x47x32xbf16> to vector<47x32xbf16>
    %cst_358 = arith.constant dense<0.000000e+00> : vector<47x10xf32>
    %652 = tpu.matmul %651, %649, %cst_358 {dimension_numbers = #tpu.dot_dimension_numbers<[1], [0], [0], [1], [0, 0, 1, 1], [], []>} : vector<47x32xbf16>, vector<32x10xbf16>, vector<47x10xf32> -> vector<47x10xf32>
    %653 = arith.addf %647, %652 : vector<47x10xf32>
    %654 = vector.extract_strided_slice %520 {offsets = [0, 220], sizes = [32, 10], strides = [1, 1]} : vector<32x260xf32> to vector<32x10xf32>
    %655 = arith.truncf %654 : vector<32x10xf32> to vector<32x10xbf16>
    %c12 = arith.constant 12 : index
    %c0_359 = arith.constant 0 : index
    %c0_360 = arith.constant 0 : index
    %656 = vector.load %arg26[%c12, %c0_359, %c0_360] : memref<16x47x32xbf16, #tpu.memory_space<vmem>>, vector<1x47x32xbf16>
    %657 = vector.shape_cast %656 : vector<1x47x32xbf16> to vector<47x32xbf16>
    %cst_361 = arith.constant dense<0.000000e+00> : vector<47x10xf32>
    %658 = tpu.matmul %657, %655, %cst_361 {dimension_numbers = #tpu.dot_dimension_numbers<[1], [0], [0], [1], [0, 0, 1, 1], [], []>} : vector<47x32xbf16>, vector<32x10xbf16>, vector<47x10xf32> -> vector<47x10xf32>
    %659 = arith.addf %653, %658 : vector<47x10xf32>
    %660 = vector.extract_strided_slice %520 {offsets = [0, 230], sizes = [32, 10], strides = [1, 1]} : vector<32x260xf32> to vector<32x10xf32>
    %661 = arith.truncf %660 : vector<32x10xf32> to vector<32x10xbf16>
    %c13 = arith.constant 13 : index
    %c0_362 = arith.constant 0 : index
    %c0_363 = arith.constant 0 : index
    %662 = vector.load %arg26[%c13, %c0_362, %c0_363] : memref<16x47x32xbf16, #tpu.memory_space<vmem>>, vector<1x47x32xbf16>
    %663 = vector.shape_cast %662 : vector<1x47x32xbf16> to vector<47x32xbf16>
    %cst_364 = arith.constant dense<0.000000e+00> : vector<47x10xf32>
    %664 = tpu.matmul %663, %661, %cst_364 {dimension_numbers = #tpu.dot_dimension_numbers<[1], [0], [0], [1], [0, 0, 1, 1], [], []>} : vector<47x32xbf16>, vector<32x10xbf16>, vector<47x10xf32> -> vector<47x10xf32>
    %665 = arith.addf %659, %664 : vector<47x10xf32>
    %666 = vector.extract_strided_slice %520 {offsets = [0, 240], sizes = [32, 10], strides = [1, 1]} : vector<32x260xf32> to vector<32x10xf32>
    %667 = arith.truncf %666 : vector<32x10xf32> to vector<32x10xbf16>
    %c14 = arith.constant 14 : index
    %c0_365 = arith.constant 0 : index
    %c0_366 = arith.constant 0 : index
    %668 = vector.load %arg26[%c14, %c0_365, %c0_366] : memref<16x47x32xbf16, #tpu.memory_space<vmem>>, vector<1x47x32xbf16>
    %669 = vector.shape_cast %668 : vector<1x47x32xbf16> to vector<47x32xbf16>
    %cst_367 = arith.constant dense<0.000000e+00> : vector<47x10xf32>
    %670 = tpu.matmul %669, %667, %cst_367 {dimension_numbers = #tpu.dot_dimension_numbers<[1], [0], [0], [1], [0, 0, 1, 1], [], []>} : vector<47x32xbf16>, vector<32x10xbf16>, vector<47x10xf32> -> vector<47x10xf32>
    %671 = arith.addf %665, %670 : vector<47x10xf32>
    %672 = vector.extract_strided_slice %520 {offsets = [0, 250], sizes = [32, 10], strides = [1, 1]} : vector<32x260xf32> to vector<32x10xf32>
    %673 = arith.truncf %672 : vector<32x10xf32> to vector<32x10xbf16>
    %c15 = arith.constant 15 : index
    %c0_368 = arith.constant 0 : index
    %c0_369 = arith.constant 0 : index
    %674 = vector.load %arg26[%c15, %c0_368, %c0_369] : memref<16x47x32xbf16, #tpu.memory_space<vmem>>, vector<1x47x32xbf16>
    %675 = vector.shape_cast %674 : vector<1x47x32xbf16> to vector<47x32xbf16>
    %cst_370 = arith.constant dense<0.000000e+00> : vector<47x10xf32>
    %676 = tpu.matmul %675, %673, %cst_370 {dimension_numbers = #tpu.dot_dimension_numbers<[1], [0], [0], [1], [0, 0, 1, 1], [], []>} : vector<47x32xbf16>, vector<32x10xbf16>, vector<47x10xf32> -> vector<47x10xf32>
    %677 = arith.addf %671, %676 : vector<47x10xf32>
    %678 = vector.shape_cast %677 : vector<47x10xf32> to vector<1x47x10xf32>
    %c0_371 = arith.constant 0 : index
    %c0_372 = arith.constant 0 : index
    %c0_373 = arith.constant 0 : index
    %679 = vector.load %arg29[%c0_371, %c0_372, %c0_373] : memref<1x47x10xf32, #tpu.memory_space<vmem>>, vector<1x47x10xf32>
    tpu.vector_store %arg29[%c0_371, %c0_372, %c0_373], %678 {strides = array<i32>} : memref<1x47x10xf32, #tpu.memory_space<vmem>>, vector<1x47x10xf32>,
    return
  }
  func.func @transform_0(%arg0: i32) -> (i32, i32) {
    %c0_i32 = arith.constant 0 : i32
    %c0_i32_0 = arith.constant 0 : i32
    return %arg0, %c0_i32 : i32, i32
  }
  func.func @transform_1(%arg0: i32) -> (i32, i32, i32) {
    %c0_i32 = arith.constant 0 : i32
    %c0_i32_0 = arith.constant 0 : i32
    %c0_i32_1 = arith.constant 0 : i32
    return %arg0, %c0_i32, %c0_i32_0 : i32, i32, i32
  }
  func.func @transform_2(%arg0: i32) -> (i32, i32) {
    %c0_i32 = arith.constant 0 : i32
    %c0_i32_0 = arith.constant 0 : i32
    %c0_i32_1 = arith.constant 0 : i32
    return %c0_i32, %c0_i32_0 : i32, i32
  }
  func.func @transform_3(%arg0: i32) -> (i32, i32) {
    %c0_i32 = arith.constant 0 : i32
    %c0_i32_0 = arith.constant 0 : i32
    %c0_i32_1 = arith.constant 0 : i32
    return %c0_i32, %c0_i32_0 : i32, i32
  }
  func.func @transform_4(%arg0: i32) -> (i32, i32) {
    %c0_i32 = arith.constant 0 : i32
    %c0_i32_0 = arith.constant 0 : i32
    %c0_i32_1 = arith.constant 0 : i32
    return %c0_i32, %c0_i32_0 : i32, i32
  }
  func.func @transform_5(%arg0: i32) -> (i32, i32) {
    %c0_i32 = arith.constant 0 : i32
    %c0_i32_0 = arith.constant 0 : i32
    %c0_i32_1 = arith.constant 0 : i32
    return %c0_i32, %c0_i32_0 : i32, i32
  }
  func.func @transform_6(%arg0: i32) -> (i32, i32) {
    %c0_i32 = arith.constant 0 : i32
    %c0_i32_0 = arith.constant 0 : i32
    %c0_i32_1 = arith.constant 0 : i32
    return %c0_i32, %c0_i32_0 : i32, i32
  }
  func.func @transform_7(%arg0: i32) -> (i32, i32, i32) {
    %c0_i32 = arith.constant 0 : i32
    %c0_i32_0 = arith.constant 0 : i32
    %c0_i32_1 = arith.constant 0 : i32
    %c0_i32_2 = arith.constant 0 : i32
    return %c0_i32, %c0_i32_0, %c0_i32_1 : i32, i32, i32
  }
  func.func @transform_8(%arg0: i32) -> (i32, i32, i32) {
    %c0_i32 = arith.constant 0 : i32
    %c0_i32_0 = arith.constant 0 : i32
    %c0_i32_1 = arith.constant 0 : i32
    %c0_i32_2 = arith.constant 0 : i32
    return %c0_i32, %c0_i32_0, %c0_i32_1 : i32, i32, i32
  }
  func.func @transform_9(%arg0: i32) -> (i32, i32, i32) {
    %c0_i32 = arith.constant 0 : i32
    %c0_i32_0 = arith.constant 0 : i32
    %c0_i32_1 = arith.constant 0 : i32
    %c0_i32_2 = arith.constant 0 : i32
    return %c0_i32, %c0_i32_0, %c0_i32_1 : i32, i32, i32
  }
  func.func @transform_10(%arg0: i32) -> (i32, i32, i32) {
    %c0_i32 = arith.constant 0 : i32
    %c0_i32_0 = arith.constant 0 : i32
    %c0_i32_1 = arith.constant 0 : i32
    %c0_i32_2 = arith.constant 0 : i32
    return %c0_i32, %c0_i32_0, %c0_i32_1 : i32, i32, i32
  }
  func.func @transform_11(%arg0: i32) -> (i32, i32, i32) {
    %c0_i32 = arith.constant 0 : i32
    %c0_i32_0 = arith.constant 0 : i32
    %c0_i32_1 = arith.constant 0 : i32
    %c0_i32_2 = arith.constant 0 : i32
    return %c0_i32, %c0_i32_0, %c0_i32_1 : i32, i32, i32
  }
  func.func @transform_12(%arg0: i32) -> (i32, i32, i32) {
    %c0_i32 = arith.constant 0 : i32
    %c0_i32_0 = arith.constant 0 : i32
    %c0_i32_1 = arith.constant 0 : i32
    %c0_i32_2 = arith.constant 0 : i32
    return %c0_i32, %c0_i32_0, %c0_i32_1 : i32, i32, i32
  }
  func.func @transform_13(%arg0: i32) -> (i32, i32, i32) {
    %c0_i32 = arith.constant 0 : i32
    %c0_i32_0 = arith.constant 0 : i32
    %c0_i32_1 = arith.constant 0 : i32
    %c0_i32_2 = arith.constant 0 : i32
    return %c0_i32, %c0_i32_0, %c0_i32_1 : i32, i32, i32
  }
  func.func @transform_14(%arg0: i32) -> (i32, i32, i32) {
    %c0_i32 = arith.constant 0 : i32
    %c0_i32_0 = arith.constant 0 : i32
    %c0_i32_1 = arith.constant 0 : i32
    %c0_i32_2 = arith.constant 0 : i32
    return %c0_i32, %c0_i32_0, %c0_i32_1 : i32, i32, i32
  }
  func.func @transform_15(%arg0: i32) -> (i32, i32, i32) {
    %c0_i32 = arith.constant 0 : i32
    %c0_i32_0 = arith.constant 0 : i32
    %c0_i32_1 = arith.constant 0 : i32
    %c0_i32_2 = arith.constant 0 : i32
    return %c0_i32, %c0_i32_0, %c0_i32_1 : i32, i32, i32
  }
  func.func @transform_16(%arg0: i32) -> (i32, i32, i32) {
    %c0_i32 = arith.constant 0 : i32
    %c0_i32_0 = arith.constant 0 : i32
    %c0_i32_1 = arith.constant 0 : i32
    %c0_i32_2 = arith.constant 0 : i32
    return %c0_i32, %c0_i32_0, %c0_i32_1 : i32, i32, i32
  }
  func.func @transform_17(%arg0: i32) -> (i32, i32, i32) {
    %c0_i32 = arith.constant 0 : i32
    %c0_i32_0 = arith.constant 0 : i32
    %c0_i32_1 = arith.constant 0 : i32
    %c0_i32_2 = arith.constant 0 : i32
    return %c0_i32, %c0_i32_0, %c0_i32_1 : i32, i32, i32
  }
  func.func @transform_18(%arg0: i32) -> (i32, i32, i32) {
    %c0_i32 = arith.constant 0 : i32
    %c0_i32_0 = arith.constant 0 : i32
    %c0_i32_1 = arith.constant 0 : i32
    %c0_i32_2 = arith.constant 0 : i32
    return %c0_i32, %c0_i32_0, %c0_i32_1 : i32, i32, i32
  }
  func.func @transform_19(%arg0: i32) -> (i32, i32, i32) {
    %c0_i32 = arith.constant 0 : i32
    %c0_i32_0 = arith.constant 0 : i32
    %c0_i32_1 = arith.constant 0 : i32
    %c0_i32_2 = arith.constant 0 : i32
    return %c0_i32, %c0_i32_0, %c0_i32_1 : i32, i32, i32
  }
  func.func @transform_20(%arg0: i32) -> (i32, i32) {
    %c0_i32 = arith.constant 0 : i32
    %c0_i32_0 = arith.constant 0 : i32
    %c0_i32_1 = arith.constant 0 : i32
    return %c0_i32, %c0_i32_0 : i32, i32
  }
  func.func @transform_21(%arg0: i32) -> (i32, i32) {
    %c0_i32 = arith.constant 0 : i32
    %c0_i32_0 = arith.constant 0 : i32
    %c0_i32_1 = arith.constant 0 : i32
    return %c0_i32, %c0_i32_0 : i32, i32
  }
  func.func @transform_22(%arg0: i32) -> (i32, i32) {
    %c0_i32 = arith.constant 0 : i32
    %c0_i32_0 = arith.constant 0 : i32
    %c0_i32_1 = arith.constant 0 : i32
    return %c0_i32, %c0_i32_0 : i32, i32
  }
  func.func @transform_23(%arg0: i32) -> (i32, i32, i32) {
    %c0_i32 = arith.constant 0 : i32
    %c0_i32_0 = arith.constant 0 : i32
    %c0_i32_1 = arith.constant 0 : i32
    %c0_i32_2 = arith.constant 0 : i32
    return %c0_i32, %c0_i32_0, %c0_i32_1 : i32, i32, i32
  }
  func.func @transform_24(%arg0: i32) -> (i32, i32, i32) {
    %c0_i32 = arith.constant 0 : i32
    %c0_i32_0 = arith.constant 0 : i32
    %c0_i32_1 = arith.constant 0 : i32
    %c0_i32_2 = arith.constant 0 : i32
    return %c0_i32, %c0_i32_0, %c0_i32_1 : i32, i32, i32
  }
  func.func @transform_25(%arg0: i32) -> (i32, i32, i32) {
    %c0_i32 = arith.constant 0 : i32
    %c0_i32_0 = arith.constant 0 : i32
    %c0_i32_1 = arith.constant 0 : i32
    %c0_i32_2 = arith.constant 0 : i32
    return %c0_i32, %c0_i32_0, %c0_i32_1 : i32, i32, i32
  }
  func.func @transform_26(%arg0: i32) -> (i32, i32, i32) {
    %c0_i32 = arith.constant 0 : i32
    %c0_i32_0 = arith.constant 0 : i32
    %c0_i32_1 = arith.constant 0 : i32
    return %arg0, %c0_i32, %c0_i32_0 : i32, i32, i32
  }
  func.func @transform_27(%arg0: i32) -> (i32, i32, i32) {
    %c0_i32 = arith.constant 0 : i32
    %c0_i32_0 = arith.constant 0 : i32
    %c0_i32_1 = arith.constant 0 : i32
    return %arg0, %c0_i32, %c0_i32_0 : i32, i32, i32
  }
  func.func @transform_28(%arg0: i32) -> (i32, i32, i32) {
    %c0_i32 = arith.constant 0 : i32
    %c0_i32_0 = arith.constant 0 : i32
    %c0_i32_1 = arith.constant 0 : i32
    return %arg0, %c0_i32, %c0_i32_0 : i32, i32, i32
  }
}

</mosaic_0001>

<bundles_post_ra>
// kernel: custom-call.2
= control target key start
LH: loop header
LB: loop body
LE: loop exit
PB: predicated region body
PF: predicated region fallthrough
CT: control target
= control target key end

     0   :  { %s6_s0 = inlined_call_operand.vmem [shape: bf16[2,16], index: 0, kind: output, shape index: {}]  }

// kernel: custom-call.3
= control target key start
LH: loop header
LB: loop body
LE: loop exit
PB: predicated region body
PF: predicated region fallthrough
CT: control target
= control target key end

     0   :  { %s6_s0 = inlined_call_operand.vmem [shape: f32[2,16], index: 0, kind: output, shape index: {}]  }

// kernel: spex_forward.1
= control target key start
LH: loop header
LB: loop body
LE: loop exit
PB: predicated region body
PF: predicated region fallthrough
CT: control target
= control target key end

     0   :  { %s9478_s0 = inlined_call_operand.vmem [shape: f32[64,160], index: 0, kind: input, shape index: {}]   ;;  %s9479_s1 = inlined_call_operand.vmem [shape: f32[2,1,24], index: 1, kind: input, shape index: {}]   ;;  %s9480_s2 = inlined_call_operand.vmem [shape: bf16[160,96], index: 2, kind: input, shape index: {}]   ;;  %s9481_s3 = inlined_call_operand.vmem [shape: f32[1,96], index: 3, kind: input, shape index: {}]   ;;  %s9482_s4 = inlined_call_operand.vmem [shape: f32[1,96], index: 4, kind: input, shape index: {}]   ;;  %s9483_s5 = inlined_call_operand.vmem [shape: bf16[96,32], index: 5, kind: input, shape index: {}]   ;;  %s9484_s6 = inlined_call_operand.vmem [shape: f32[1,32], index: 6, kind: input, shape index: {}]   ;;  %s9485_s7 = inlined_call_operand.vmem [shape: bf16[4,32,48], index: 7, kind: input, shape index: {}]   ;;  %s9486_s8 = inlined_call_operand.vmem [shape: bf16[4,24,48], index: 8, kind: input, shape index: {}]   ;;  %s9487_s9 = inlined_call_operand.vmem [shape: f32[4,1,48], index: 9, kind: input, shape index: {}]   ;;  %s9488_s10 = inlined_call_operand.vmem [shape: f32[4,1,48], index: 10, kind: input, shape index: {}]   ;;  %s9489_s11 = inlined_call_operand.vmem [shape: f32[4,1,48], index: 11, kind: input, shape index: {}]   ;;  %s9490_s12 = inlined_call_operand.vmem [shape: f32[4,1,48], index: 12, kind: input, shape index: {}]   ;;  %s9491_s13 = inlined_call_operand.vmem [shape: f32[4,3,48], index: 13, kind: input, shape index: {}]   ;;  %s9492_s14 = inlined_call_operand.vmem [shape: f32[4,1,48], index: 14, kind: input, shape index: {}]   ;;  %s9493_s15 = inlined_call_operand.vmem [shape: f32[4,1,48], index: 15, kind: input, shape index: {}]   ;;  %s9494_s16 = inlined_call_operand.vmem [shape: f32[4,1,48], index: 16, kind: input, shape index: {}]   ;;  %s9495_s17 = inlined_call_operand.vmem [shape: f32[4,1,48], index: 17, kind: input, shape index: {}]   ;;  %s9496_s18 = inlined_call_operand.vmem [shape: bf16[4,48,32], index: 18, kind: input, shape index: {}]   ;;  %s9497_s19 = inlined_call_operand.vmem [shape: f32[4,1,32], index: 19, kind: input, shape index: {}]   ;;  %s9498_s20 = inlined_call_operand.vmem [shape: bf16[32,96], index: 20, kind: input, shape index: {}]   ;;  %s9499_s21 = inlined_call_operand.vmem [shape: f32[1,96], index: 21, kind: input, shape index: {}]   ;;  %s9500_s22 = inlined_call_operand.vmem [shape: bf16[96,260], index: 22, kind: input, shape index: {}]   ;;  %s9501_s23 = inlined_call_operand.vmem [shape: bf16[2,33,32], index: 23, kind: input, shape index: {}]   ;;  %s9502_s24 = inlined_call_operand.vmem [shape: bf16[8,39,32], index: 24, kind: input, shape index: {}]   ;;  %s9503_s25 = inlined_call_operand.vmem [shape: bf16[16,47,32], index: 25, kind: input, shape index: {}]   ;;  %s9504_s26 = inlined_call_operand.vmem [shape: f32[2,33,10], index: 26, kind: output, shape index: {0}]   ;;  %s9505_s27 = inlined_call_operand.vmem [shape: f32[2,39,10], index: 27, kind: output, shape index: {1}]   ;;  %s9506_s28 = inlined_call_operand.vmem [shape: f32[2,47,10], index: 28, kind: output, shape index: {2}]  }
   0x1   :  { %9522 = sst [smem:[#allocation2_spill]] %s9478_s0 }
   0x2   :  { %9523 = sst [smem:[#allocation3_spill]] %s9479_s1 }
   0x3   :  { %9524 = sst [smem:[#allocation4_spill]] %s9480_s2 }
   0x4   :  { %9525 = sst [smem:[#allocation5_spill]] %s9481_s3 }
   0x5   :  { %9526 = sst [smem:[#allocation6_spill]] %s9482_s4 }
   0x6   :  { %9527 = sst [smem:[#allocation7_spill]] %s9483_s5 }
   0x7   :  { %9528 = sst [smem:[#allocation8_spill]] %s9484_s6 }
   0x8   :  { %9529 = sst [smem:[#allocation9_spill]] %s9485_s7 }
   0x9   :  { %9530 = sst [smem:[#allocation10_spill]] %s9486_s8  ;;  %s8096_s8 = smov 0  }
   0xa   :  { %9531 = sst [smem:[#allocation11_spill]] %s9487_s9 }
   0xb   :  { %9532 = sst [smem:[#allocation12_spill]] %s9488_s10 }
   0xc   :  { %9533 = sst [smem:[#allocation13_spill]] %s9489_s11 }
   0xd   :  { %9534 = sst [smem:[#allocation14_spill]] %s9490_s12 }
   0xe LB: > { %s8102_s5 = sadd.s32 4294967295, %s7921_s8   ;;  %p6202_p0 = scmp.ge.s32.totalorder %s7921_s8, 1  ;;  %s7921_s8 = sphi %s8096_s8, %s39_s8  }
   0xf   : > { %p777_p1 = scmp.lt.s32.totalorder %s7921_s8, 3 }
  0x11   : > { %p778_p2 = pnand %p6202_p0, %p777_p1 }
  0x12   : > { %s9535_s3 = sld [smem:[#allocation4_spill]] (!%p778_p2)  ;;  %v7923_v1 = vmov (!%p778_p2), 0   ;;  %s6203_s6 = sshll.u32 (!%p778_p2), %s8102_s5, 2  ;;  %vm983_vm0 = vcmask (!%p778_p2), 261120   ;;  %vm9516_vm1 = vcmask (!%p778_p2), 785408   ;;  %vm1339_vm2 = vcmask (!%p778_p2), 1043456  }
  0x13   : > { %781 = sbr.rel (%p778_p2) target bundleno = 6692 (0x1a24), region = 124  ;;  %990 = vmatprep.subr.bf16.mxu0 (!%p778_p2), %v7923_v1  ;;  %p866_p3 = scmp.lt.s32.totalorder (!%p778_p2), %s6203_s6, 7  ;;  %vm7925_vm3 = vmmov (!%p778_p2), 0   ;;  %vm1335_vm4 = vcmask (!%p778_p2), 195584   ;;  %vm1412_vm5 = vcmask (!%p778_p2), 392192  }
  0x14   : > { %s9536_s1 = sld [smem:[#allocation2_spill]] (!%p778_p2)  ;;  %s9537_s0 = sld [smem:[#allocation7_spill]] (!%p778_p2) }
  0x15   : > { %s9538_s29 = sld [smem:[#allocation5_spill]] (!%p778_p2)  ;;  %s9539_s12 = sld [smem:[#allocation6_spill]] (!%p778_p2) }
  0x16   : > { %s9540_s30 = sld [smem:[#allocation9_spill]] (!%p778_p2)  ;;  %p872_p4 = scmp.lt.s32.totalorder (!%p778_p2), %s8102_s5, 1 }
  0x17   : > { %s9543_s10 = sld [smem:[#allocation3_spill]] (!%p778_p2)  ;;  %s7933_s9 = smov (!%p778_p2), 106  }
  0x18   : > { %v7737_v0 = vld [vmem:[%s9535_s3] sm:$0xff] (!%p778_p2)   ;;  %v7738_v2 = vld [vmem:[%s9535_s3 + $0x8] sm:$0xff] (!%p778_p2)   ;;  %v7739_v3 = vld [vmem:[%s9535_s3 + $0x10] sm:$0xff] (!%p778_p2)   ;;  %s9544_s7 = sld [smem:[#allocation11_spill]] (!%p778_p2) }
  0x19   : > { %991 = vmatpush1.bf16.msra.mxu0 (!%p778_p2), %v7737_v0  ;;  %v7740_v4 = vld [vmem:[%s9535_s3 + $0x18] sm:$0xff] (!%p778_p2)   ;;  %v7741_v8 = vld [vmem:[%s9535_s3 + $0x20] sm:$0xff] (!%p778_p2)   ;;  %v7742_v9 = vld [vmem:[%s9535_s3 + $0x28] sm:$0xff] (!%p778_p2)  }
  0x1a   : > { %992 = vmatprep.subr.bf16.mxu0 %v7923_v1  ;;  %s9554_s6 = smov (!%p866_p3, %s6203_s6), 7  ;;  %v7743_v10 = vld [vmem:[%s9535_s3 + $0x30] sm:$0xff]   ;;  %v7744_v11 = vld [vmem:[%s9535_s3 + $0x38] sm:$0xff]   ;;  %v7745_v12 = vld [vmem:[%s9535_s3 + $0x40] sm:$0xff]   ;;  %s9556_s5 = smov (!%p872_p4, %s8102_s5), 1 }
  0x1b   : > { %s6692_s2 = sshll.u32 %s9554_s6, 4  ;;  %v7746_v13 = vld [vmem:[%s9535_s3 + $0x48] sm:$0xff]   ;;  %s9545_s6 = sld [smem:[#allocation12_spill]] }
  0x1c   : > { %s8122_s4 = scalar_lea.vmem %s9536_s1, %s6692_s2  ;;  %s7931_s2 = smov 96  }
  0x1d   : > { %993 = vmatpush1.bf16.msra.mxu0 %v7738_v2  ;;  %v892_v5 = vld [vmem:[%s8122_s4 + $0x8] sm:$0xff]  ;;  %v894_v6 = vld [vmem:[%s8122_s4 + $0x18] sm:$0xff]  ;;  %v891_v14 = vld [vmem:[%s8122_s4] sm:$0xff]  ;;  %s874_s11 = scalar_lea.vmem %s9543_s10, %s9556_s5  ;;  %s7929_s10 = smov 116  }
  0x1e   : > { %994 = vmatprep.subr.bf16.mxu0 %v7923_v1  ;;  %v900_v7 = vpack.c.bf16 %v894_v6, %v892_v5  ;;  %v893_v15 = vld [vmem:[%s8122_s4 + $0x10] sm:$0xff]  ;;  %v896_v16 = vld [vmem:[%s8122_s4 + $0x28] sm:$0xff]  ;;  %v898_v17 = vld [vmem:[%s8122_s4 + $0x38] sm:$0xff]  ;;  %s7932_s1 = smov 98   ;;  %s7934_s3 = smov 108  }
  0x1f   : > { %v899_v18 = vpack.c.bf16 %v893_v15, %v891_v14  ;;  %v902_v19 = vpack.c.bf16 %v898_v17, %v896_v16  ;;  %v895_v20 = vld [vmem:[%s8122_s4 + $0x20] sm:$0xff]  ;;  %v897_v21 = vld [vmem:[%s8122_s4 + $0x30] sm:$0xff]  ;;  %v7750_v5 = vld [vmem:[%s9537_s0 + $0x18] sm:$0xff]   ;;  %s7928_s4 = smov 126  }
  0x20   : > { %6219 = vmatprep.mubr.msk.bf16.mxu0 %vm983_vm0, %v900_v7  ;;  %v901_v22 = vpack.c.bf16 %v897_v21, %v895_v20  ;;  %v7747_v2 = vld [vmem:[%s9537_s0] sm:$0xff]   ;;  %v7752_v7 = vld [vmem:[%s9537_s0 + $0x28] sm:$0xff]  }
  0x21   : > { %995 = vmatpush1.bf16.msra.mxu0 %v7739_v3  ;;  %v7748_v3 = vld [vmem:[%s9537_s0 + $0x8] sm:$0xff]   ;;  %v7751_v6 = vld [vmem:[%s9537_s0 + $0x20] sm:$0xff]  }
  0x22   : > { %996 = vmatprep.subr.bf16.mxu0 %v7923_v1 }
  0x25   : > { %997 = vmatpush1.bf16.msra.mxu0 %v7740_v4  ;;  %v7749_v4 = vld [vmem:[%s9537_s0 + $0x10] sm:$0xff]   ;;  %s9547_s0 = sld [smem:[#allocation14_spill]] }
  0x26   : > { %998 = vmatprep.subr.bf16.mxu0 %v7923_v1 }
  0x29   : > { %999 = vmatpush1.bf16.msra.mxu0 %v7741_v8 }
  0x2a   : > { %1000 = vmatprep.subr.bf16.mxu0 %v7923_v1 }
  0x2d   : > { %1001 = vmatpush1.bf16.msra.mxu0 %v7742_v9 }
  0x2e   : > { %1002 = vmatprep.subr.bf16.mxu0 %v7923_v1 }
  0x31   : > { %1003 = vmatpush1.bf16.msra.mxu0 %v7743_v10 }
  0x32   : > { %1004 = vmatprep.subr.bf16.mxu0 %v7923_v1 }
  0x35   : > { %1005 = vmatpush1.bf16.msra.mxu0 %v7744_v11 }
  0x36   : > { %1006 = vmatprep.subr.bf16.mxu0 %v7923_v1 }
  0x39   : > { %1007 = vmatpush1.bf16.msra.mxu0 %v7745_v12 }
  0x3a   : > { %1008 = vmatprep.subr.bf16.mxu0 %v7923_v1 }
  0x3d   : > { %1009 = vmatpush1.bf16.msra.mxu0 %v7746_v13 }
  0x3e   : > { %6885 = vmatprep.subr.bf16.mxu0 %v7747_v2 }
  0x40   : > { %1023 = vmatmul.mubr.bf16.vlgmr.msra.gmra.mrb[0].mxu0 %v899_v18 }
  0x41   : > { %6220 = vmatprep.mubr.msk.bf16.mxu0 %vm983_vm0, %v902_v19  ;;  %6886 = vmatpush3.bf16.msra.mxu0 %v7747_v2 }
  0x42   : > { %6887 = vmatprep.subr.bf16.mxu0 %v7748_v3 }
  0x45   : > { %6888 = vmatpush3.bf16.msra.mxu0 %v7748_v3 }
  0x46   : > { %6889 = vmatprep.subr.bf16.mxu0 %v7749_v4 }
  0x48   : > { %1031 = vmatmul.mubr.bf16.gmra.mrb[4].mxu0 %v901_v22 }
  0x49   : > { %6890 = vmatpush3.bf16.msra.mxu0 %v7749_v4 }
  0x4a   : > { %6891 = vmatprep.subr.bf16.mxu0 %v7750_v5 }
  0x4d   : > { %6892 = vmatpush3.bf16.msra.mxu0 %v7750_v5 }
  0x4e   : > { %6893 = vmatprep.subr.bf16.mxu0 %v7751_v6 }
  0x51   : > { %6894 = vmatpush3.bf16.msra.mxu0 %v7751_v6  ;;  %v6232_v6 = vld [vmem:[%s9544_s7] ss:$0 sm:$0xff] }
  0x52   : > { %6895 = vmatprep.subr.bf16.mxu0 %v7752_v7 }
  0x55   : > { %6896 = vmatpush3.bf16.msra.mxu0 %v7752_v7 }
 0x113   : > { %v1024_v23 = vpop.f32.mrb[0].mxu0 }
 0x114   : > { %v8162_v24 = vmax.f32 %v1024_v23, 0.0  ;;  %v1026_v25 = vpop.f32.mrb[1].mxu0 }
 0x115   : > { %v1027_v26 = vpop.f32.mrb[2].mxu0  ;;  %v6221_v25 = vld [vmem:[%s9538_s29] ss:$0 sm:$0xff]  ;;  %s9541_s29 = sld [smem:[#allocation8_spill]] }
 0x116   : > { %v8164_v27 = vmax.f32 %v1027_v26, 0.0  ;;  %v1029_v28 = vpop.f32.mrb[3].mxu0  ;;  %v1046_v29 = vsel %vm9516_vm1, %v8162_v24, 0.0 }
 0x117   : > { %1047 = vadd.xlane.f32.xlu0 %v1046_v29 }
 0x118   : > { %v1049_v30 = vsel %vm9516_vm1, %v8164_v27, 0.0 }
 0x11b   : > { %1050 = vadd.xlane.f32.xlu0 %v1049_v30  ;;  %v1032_v31 = vpop.f32.mrb[4].mxu0 }
 0x11c   : > { %v8170_v32 = vmax.f32 %v1032_v31, 0.0  ;;  %v1034_v33 = vpop.f32.mrb[5].mxu0  ;;  %v6222_v31 = vld [vmem:[%s9539_s12] ss:$0 sm:$0xff]  ;;  %s9542_s12 = sld [smem:[#allocation10_spill]] }
 0x11d   : > { %v1035_v34 = vpop.f32.mrb[6].mxu0 }
 0x11e   : > { %v8172_v35 = vmax.f32 %v1035_v34, 0.0  ;;  %v1037_v36 = vpop.f32.mrb[7].mxu0  ;;  %v1052_v37 = vsel %vm9516_vm1, %v8170_v32, 0.0 }
 0x11f   : > { %1053 = vadd.xlane.f32.xlu1 %v1052_v37 }
 0x120   : > { %v1055_v38 = vsel %vm9516_vm1, %v8172_v35, 0.0 }
 0x123   : > { %1056 = vadd.xlane.f32.xlu1 %v1055_v38 }
 0x1a4   : > { %v1048_v39 = vpop.xlane.xlu0 %1047 }
 0x1a8   : > { %v1051_v40 = vpop.xlane.xlu0 %1050 }
 0x1a9   : > { %v1058_v42 = vadd.f32 %v1051_v40, %v1048_v39 }
 0x1ac   : > { %v1054_v41 = vpop.xlane.xlu1 %1053 }
 0x1ad   : > { %v1059_v43 = vadd.f32 %v1058_v42, %v1054_v41 }
 0x1b0   : > { %v1057_v44 = vpop.xlane.xlu1 %1056 }
 0x1b1   : > { %v1060_v45 = vadd.f32 %v1059_v43, %v1057_v44  ;;  %v7753_v44 = vld [vmem:[%s9540_s30] sm:$0xff]  }
 0x1b2   : > { %6901 = vmatprep.subr.bf16.mxu1 %v7753_v44 }
 0x1b3   : > { %v1061_v46 = vrot.slane %v1060_v45, 4  ;;  %6902 = vmatpush3.bf16.msra.mxu1 %v7753_v44 }
 0x1b5   : > { %v1062_v47 = vadd.f32 %v1061_v46, %v1060_v45  ;;  %v7754_v45 = vld [vmem:[%s9540_s30 + $0x8] sm:$0xff]   ;;  %v7924_v46 = vmov 0.0  }
 0x1b6   : > { %6903 = vmatprep.subr.bf16.mxu1 %v7754_v45 }
 0x1b7   : > { %v1063_v48 = vrot.slane %v1062_v47, 2  ;;  %6904 = vmatpush3.bf16.msra.mxu1 %v7754_v45 }
 0x1b8   : > { %6909 = vmatprep.subr.bf16.mxu1 %v7924_v46 }
 0x1b9   : > { %v1064_v49 = vadd.f32 %v1063_v48, %v1062_v47  ;;  %v6223_v48 = vld [vmem:[%s9541_s29] ss:$0 sm:$0xff]  ;;  %s7930_s29 = smov 118  }
 0x1bb   : > { %v1065_v50 = vrot.slane %v1064_v49, 1 }
 0x1bd   : > { %v1066_v51 = vadd.f32 %v1065_v50, %v1064_v49 }
 0x1bf   : > { %v1067_v52 = vmul.f32 0.00032552084, %v1066_v51 }
 0x1c1   : > { %v1069_v53 = vsub.f32 %v8164_v27, %v1067_v52  ;;  %v1068_v54 = vsub.f32 %v8162_v24, %v1067_v52  ;;  %v1071_v55 = vsub.f32 %v8172_v35, %v1067_v52  ;;  %v1070_v56 = vsub.f32 %v8170_v32, %v1067_v52 }
 0x1c3   : > { %v1073_v57 = vmul.f32 %v1069_v53, %v1069_v53  ;;  %v1072_v58 = vmul.f32 %v1068_v54, %v1068_v54  ;;  %v1075_v61 = vmul.f32 %v1071_v55, %v1071_v55  ;;  %v1074_v62 = vmul.f32 %v1070_v56, %v1070_v56 }
 0x1c5   : > { %v1079_v59 = vsel %vm9516_vm1, %v1073_v57, 0.0  ;;  %v1076_v60 = vsel %vm9516_vm1, %v1072_v58, 0.0  ;;  %v1085_v63 = vsel %vm9516_vm1, %v1075_v61, 0.0  ;;  %v1082_v0 = vsel %vm9516_vm1, %v1074_v62, 0.0  ;;  %v7755_v58 = vld [vmem:[%s9542_s12] sm:$0xff]  }
 0x1c6   : > { %1080 = vadd.xlane.f32.xlu1 %v1079_v59  ;;  %1077 = vadd.xlane.f32.xlu0 %v1076_v60  ;;  %v7756_v59 = vld [vmem:[%s9542_s12 + $0x8] ss:$0 sps:$4 sm:$0xff]   ;;  %v1236_v60 = vld [vmem:[%s874_s11] sm:$0x1]  ;;  %s9546_s11 = sld [smem:[#allocation13_spill]] }
 0x1c7   : > { %v1341_v61 = vsel %vm1339_vm2, %v7756_v59, 0  ;;  %v8242_v62 = vpack.c.bf16 %v1236_v60, %v1236_v60 }
 0x1ca   : > { %1086 = vadd.xlane.f32.xlu1 %v1085_v63  ;;  %1083 = vadd.xlane.f32.xlu0 %v1082_v0  ;;  %v1238_v63 = vlaneseq }
 0x1cc   : > { %v8246_v3 = vshrl.u32 %v1238_v63, 7 }
 0x1ce   : > { %v8252_v7 = vsub.s32 0, %v8246_v3  ;;  %vm1500_vm10 = vcmp.lt.s32.totalorder %v8246_v3, 1  ;;  %vm1517_vm11 = vcmp.lt.s32.totalorder %v8246_v3, 7  ;;  %vm1492_vm12 = vcmp.ge.s32.totalorder %v8246_v3, 1 }
 0x253   : > { %v1081_v8 = vpop.xlane.xlu1 %1080  ;;  %v1078_v9 = vpop.xlane.xlu0 %1077 }
 0x254   : > { %v1088_v10 = vadd.f32 %v1081_v8, %v1078_v9 }
 0x257   : > { %v1084_v11 = vpop.xlane.xlu0 %1083  ;;  %v1087_v13 = vpop.xlane.xlu1 %1086 }
 0x258   : > { %v1089_v12 = vadd.f32 %v1088_v10, %v1084_v11 }
 0x25a   : > { %v1090_v14 = vadd.f32 %v1089_v12, %v1087_v13 }
 0x25c   : > { %v1091_v15 = vrot.slane %v1090_v14, 4 }
 0x25e   : > { %v1092_v16 = vadd.f32 %v1091_v15, %v1090_v14 }
 0x260   : > { %v1093_v17 = vrot.slane %v1092_v16, 2 }
 0x262   : > { %v1094_v18 = vadd.f32 %v1093_v17, %v1092_v16  ;;  %v6240_v16 = vld [vmem:[%s9545_s6] ss:$0 sm:$0xff] }
 0x264   : > { %v1095_v19 = vrot.slane %v1094_v18, 1 }
 0x266   : > { %v1096_v20 = vadd.f32 %v1095_v19, %v1094_v18 }
 0x268   : > { %v1097_v21 = vmul.f32 0.00032552084, %v1096_v20 }
 0x26a   : > { %v1098_v22 = vadd.f32 1e-08, %v1097_v21 }
 0x26c   : > { %7881 = vrsqrt.f32 %v1098_v22 }
 0x276   : > { %v7882_v23 = vpop.eup %7881 }
 0x277   : > { %v1100_v26 = vmul.f32 %v7882_v23, %v1068_v54  ;;  %v1101_v28 = vmul.f32 %v7882_v23, %v1069_v53  ;;  %v1102_v29 = vmul.f32 %v7882_v23, %v1070_v56  ;;  %v1103_v30 = vmul.f32 %v7882_v23, %v1071_v55 }
 0x279   : > { %v1110_v33 = vmul.f32 %v6221_v25, %v1100_v26  ;;  %v1111_v34 = vmul.f32 %v6221_v25, %v1101_v28  ;;  %v1112_v36 = vmul.f32 %v6221_v25, %v1102_v29  ;;  %v1113_v37 = vmul.f32 %v6221_v25, %v1103_v30 }
 0x27b   : > { %v1120_v38 = vadd.f32 %v6222_v31, %v1110_v33  ;;  %v1121_v39 = vadd.f32 %v6222_v31, %v1111_v34  ;;  %v1122_v40 = vadd.f32 %v6222_v31, %v1112_v36  ;;  %v1123_v41 = vadd.f32 %v6222_v31, %v1113_v37 }
 0x27d   : > { %v1124_v42 = vpack.c.bf16 %v1121_v39, %v1120_v38  ;;  %v1125_v43 = vpack.c.bf16 %v1123_v41, %v1122_v40 }
 0x27f   : > { %6897 = vmatprep.mubr.msk.bf16.mxu0 %vm9516_vm1, %v1124_v42 }
 0x280   : > { %6898 = vmatmul.mubr.msk.bf16.vlgmr.msra.gmra.mrb[8].mxu0 %vm9516_vm1, %v1125_v43 }
 0x353   : > { %v6899_v47 = vpop.f32.mrb[8].mxu0 }
 0x354   : > { %v1221_v49 = vpop.f32.mrb[9].mxu0  ;;  %v1230_v51 = vadd.f32 %v6899_v47, %v6223_v48 }
 0x355   : > { %v6900_v50 = vpop.f32.mrb[10].mxu0  ;;  %v1222_v54 = vadd.f32 %v6223_v48, %v1221_v49 }
 0x356   : > { %v1233_v52 = vadd.f32 %v6900_v50, %v6223_v48  ;;  %v1224_v53 = vpop.f32.mrb[11].mxu0 }
 0x357   : > { %v1225_v55 = vadd.f32 %v6223_v48, %v1224_v53 }
 0x358   : > { %v1244_v56 = vpack.c.bf16 %v1233_v52, %v1230_v51 }
 0x359   : > { %v1243_v57 = vpack.c.bf16 %v1225_v55, %v1222_v54 }
 0x35b   : > { %6905 = vmatprep.mubr.msk.bf16.mxu1 %vm983_vm0, %v1243_v57 }
 0x35c   : > { %6906 = vmatmul.mubr.msk.bf16.vlgmr.msra.gmra.mrb[0].mxu1 %vm983_vm0, %v1244_v56 }
 0x35d   : > { %6910 = vmatpush3.bf16.msra.mxu1 %v7755_v58  ;;  %6913 = vmatprep.mubr.msk.bf16.mxu1 %vm7925_vm3, %v7924_v46 }
 0x35e   : > { %6911 = vmatprep.subr.bf16.mxu1 %v7924_v46 }
 0x361   : > { %6912 = vmatpush3.bf16.msra.mxu1 %v1341_v61 }
 0x364   : > { %6914 = vmatmul.mubr.msk.bf16.vlgmr.msra.gmra.mrb[4].mxu1 %vm1335_vm4, %v8242_v62 }
 0x42f   : > { %v6907_v0 = vpop.f32.mrb[0].mxu1 }
 0x430   : > { %v1308_v2 = vpop.f32.mrb[1].mxu1  ;;  %v1317_v8 = vadd.f32 %v6907_v0, %v6232_v6 }
 0x431   : > { %v6908_v4 = vpop.f32.mrb[2].mxu1  ;;  %v1309_v10 = vadd.f32 %v6232_v6, %v1308_v2 }
 0x432   : > { %v1311_v5 = vpop.f32.mrb[3].mxu1  ;;  %v1320_v11 = vadd.f32 %v6908_v4, %v6232_v6 }
 0x433   : > { %v1312_v12 = vadd.f32 %v6232_v6, %v1311_v5 }
 0x437   : > { %v1377_v9 = vpop.f32.mrb[4].mxu1 }
 0x438   : > { %v1386_v13 = vrot.slane %v1377_v9, %v8252_v7  ;;  %v6915_v14 = vpop.f32.mrb[5].mxu1 }
 0x439   : > { %v1380_v15 = vpop.f32.mrb[6].mxu1 }
 0x43a   : > { %v6916_v17 = vpop.f32.mrb[7].mxu1  ;;  %v1388_v18 = vadd.f32 %v1386_v13, %v1312_v12  ;;  %v1387_v19 = vadd.f32 %v1386_v13, %v1309_v10  ;;  %v1390_v20 = vadd.f32 %v1386_v13, %v1320_v11  ;;  %v1389_v21 = vadd.f32 %v1386_v13, %v1317_v8 }
 0x43c   : > { %vm1392_vm6 = vcmp.ge.f32.partialorder %v1388_v18, 0.0  ;;  %v1403_v22 = vmul.f32 %v6240_v16, %v1388_v18  ;;  %vm1391_vm7 = vcmp.ge.f32.partialorder %v1387_v19, 0.0  ;;  %v1402_v23 = vmul.f32 %v6240_v16, %v1387_v19 }
 0x43d   : > { %vm1394_vm8 = vcmp.ge.f32.partialorder %v1390_v20, 0.0  ;;  %v1405_v25 = vmul.f32 %v6240_v16, %v1390_v20  ;;  %vm1393_vm9 = vcmp.ge.f32.partialorder %v1389_v21, 0.0  ;;  %v1404_v26 = vmul.f32 %v6240_v16, %v1389_v21 }
 0x43e   : > { %v1407_v28 = vsel %vm1392_vm6, %v1388_v18, %v1403_v22  ;;  %v1406_v29 = vsel %vm1391_vm7, %v1387_v19, %v1402_v23  ;;  %v8270_v22 = vsub.s32 1, %v8246_v3 }
 0x43f   : > { %v1416_v30 = vsel %vm1412_vm5, %v1407_v28, 0.0  ;;  %v1413_v31 = vsel %vm1412_vm5, %v1406_v29, 0.0  ;;  %v1409_v33 = vsel %vm1394_vm8, %v1390_v20, %v1405_v25  ;;  %v1408_v34 = vsel %vm1393_vm9, %v1389_v21, %v1404_v26  ;;  %v6241_v21 = vld [vmem:[%s9546_s11] ss:$0 sm:$0xff] }
 0x440   : > { %1417 = vadd.xlane.f32.xlu1 %v1416_v30  ;;  %1414 = vadd.xlane.f32.xlu0 %v1413_v31  ;;  %v1422_v36 = vsel %vm1412_vm5, %v1409_v33, 0.0  ;;  %v1419_v37 = vsel %vm1412_vm5, %v1408_v34, 0.0  ;;  %v6242_v30 = vld [vmem:[%s9547_s0] ss:$0 sm:$0xff]  ;;  %v8279_v31 = vsub.s32 2, %v8246_v3 }
 0x444   : > { %1423 = vadd.xlane.f32.xlu1 %v1422_v36  ;;  %1420 = vadd.xlane.f32.xlu0 %v1419_v37 }
 0x4cd   : > { %v1418_v38 = vpop.xlane.xlu1 %1417  ;;  %v1415_v39 = vpop.xlane.xlu0 %1414 }
 0x4ce   : > { %v1425_v40 = vadd.f32 %v1418_v38, %v1415_v39 }
 0x4d1   : > { %v1421_v41 = vpop.xlane.xlu0 %1420  ;;  %v1424_v43 = vpop.xlane.xlu1 %1423 }
 0x4d2   : > { %v1426_v42 = vadd.f32 %v1425_v40, %v1421_v41 }
 0x4d4   : > { %v1427_v44 = vadd.f32 %v1426_v42, %v1424_v43 }
 0x4d6   : > { %v1428_v45 = vrot.slane %v1427_v44, 4 }
 0x4d8   : > { %v1429_v47 = vadd.f32 %v1428_v45, %v1427_v44 }
 0x4da   : > { %v1430_v48 = vrot.slane %v1429_v47, 2 }
 0x4dc   : > { %v1431_v49 = vadd.f32 %v1430_v48, %v1429_v47 }
 0x4de   : > { %v1432_v50 = vrot.slane %v1431_v49, 1 }
 0x4e0   : > { %v1433_v51 = vadd.f32 %v1432_v50, %v1431_v49 }
 0x4e2   : > { %v1434_v52 = vmul.f32 0.0006510417, %v1433_v51 }
 0x4e4   : > { %v1436_v53 = vsub.f32 %v1407_v28, %v1434_v52  ;;  %v1435_v54 = vsub.f32 %v1406_v29, %v1434_v52  ;;  %v1438_v55 = vsub.f32 %v1409_v33, %v1434_v52  ;;  %v1437_v56 = vsub.f32 %v1408_v34, %v1434_v52  ;;  %v1491_v28 = vld [vmem:[%s9491_s13] sm:$0x7] }
 0x4e5   : > { %v8282_v33 = vadd.s32 24, %v8246_v3  ;;  %v1537_v39 = vrot.slane %v1491_v28, %v8270_v22  ;;  %v1529_v44 = vrot.slane %v1491_v28, %v8252_v7  ;;  %v1549_v45 = vrot.slane %v1491_v28, %v8279_v31 }
 0x4e6   : > { %v1440_v57 = vmul.f32 %v1436_v53, %v1436_v53  ;;  %v1439_v58 = vmul.f32 %v1435_v54, %v1435_v54  ;;  %v1442_v61 = vmul.f32 %v1438_v55, %v1438_v55  ;;  %v1441_v63 = vmul.f32 %v1437_v56, %v1437_v56 }
 0x4e7   : > { %vm1512_vm13 = vcmp.lt.s32.totalorder %v8282_v33, 31 }
 0x4e8   : > { %v1446_v59 = vsel %vm1412_vm5, %v1440_v57, 0.0  ;;  %v1443_v60 = vsel %vm1412_vm5, %v1439_v58, 0.0  ;;  %v1452_v0 = vsel %vm1412_vm5, %v1442_v61, 0.0  ;;  %v1449_v2 = vsel %vm1412_vm5, %v1441_v63, 0.0 }
 0x4e9   : > { %1447 = vadd.xlane.f32.xlu1 %v1446_v59  ;;  %1444 = vadd.xlane.f32.xlu0 %v1443_v60 }
 0x4ed   : > { %1453 = vadd.xlane.f32.xlu1 %v1452_v0  ;;  %1450 = vadd.xlane.f32.xlu0 %v1449_v2 }
 0x576   : > { %v1448_v4 = vpop.xlane.xlu1 %1447  ;;  %v1445_v5 = vpop.xlane.xlu0 %1444 }
 0x577   : > { %v1455_v6 = vadd.f32 %v1448_v4, %v1445_v5 }
 0x57a   : > { %v1451_v8 = vpop.xlane.xlu0 %1450  ;;  %v1454_v10 = vpop.xlane.xlu1 %1453 }
 0x57b   : > { %v1456_v9 = vadd.f32 %v1455_v6, %v1451_v8 }
 0x57d   : > { %v1457_v11 = vadd.f32 %v1456_v9, %v1454_v10 }
 0x57f   : > { %v1458_v12 = vrot.slane %v1457_v11, 4 }
 0x581   : > { %v1459_v13 = vadd.f32 %v1458_v12, %v1457_v11  ;;  %v6243_v11 = vld [vmem:[%s9492_s14] ss:$0 sm:$0xff] }
 0x583   : > { %v1460_v14 = vrot.slane %v1459_v13, 2 }
 0x585   : > { %v1461_v15 = vadd.f32 %v1460_v14, %v1459_v13 }
 0x587   : > { %v1462_v16 = vrot.slane %v1461_v15, 1 }
 0x589   : > { %v1463_v17 = vadd.f32 %v1462_v16, %v1461_v15 }
 0x58b   : > { %v1464_v18 = vmul.f32 0.0006510417, %v1463_v17 }
 0x58d   : > { %v1465_v19 = vadd.f32 1e-08, %v1464_v18 }
 0x58f   : > { %7883 = vrsqrt.f32 %v1465_v19 }
 0x599   : > { %v7884_v20 = vpop.eup %7883 }
 0x59a   : > { %v1467_v23 = vmul.f32 %v7884_v20, %v1435_v54  ;;  %v1468_v25 = vmul.f32 %v7884_v20, %v1436_v53  ;;  %v1469_v26 = vmul.f32 %v7884_v20, %v1437_v56  ;;  %v1470_v29 = vmul.f32 %v7884_v20, %v1438_v55  ;;  %v6244_v20 = vld [vmem:[%s9493_s15] ss:$0 sm:$0xff] }
 0x59c   : > { %v1477_v34 = vmul.f32 %v6241_v21, %v1467_v23  ;;  %v1478_v36 = vmul.f32 %v6241_v21, %v1468_v25  ;;  %v1479_v37 = vmul.f32 %v6241_v21, %v1469_v26  ;;  %v1480_v38 = vmul.f32 %v6241_v21, %v1470_v29 }
 0x59e   : > { %v1487_v40 = vadd.f32 %v6242_v30, %v1477_v34  ;;  %v1488_v41 = vadd.f32 %v6242_v30, %v1478_v36  ;;  %v1489_v42 = vadd.f32 %v6242_v30, %v1479_v37  ;;  %v1490_v43 = vadd.f32 %v6242_v30, %v1480_v38 }
 0x5a0   : > { %v1496_v47 = vrot.slane %v1487_v40, 7  ;;  %v1497_v48 = vrot.slane %v1488_v41, 7  ;;  %v1514_v49 = vrot.slane %v1488_v41, 1  ;;  %v1515_v50 = vrot.slane %v1489_v42, 1 }
 0x5a1   : > { %v1539_v51 = vmul.f32 %v1537_v39, %v1488_v41  ;;  %v1499_v52 = vrot.slane %v1490_v43, 7  ;;  %v1513_v53 = vrot.slane %v1487_v40, 1  ;;  %v1538_v54 = vmul.f32 %v1537_v39, %v1487_v40 }
 0x5a2   : > { %v1503_v55 = vsel %vm1500_vm10, %v1496_v47, %v1497_v48  ;;  %v1519_v56 = vsel %vm1517_vm11, %v1514_v49, %v1515_v50  ;;  %v1498_v57 = vrot.slane %v1489_v42, 7  ;;  %v1516_v58 = vrot.slane %v1490_v43, 1 }
 0x5a3   : > { %v1531_v59 = vmul.f32 %v1529_v44, %v1503_v55  ;;  %v1551_v60 = vmul.f32 %v1549_v45, %v1519_v56  ;;  %v1504_v61 = vsel %vm1500_vm10, %v1499_v52, %v1496_v47  ;;  %v1520_v63 = vsel %vm1517_vm11, %v1513_v53, %v1514_v49 }
 0x5a4   : > { %v1505_v0 = vsel %vm1492_vm12, %v1504_v61, 0.0  ;;  %v1550_v2 = vmul.f32 %v1549_v45, %v1520_v63  ;;  %v1501_v4 = vsel %vm1500_vm10, %v1498_v57, %v1499_v52  ;;  %v1521_v5 = vsel %vm1517_vm11, %v1516_v58, %v1513_v53 }
 0x5a5   : > { %v1543_v6 = vadd.f32 %v1539_v51, %v1531_v59  ;;  %v1530_v8 = vmul.f32 %v1529_v44, %v1505_v0  ;;  %v1525_v9 = vsel %vm1512_vm13, %v1521_v5, 0.0  ;;  %v1533_v10 = vmul.f32 %v1529_v44, %v1501_v4 }
 0x5a6   : > { %v1541_v12 = vmul.f32 %v1537_v39, %v1490_v43  ;;  %v1553_v13 = vmul.f32 %v1549_v45, %v1525_v9  ;;  %v1502_v14 = vsel %vm1500_vm10, %v1497_v48, %v1498_v57  ;;  %v1518_v15 = vsel %vm1517_vm11, %v1515_v50, %v1516_v58 }
 0x5a7   : > { %v1555_v16 = vadd.f32 %v1551_v60, %v1543_v6  ;;  %v1542_v17 = vadd.f32 %v1538_v54, %v1530_v8  ;;  %v1532_v18 = vmul.f32 %v1529_v44, %v1502_v14  ;;  %v1540_v19 = vmul.f32 %v1537_v39, %v1489_v42 }
 0x5a8   : > { %v1545_v21 = vadd.f32 %v1541_v12, %v1533_v10  ;;  %v1552_v28 = vmul.f32 %v1549_v45, %v1518_v15 }
 0x5a9   : > { %v1566_v23 = vadd.f32 %v6243_v11, %v1555_v16  ;;  %v1554_v25 = vadd.f32 %v1550_v2, %v1542_v17  ;;  %v1544_v26 = vadd.f32 %v1540_v19, %v1532_v18  ;;  %v7757_v17 = vld [vmem:[%s9496_s18] sm:$0xff]   ;;  %v7758_v18 = vld [vmem:[%s9496_s18 + $0x8] sm:$0xff]   ;;  %v7759_v19 = vld [vmem:[%s9496_s18 + $0x10] sm:$0xff]  }
 0x5aa   : > { %v1557_v29 = vadd.f32 %v1553_v13, %v1545_v21  ;;  %6917 = vmatprep.subr.bf16.mxu1 %v7757_v17 }
 0x5ab   : > { %vm1570_vm14 = vcmp.ge.f32.partialorder %v1566_v23, 0.0  ;;  %v1581_v30 = vmul.f32 %v6244_v20, %v1566_v23  ;;  %v1565_v34 = vadd.f32 %v6243_v11, %v1554_v25  ;;  %v1556_v36 = vadd.f32 %v1552_v28, %v1544_v26  ;;  %6918 = vmatpush3.bf16.msra.mxu1 %v7757_v17 }
 0x5ac   : > { %v1568_v37 = vadd.f32 %v6243_v11, %v1557_v29  ;;  %6919 = vmatprep.subr.bf16.mxu1 %v7758_v18 }
 0x5ad   : > { %v1585_v38 = vsel %vm1570_vm14, %v1566_v23, %v1581_v30  ;;  %vm1569_vm15 = vcmp.ge.f32.partialorder %v1565_v34, 0.0  ;;  %v1580_v40 = vmul.f32 %v6244_v20, %v1565_v34  ;;  %v1567_v41 = vadd.f32 %v6243_v11, %v1556_v36 }
 0x5ae   : > { %v1593_v39 = vsel %vm1412_vm5, %v1585_v38, 0.0  ;;  %vm1572_vm6 = vcmp.ge.f32.partialorder %v1568_v37, 0.0  ;;  %v1583_v42 = vmul.f32 %v6244_v20, %v1568_v37 }
 0x5af   : > { %1594 = vadd.xlane.f32.xlu1 %v1593_v39  ;;  %v1584_v43 = vsel %vm1569_vm15, %v1565_v34, %v1580_v40  ;;  %vm1571_vm7 = vcmp.ge.f32.partialorder %v1567_v41, 0.0  ;;  %v1582_v44 = vmul.f32 %v6244_v20, %v1567_v41  ;;  %6920 = vmatpush3.bf16.msra.mxu1 %v7758_v18 }
 0x5b0   : > { %v1590_v45 = vsel %vm1412_vm5, %v1584_v43, 0.0  ;;  %v1587_v47 = vsel %vm1572_vm6, %v1568_v37, %v1583_v42  ;;  %6921 = vmatprep.subr.bf16.mxu1 %v7759_v19  ;;  %vm1950_vm6 = vcmp.lt.s32.totalorder %v8246_v3, 2 }
 0x5b1   : > { %1591 = vadd.xlane.f32.xlu0 %v1590_v45  ;;  %v1586_v48 = vsel %vm1571_vm7, %v1567_v41, %v1582_v44  ;;  %v1599_v49 = vsel %vm1412_vm5, %v1587_v47, 0.0  ;;  %vm1967_vm7 = vcmp.lt.s32.totalorder %v8246_v3, 6 }
 0x5b2   : > { %v1596_v50 = vsel %vm1412_vm5, %v1586_v48, 0.0 }
 0x5b3   : > { %1600 = vadd.xlane.f32.xlu1 %v1599_v49  ;;  %6922 = vmatpush3.bf16.msra.mxu1 %v7759_v19  ;;  %v6246_v49 = vld [vmem:[%s9495_s17] ss:$0 sm:$0xff] }
 0x5b5   : > { %1597 = vadd.xlane.f32.xlu0 %v1596_v50 }
 0x63c   : > { %v1595_v51 = vpop.xlane.xlu1 %1594 }
 0x63e   : > { %v1592_v52 = vpop.xlane.xlu0 %1591 }
 0x63f   : > { %v1602_v53 = vadd.f32 %v1595_v51, %v1592_v52 }
 0x640   : > { %v1601_v56 = vpop.xlane.xlu1 %1600 }
 0x642   : > { %v1598_v54 = vpop.xlane.xlu0 %1597 }
 0x643   : > { %v1603_v55 = vadd.f32 %v1602_v53, %v1598_v54 }
 0x645   : > { %v1604_v57 = vadd.f32 %v1603_v55, %v1601_v56 }
 0x647   : > { %v1605_v58 = vrot.slane %v1604_v57, 4 }
 0x649   : > { %v1606_v59 = vadd.f32 %v1605_v58, %v1604_v57 }
 0x64b   : > { %v1607_v60 = vrot.slane %v1606_v59, 2 }
 0x64d   : > { %v1608_v61 = vadd.f32 %v1607_v60, %v1606_v59  ;;  %v7760_v60 = vld [vmem:[%s9540_s30 + $0x10] sm:$0xff]  }
 0x64e   : > { %6927 = vmatprep.subr.bf16.mxu0 %v7760_v60 }
 0x64f   : > { %v1609_v63 = vrot.slane %v1608_v61, 1  ;;  %6928 = vmatpush3.bf16.msra.mxu0 %v7760_v60 }
 0x651   : > { %v1610_v0 = vadd.f32 %v1609_v63, %v1608_v61  ;;  %v7761_v61 = vld [vmem:[%s9540_s30 + $0x18] sm:$0xff]  }
 0x652   : > { %6929 = vmatprep.subr.bf16.mxu0 %v7761_v61 }
 0x653   : > { %v1611_v2 = vmul.f32 0.0006510417, %v1610_v0  ;;  %6930 = vmatpush3.bf16.msra.mxu0 %v7761_v61  ;;  %v6247_v0 = vld [vmem:[%s9497_s19] ss:$0 sm:$0xff] }
 0x655   : > { %v1613_v4 = vsub.f32 %v1585_v38, %v1611_v2  ;;  %v1612_v5 = vsub.f32 %v1584_v43, %v1611_v2  ;;  %v1615_v6 = vsub.f32 %v1587_v47, %v1611_v2  ;;  %v1614_v8 = vsub.f32 %v1586_v48, %v1611_v2  ;;  %v6245_v43 = vld [vmem:[%s9494_s16] ss:$0 sm:$0xff] }
 0x657   : > { %v1617_v9 = vmul.f32 %v1613_v4, %v1613_v4  ;;  %v1616_v10 = vmul.f32 %v1612_v5, %v1612_v5  ;;  %v1619_v13 = vmul.f32 %v1615_v6, %v1615_v6  ;;  %v1618_v14 = vmul.f32 %v1614_v8, %v1614_v8 }
 0x659   : > { %v1623_v11 = vsel %vm1412_vm5, %v1617_v9, 0.0  ;;  %v1620_v12 = vsel %vm1412_vm5, %v1616_v10, 0.0  ;;  %v1629_v15 = vsel %vm1412_vm5, %v1619_v13, 0.0  ;;  %v1626_v16 = vsel %vm1412_vm5, %v1618_v14, 0.0  ;;  %v6258_v13 = vld [vmem:[%s9544_s7 + $0x1] ss:$0 sm:$0xff] }
 0x65a   : > { %1624 = vadd.xlane.f32.xlu1 %v1623_v11  ;;  %1621 = vadd.xlane.f32.xlu0 %v1620_v12 }
 0x65e   : > { %1630 = vadd.xlane.f32.xlu1 %v1629_v15  ;;  %1627 = vadd.xlane.f32.xlu0 %v1626_v16  ;;  %v6264_v16 = vld [vmem:[%s9545_s6 + $0x1] ss:$0 sm:$0xff] }
 0x6e7   : > { %v1625_v20 = vpop.xlane.xlu1 %1624  ;;  %v1622_v21 = vpop.xlane.xlu0 %1621 }
 0x6e8   : > { %v1632_v23 = vadd.f32 %v1625_v20, %v1622_v21 }
 0x6eb   : > { %v1628_v25 = vpop.xlane.xlu0 %1627  ;;  %v1631_v28 = vpop.xlane.xlu1 %1630 }
 0x6ec   : > { %v1633_v26 = vadd.f32 %v1632_v23, %v1628_v25 }
 0x6ee   : > { %v1634_v29 = vadd.f32 %v1633_v26, %v1631_v28 }
 0x6f0   : > { %v1635_v30 = vrot.slane %v1634_v29, 4 }
 0x6f2   : > { %v1636_v34 = vadd.f32 %v1635_v30, %v1634_v29 }
 0x6f4   : > { %v1637_v36 = vrot.slane %v1636_v34, 2 }
 0x6f6   : > { %v1638_v37 = vadd.f32 %v1637_v36, %v1636_v34 }
 0x6f8   : > { %v1639_v38 = vrot.slane %v1638_v37, 1 }
 0x6fa   : > { %v1640_v40 = vadd.f32 %v1639_v38, %v1638_v37 }
 0x6fc   : > { %v1641_v41 = vmul.f32 0.0006510417, %v1640_v40 }
 0x6fe   : > { %v1642_v39 = vadd.f32 1e-08, %v1641_v41 }
 0x700   : > { %7885 = vrsqrt.f32 %v1642_v39 }
 0x70a   : > { %v7886_v42 = vpop.eup %7885 }
 0x70b   : > { %v1644_v44 = vmul.f32 %v7886_v42, %v1612_v5  ;;  %v1645_v45 = vmul.f32 %v7886_v42, %v1613_v4  ;;  %v1646_v47 = vmul.f32 %v7886_v42, %v1614_v8  ;;  %v1647_v48 = vmul.f32 %v7886_v42, %v1615_v6 }
 0x70d   : > { %v1654_v50 = vmul.f32 %v6245_v43, %v1644_v44  ;;  %v1655_v51 = vmul.f32 %v6245_v43, %v1645_v45  ;;  %v1656_v52 = vmul.f32 %v6245_v43, %v1646_v47  ;;  %v1657_v53 = vmul.f32 %v6245_v43, %v1647_v48 }
 0x70f   : > { %v1664_v54 = vadd.f32 %v6246_v49, %v1654_v50  ;;  %v1665_v55 = vadd.f32 %v6246_v49, %v1655_v51  ;;  %v1666_v56 = vadd.f32 %v6246_v49, %v1656_v52  ;;  %v1667_v57 = vadd.f32 %v6246_v49, %v1657_v53 }
 0x711   : > { %v1668_v58 = vpack.c.bf16 %v1665_v55, %v1664_v54  ;;  %v1669_v59 = vpack.c.bf16 %v1667_v57, %v1666_v56 }
 0x713   : > { %6923 = vmatprep.mubr.msk.bf16.mxu1 %vm1412_vm5, %v1668_v58 }
 0x714   : > { %6924 = vmatmul.mubr.msk.bf16.vlgmr.msra.gmra.mrb[8].mxu1 %vm1412_vm5, %v1669_v59 }
 0x7e7   : > { %v6925_v63 = vpop.f32.mrb[8].mxu1 }
 0x7e8   : > { %v1741_v2 = vpop.f32.mrb[9].mxu1  ;;  %v8357_v10 = vadd.f32 %v6925_v63, %v6247_v0 }
 0x7e9   : > { %v6926_v4 = vpop.f32.mrb[10].mxu1  ;;  %v8353_v8 = vadd.f32 %v6247_v0, %v1741_v2 }
 0x7ea   : > { %v8351_v5 = vadd.f32 %v6926_v4, %v6247_v0  ;;  %v1744_v6 = vpop.f32.mrb[11].mxu1 }
 0x7eb   : > { %v8355_v9 = vadd.f32 %v6247_v0, %v1744_v6 }
 0x7ec   : > { %v1757_v12 = vpack.c.bf16 %v8351_v5, %v8357_v10 }
 0x7ed   : > { %v1756_v11 = vpack.c.bf16 %v8355_v9, %v8353_v8 }
 0x7ef   : > { %6931 = vmatprep.mubr.msk.bf16.mxu0 %vm983_vm0, %v1756_v11 }
 0x7f0   : > { %6932 = vmatmul.mubr.msk.bf16.vlgmr.msra.gmra.mrb[12].mxu0 %vm983_vm0, %v1757_v12 }
 0x8c3   : > { %v6933_v14 = vpop.f32.mrb[12].mxu0 }
 0x8c4   : > { %v1832_v15 = vadd.f32 %v6933_v14, %v6258_v13  ;;  %v1823_v17 = vpop.f32.mrb[13].mxu0 }
 0x8c5   : > { %v1824_v18 = vadd.f32 %v6258_v13, %v1823_v17  ;;  %v6934_v19 = vpop.f32.mrb[14].mxu0 }
 0x8c6   : > { %v1835_v20 = vadd.f32 %v6934_v19, %v6258_v13  ;;  %v1826_v21 = vpop.f32.mrb[15].mxu0  ;;  %v1852_v23 = vmul.f32 %v6264_v16, %v1832_v15  ;;  %vm1840_vm9 = vcmp.ge.f32.partialorder %v1832_v15, 0.0 }
 0x8c7   : > { %v1850_v25 = vmul.f32 %v6264_v16, %v1824_v18  ;;  %v1827_v26 = vadd.f32 %v6258_v13, %v1826_v21  ;;  %vm1838_vm8 = vcmp.ge.f32.partialorder %v1824_v18, 0.0 }
 0x8c8   : > { %v1853_v28 = vmul.f32 %v6264_v16, %v1835_v20  ;;  %vm1841_vm15 = vcmp.ge.f32.partialorder %v1835_v20, 0.0  ;;  %v1856_v37 = vsel %vm1840_vm9, %v1832_v15, %v1852_v23  ;;  %vm9517_vm9 = vcmp.lt.s32.totalorder %v8282_v33, 30 }
 0x8c9   : > { %v1851_v29 = vmul.f32 %v6264_v16, %v1827_v26  ;;  %v1854_v30 = vsel %vm1838_vm8, %v1824_v18, %v1850_v25  ;;  %vm1839_vm14 = vcmp.ge.f32.partialorder %v1827_v26, 0.0  ;;  %v1868_v41 = vsel %vm1412_vm5, %v1856_v37, 0.0 }
 0x8ca   : > { %v1862_v34 = vsel %vm1412_vm5, %v1854_v30, 0.0  ;;  %v1857_v40 = vsel %vm1841_vm15, %v1835_v20, %v1853_v28  ;;  %vm1942_vm8 = vcmp.ge.s32.totalorder %v8246_v3, 2 }
 0x8cb   : > { %1863 = vadd.xlane.f32.xlu0 %v1862_v34  ;;  %v1855_v36 = vsel %vm1839_vm14, %v1827_v26, %v1851_v29  ;;  %v1871_v39 = vsel %vm1412_vm5, %v1857_v40, 0.0 }
 0x8cc   : > { %v1865_v38 = vsel %vm1412_vm5, %v1855_v36, 0.0 }
 0x8cd   : > { %1866 = vadd.xlane.f32.xlu1 %v1865_v38 }
 0x8cf   : > { %1869 = vadd.xlane.f32.xlu0 %v1868_v41  ;;  %v6269_v41 = vld [vmem:[%s9491_s13 + $0x4] sm:$0x7] }
 0x8d1   : > { %1872 = vadd.xlane.f32.xlu1 %v1871_v39 }
 0x958   : > { %v1864_v42 = vpop.xlane.xlu0 %1863 }
 0x95a   : > { %v1867_v43 = vpop.xlane.xlu1 %1866 }
 0x95b   : > { %v1874_v44 = vadd.f32 %v1867_v43, %v1864_v42  ;;  %v6268_v42 = vld [vmem:[%s9547_s0 + $0x1] ss:$0 sm:$0xff] }
 0x95c   : > { %v1870_v45 = vpop.xlane.xlu0 %1869 }
 0x95d   : > { %v1875_v47 = vadd.f32 %v1874_v44, %v1870_v45 }
 0x95e   : > { %v1873_v48 = vpop.xlane.xlu1 %1872 }
 0x95f   : > { %v1876_v49 = vadd.f32 %v1875_v47, %v1873_v48  ;;  %v1987_v48 = vrot.slane %v6269_v41, %v8270_v22 }
 0x961   : > { %v1877_v50 = vrot.slane %v1876_v49, 4 }
 0x963   : > { %v1878_v51 = vadd.f32 %v1877_v50, %v1876_v49 }
 0x965   : > { %v1879_v52 = vrot.slane %v1878_v51, 2 }
 0x967   : > { %v1880_v53 = vadd.f32 %v1879_v52, %v1878_v51 }
 0x969   : > { %v1881_v54 = vrot.slane %v1880_v53, 1 }
 0x96b   : > { %v1882_v55 = vadd.f32 %v1881_v54, %v1880_v53  ;;  %v1979_v53 = vrot.slane %v6269_v41, %v8252_v7  ;;  %v1999_v54 = vrot.slane %v6269_v41, %v8279_v31 }
 0x96d   : > { %v1883_v56 = vmul.f32 0.0006510417, %v1882_v55 }
 0x96f   : > { %v1885_v57 = vsub.f32 %v1855_v36, %v1883_v56  ;;  %v1884_v58 = vsub.f32 %v1854_v30, %v1883_v56  ;;  %v1887_v59 = vsub.f32 %v1857_v40, %v1883_v56  ;;  %v1886_v60 = vsub.f32 %v1856_v37, %v1883_v56  ;;  %v6267_v36 = vld [vmem:[%s9546_s11 + $0x1] ss:$0 sm:$0xff] }
 0x971   : > { %v1889_v61 = vmul.f32 %v1885_v57, %v1885_v57  ;;  %v1888_v63 = vmul.f32 %v1884_v58, %v1884_v58  ;;  %v1891_v4 = vmul.f32 %v1887_v59, %v1887_v59  ;;  %v1890_v6 = vmul.f32 %v1886_v60, %v1886_v60 }
 0x973   : > { %v1895_v0 = vsel %vm1412_vm5, %v1889_v61, 0.0  ;;  %v1892_v2 = vsel %vm1412_vm5, %v1888_v63, 0.0  ;;  %v1901_v11 = vsel %vm1412_vm5, %v1891_v4, 0.0  ;;  %v1898_v12 = vsel %vm1412_vm5, %v1890_v6, 0.0 }
 0x974   : > { %1896 = vadd.xlane.f32.xlu1 %v1895_v0  ;;  %1893 = vadd.xlane.f32.xlu0 %v1892_v2 }
 0x978   : > { %1902 = vadd.xlane.f32.xlu1 %v1901_v11  ;;  %1899 = vadd.xlane.f32.xlu0 %v1898_v12 }
 0xa01   : > { %v1897_v13 = vpop.xlane.xlu1 %1896  ;;  %v1894_v14 = vpop.xlane.xlu0 %1893 }
 0xa02   : > { %v1904_v15 = vadd.f32 %v1897_v13, %v1894_v14 }
 0xa05   : > { %v1900_v16 = vpop.xlane.xlu0 %1899  ;;  %v1903_v18 = vpop.xlane.xlu1 %1902 }
 0xa06   : > { %v1905_v17 = vadd.f32 %v1904_v15, %v1900_v16 }
 0xa08   : > { %v1906_v19 = vadd.f32 %v1905_v17, %v1903_v18 }
 0xa0a   : > { %v1907_v20 = vrot.slane %v1906_v19, 4 }
 0xa0c   : > { %v1908_v21 = vadd.f32 %v1907_v20, %v1906_v19 }
 0xa0e   : > { %v1909_v23 = vrot.slane %v1908_v21, 2 }
 0xa10   : > { %v1910_v25 = vadd.f32 %v1909_v23, %v1908_v21 }
 0xa12   : > { %v1911_v26 = vrot.slane %v1910_v25, 1 }
 0xa14   : > { %v1912_v28 = vadd.f32 %v1911_v26, %v1910_v25  ;;  %v6271_v25 = vld [vmem:[%s9492_s14 + $0x1] ss:$0 sm:$0xff] }
 0xa16   : > { %v1913_v29 = vmul.f32 0.0006510417, %v1912_v28 }
 0xa18   : > { %v1914_v30 = vadd.f32 1e-08, %v1913_v29 }
 0xa1a   : > { %7887 = vrsqrt.f32 %v1914_v30 }
 0xa24   : > { %v7888_v34 = vpop.eup %7887 }
 0xa25   : > { %v1916_v37 = vmul.f32 %v7888_v34, %v1884_v58  ;;  %v1917_v38 = vmul.f32 %v7888_v34, %v1885_v57  ;;  %v1918_v40 = vmul.f32 %v7888_v34, %v1886_v60  ;;  %v1919_v39 = vmul.f32 %v7888_v34, %v1887_v59 }
 0xa27   : > { %v1926_v43 = vmul.f32 %v6267_v36, %v1916_v37  ;;  %v1927_v44 = vmul.f32 %v6267_v36, %v1917_v38  ;;  %v1928_v45 = vmul.f32 %v6267_v36, %v1918_v40  ;;  %v1929_v47 = vmul.f32 %v6267_v36, %v1919_v39  ;;  %v6273_v40 = vld [vmem:[%s9493_s15 + $0x1] ss:$0 sm:$0xff] }
 0xa29   : > { %v1936_v49 = vadd.f32 %v6268_v42, %v1926_v43  ;;  %v1937_v50 = vadd.f32 %v6268_v42, %v1927_v44  ;;  %v1938_v51 = vadd.f32 %v6268_v42, %v1928_v45  ;;  %v1939_v52 = vadd.f32 %v6268_v42, %v1929_v47 }
 0xa2b   : > { %v1946_v55 = vrot.slane %v1936_v49, 6  ;;  %v1947_v56 = vrot.slane %v1937_v50, 6  ;;  %v1964_v57 = vrot.slane %v1937_v50, 2  ;;  %v1965_v58 = vrot.slane %v1938_v51, 2 }
 0xa2c   : > { %v1989_v59 = vmul.f32 %v1987_v48, %v1937_v50  ;;  %v1949_v60 = vrot.slane %v1939_v52, 6  ;;  %v1963_v61 = vrot.slane %v1936_v49, 2  ;;  %v1988_v63 = vmul.f32 %v1987_v48, %v1936_v49 }
 0xa2d   : > { %v1953_v0 = vsel %vm1950_vm6, %v1946_v55, %v1947_v56  ;;  %v1969_v2 = vsel %vm1967_vm7, %v1964_v57, %v1965_v58  ;;  %v1948_v4 = vrot.slane %v1938_v51, 6  ;;  %v1966_v6 = vrot.slane %v1939_v52, 2 }
 0xa2e   : > { %v1981_v11 = vmul.f32 %v1979_v53, %v1953_v0  ;;  %v2001_v12 = vmul.f32 %v1999_v54, %v1969_v2  ;;  %v1954_v13 = vsel %vm1950_vm6, %v1949_v60, %v1946_v55  ;;  %v1970_v14 = vsel %vm1967_vm7, %v1963_v61, %v1964_v57 }
 0xa2f   : > { %v1955_v15 = vsel %vm1942_vm8, %v1954_v13, 0.0  ;;  %v2000_v16 = vmul.f32 %v1999_v54, %v1970_v14  ;;  %v1951_v17 = vsel %vm1950_vm6, %v1948_v4, %v1949_v60  ;;  %v1971_v18 = vsel %vm1967_vm7, %v1966_v6, %v1963_v61 }
 0xa30   : > { %v1993_v19 = vadd.f32 %v1989_v59, %v1981_v11  ;;  %v1980_v20 = vmul.f32 %v1979_v53, %v1955_v15  ;;  %v1975_v21 = vsel %vm9517_vm9, %v1971_v18, 0.0  ;;  %v1983_v23 = vmul.f32 %v1979_v53, %v1951_v17 }
 0xa31   : > { %v1991_v26 = vmul.f32 %v1987_v48, %v1939_v52  ;;  %v2003_v28 = vmul.f32 %v1999_v54, %v1975_v21  ;;  %v1952_v29 = vsel %vm1950_vm6, %v1947_v56, %v1948_v4  ;;  %v1968_v30 = vsel %vm1967_vm7, %v1965_v58, %v1966_v6 }
 0xa32   : > { %v2005_v34 = vadd.f32 %v2001_v12, %v1993_v19  ;;  %v1992_v36 = vadd.f32 %v1988_v63, %v1980_v20  ;;  %v1982_v37 = vmul.f32 %v1979_v53, %v1952_v29  ;;  %v1990_v38 = vmul.f32 %v1987_v48, %v1938_v51 }
 0xa33   : > { %v1995_v41 = vadd.f32 %v1991_v26, %v1983_v23  ;;  %v2002_v44 = vmul.f32 %v1999_v54, %v1968_v30 }
 0xa34   : > { %v2017_v39 = vadd.f32 %v6271_v25, %v2005_v34  ;;  %v2004_v42 = vadd.f32 %v2000_v16, %v1992_v36  ;;  %v1994_v43 = vadd.f32 %v1990_v38, %v1982_v37 }
 0xa35   : > { %v2007_v45 = vadd.f32 %v2003_v28, %v1995_v41  ;;  %v7762_v41 = vld [vmem:[%s9496_s18 + $0x18] sm:$0xff]  }
 0xa36   : > { %vm2021_vm14 = vcmp.ge.f32.partialorder %v2017_v39, 0.0  ;;  %v2033_v47 = vmul.f32 %v6273_v40, %v2017_v39  ;;  %v2016_v49 = vadd.f32 %v6271_v25, %v2004_v42  ;;  %v2006_v50 = vadd.f32 %v2002_v44, %v1994_v43  ;;  %6935 = vmatprep.subr.bf16.mxu1 %v7762_v41  ;;  %v7764_v42 = vld [vmem:[%s9496_s18 + $0x28] sm:$0xff]  }
 0xa37   : > { %v2019_v52 = vadd.f32 %v6271_v25, %v2007_v45  ;;  %6936 = vmatpush3.bf16.msra.mxu1 %v7762_v41 }
 0xa38   : > { %v2037_v55 = vsel %vm2021_vm14, %v2017_v39, %v2033_v47  ;;  %vm2020_vm15 = vcmp.ge.f32.partialorder %v2016_v49, 0.0  ;;  %v2032_v56 = vmul.f32 %v6273_v40, %v2016_v49  ;;  %v2018_v53 = vadd.f32 %v6271_v25, %v2006_v50  ;;  %v7763_v39 = vld [vmem:[%s9496_s18 + $0x20] sm:$0xff]  }
 0xa39   : > { %v2047_v48 = vsel %vm1412_vm5, %v2037_v55, 0.0  ;;  %vm2023_vm1 = vcmp.ge.f32.partialorder %v2019_v52, 0.0  ;;  %v2035_v51 = vmul.f32 %v6273_v40, %v2019_v52  ;;  %6937 = vmatprep.subr.bf16.mxu1 %v7763_v39 }
 0xa3a   : > { %2048 = vadd.xlane.f32.xlu1 %v2047_v48  ;;  %v2036_v57 = vsel %vm2020_vm15, %v2016_v49, %v2032_v56  ;;  %vm2022_vm9 = vcmp.ge.f32.partialorder %v2018_v53, 0.0  ;;  %v2034_v58 = vmul.f32 %v6273_v40, %v2018_v53 }
 0xa3b   : > { %v2044_v54 = vsel %vm1412_vm5, %v2036_v57, 0.0  ;;  %v2039_v59 = vsel %vm2023_vm1, %v2019_v52, %v2035_v51  ;;  %6938 = vmatpush3.bf16.msra.mxu1 %v7763_v39 }
 0xa3c   : > { %2045 = vadd.xlane.f32.xlu0 %v2044_v54  ;;  %v2038_v60 = vsel %vm2022_vm9, %v2018_v53, %v2034_v58  ;;  %v2053_v61 = vsel %vm1412_vm5, %v2039_v59, 0.0  ;;  %6939 = vmatprep.subr.bf16.mxu1 %v7764_v42 }
 0xa3d   : > { %v2050_v63 = vsel %vm1412_vm5, %v2038_v60, 0.0 }
 0xa3e   : > { %2054 = vadd.xlane.f32.xlu1 %v2053_v61 }
 0xa3f   : > { %6940 = vmatpush3.bf16.msra.mxu1 %v7764_v42 }
 0xa40   : > { %2051 = vadd.xlane.f32.xlu0 %v2050_v63 }
 0xac7   : > { %v2049_v0 = vpop.xlane.xlu1 %2048 }
 0xac9   : > { %v2046_v2 = vpop.xlane.xlu0 %2045 }
 0xaca   : > { %v2056_v4 = vadd.f32 %v2049_v0, %v2046_v2 }
 0xacb   : > { %v2055_v12 = vpop.xlane.xlu1 %2054 }
 0xacd   : > { %v2052_v6 = vpop.xlane.xlu0 %2051 }
 0xace   : > { %v2057_v11 = vadd.f32 %v2056_v4, %v2052_v6  ;;  %v6277_v4 = vld [vmem:[%s9495_s17 + $0x1] ss:$0 sm:$0xff] }
 0xad0   : > { %v2058_v13 = vadd.f32 %v2057_v11, %v2055_v12 }
 0xad2   : > { %v2059_v14 = vrot.slane %v2058_v13, 4 }
 0xad4   : > { %v2060_v15 = vadd.f32 %v2059_v14, %v2058_v13 }
 0xad6   : > { %v2061_v16 = vrot.slane %v2060_v15, 2 }
 0xad8   : > { %v2062_v17 = vadd.f32 %v2061_v16, %v2060_v15 }
 0xada   : > { %v2063_v18 = vrot.slane %v2062_v17, 1 }
 0xadc   : > { %v2064_v19 = vadd.f32 %v2063_v18, %v2062_v17 }
 0xade   : > { %v2065_v20 = vmul.f32 0.0006510417, %v2064_v19 }
 0xae0   : > { %v2067_v21 = vsub.f32 %v2037_v55, %v2065_v20  ;;  %v2066_v23 = vsub.f32 %v2036_v57, %v2065_v20  ;;  %v2069_v25 = vsub.f32 %v2039_v59, %v2065_v20  ;;  %v2068_v26 = vsub.f32 %v2038_v60, %v2065_v20  ;;  %v6276_v60 = vld [vmem:[%s9494_s16 + $0x1] ss:$0 sm:$0xff] }
 0xae1   : > { %v7765_v20 = vld [vmem:[%s9540_s30 + $0x20] sm:$0xff]  }
 0xae2   : > { %v2071_v28 = vmul.f32 %v2067_v21, %v2067_v21  ;;  %v2070_v29 = vmul.f32 %v2066_v23, %v2066_v23  ;;  %v2073_v36 = vmul.f32 %v2069_v25, %v2069_v25  ;;  %v2072_v37 = vmul.f32 %v2068_v26, %v2068_v26  ;;  %6945 = vmatprep.subr.bf16.mxu0 %v7765_v20 }
 0xae3   : > { %6946 = vmatpush3.bf16.msra.mxu0 %v7765_v20 }
 0xae4   : > { %v2077_v30 = vsel %vm1412_vm5, %v2071_v28, 0.0  ;;  %v2074_v34 = vsel %vm1412_vm5, %v2070_v29, 0.0  ;;  %v2083_v38 = vsel %vm1412_vm5, %v2073_v36, 0.0  ;;  %v2080_v40 = vsel %vm1412_vm5, %v2072_v37, 0.0 }
 0xae5   : > { %2078 = vadd.xlane.f32.xlu1 %v2077_v30  ;;  %2075 = vadd.xlane.f32.xlu0 %v2074_v34 }
 0xae9   : > { %2084 = vadd.xlane.f32.xlu1 %v2083_v38  ;;  %2081 = vadd.xlane.f32.xlu0 %v2080_v40 }
 0xb72   : > { %v2079_v43 = vpop.xlane.xlu1 %2078  ;;  %v2076_v44 = vpop.xlane.xlu0 %2075 }
 0xb73   : > { %v2086_v45 = vadd.f32 %v2079_v43, %v2076_v44  ;;  %v7767_v44 = vld [vmem:[%s9542_s12 + $0x18] sm:$0xff]  }
 0xb76   : > { %v2082_v47 = vpop.xlane.xlu0 %2081  ;;  %v2085_v50 = vpop.xlane.xlu1 %2084 }
 0xb77   : > { %v2087_v49 = vadd.f32 %v2086_v45, %v2082_v47  ;;  %v7768_v45 = vld [vmem:[%s9542_s12 + $0x20] ss:$0 sps:$4 sm:$0xff]  }
 0xb79   : > { %v2088_v52 = vadd.f32 %v2087_v49, %v2085_v50  ;;  %v6296_v49 = vld [vmem:[%s9544_s7 + $0x2] ss:$0 sm:$0xff] }
 0xb7b   : > { %v2089_v55 = vrot.slane %v2088_v52, 4 }
 0xb7d   : > { %v2090_v56 = vadd.f32 %v2089_v55, %v2088_v52 }
 0xb7f   : > { %v2091_v53 = vrot.slane %v2090_v56, 2 }
 0xb81   : > { %v2092_v48 = vadd.f32 %v2091_v53, %v2090_v56 }
 0xb83   : > { %v2093_v51 = vrot.slane %v2092_v48, 1 }
 0xb85   : > { %v2094_v57 = vadd.f32 %v2093_v51, %v2092_v48 }
 0xb87   : > { %v2095_v58 = vmul.f32 0.0006510417, %v2094_v57 }
 0xb89   : > { %v2096_v54 = vadd.f32 1e-08, %v2095_v58 }
 0xb8b   : > { %7889 = vrsqrt.f32 %v2096_v54 }
 0xb95   : > { %v7890_v59 = vpop.eup %7889 }
 0xb96   : > { %v2098_v61 = vmul.f32 %v7890_v59, %v2066_v23  ;;  %v2099_v63 = vmul.f32 %v7890_v59, %v2067_v21  ;;  %v2100_v0 = vmul.f32 %v7890_v59, %v2068_v26  ;;  %v2101_v2 = vmul.f32 %v7890_v59, %v2069_v25  ;;  %v7766_v21 = vld [vmem:[%s9540_s30 + $0x28] sm:$0xff]   ;;  %v6285_v23 = vld [vmem:[%s9497_s19 + $0x1] ss:$0 sm:$0xff] }
 0xb97   : > { %6947 = vmatprep.subr.bf16.mxu0 %v7766_v21 }
 0xb98   : > { %v2108_v6 = vmul.f32 %v6276_v60, %v2098_v61  ;;  %v2109_v11 = vmul.f32 %v6276_v60, %v2099_v63  ;;  %v2110_v12 = vmul.f32 %v6276_v60, %v2100_v0  ;;  %v2111_v13 = vmul.f32 %v6276_v60, %v2101_v2  ;;  %6948 = vmatpush3.bf16.msra.mxu0 %v7766_v21 }
 0xb99   : > { %6953 = vmatprep.subr.bf16.mxu0 %v7924_v46 }
 0xb9a   : > { %v2118_v14 = vadd.f32 %v6277_v4, %v2108_v6  ;;  %v2119_v15 = vadd.f32 %v6277_v4, %v2109_v11  ;;  %v2120_v16 = vadd.f32 %v6277_v4, %v2110_v12  ;;  %v2121_v17 = vadd.f32 %v6277_v4, %v2111_v13 }
 0xb9c   : > { %v2122_v18 = vpack.c.bf16 %v2119_v15, %v2118_v14  ;;  %v2123_v19 = vpack.c.bf16 %v2121_v17, %v2120_v16 }
 0xb9e   : > { %6941 = vmatprep.mubr.msk.bf16.mxu1 %vm1412_vm5, %v2122_v18 }
 0xb9f   : > { %6942 = vmatmul.mubr.msk.bf16.vlgmr.msra.gmra.mrb[12].mxu1 %vm1412_vm5, %v2123_v19 }
 0xc72   : > { %v6943_v25 = vpop.f32.mrb[12].mxu1 }
 0xc73   : > { %v2206_v26 = vadd.f32 %v6943_v25, %v6285_v23  ;;  %v2197_v28 = vpop.f32.mrb[13].mxu1 }
 0xc74   : > { %v2198_v29 = vadd.f32 %v6285_v23, %v2197_v28  ;;  %v6944_v30 = vpop.f32.mrb[14].mxu1 }
 0xc75   : > { %v2209_v34 = vadd.f32 %v6944_v30, %v6285_v23  ;;  %v2200_v36 = vpop.f32.mrb[15].mxu1  ;;  %v2214_v38 = vadd.f32 %v2206_v26, %v8357_v10 }
 0xc76   : > { %v2201_v37 = vadd.f32 %v6285_v23, %v2200_v36  ;;  %v2212_v41 = vadd.f32 %v2198_v29, %v8353_v8 }
 0xc77   : > { %v2215_v40 = vadd.f32 %v2209_v34, %v8351_v5  ;;  %v2312_v5 = vsel %vm1339_vm2, %v7768_v45, 0 }
 0xc78   : > { %v2213_v39 = vadd.f32 %v2201_v37, %v8355_v9 }
 0xc79   : > { %v2217_v42 = vpack.c.bf16 %v2215_v40, %v2214_v38 }
 0xc7a   : > { %v2216_v43 = vpack.c.bf16 %v2213_v39, %v2212_v41 }
 0xc7c   : > { %6949 = vmatprep.mubr.msk.bf16.mxu0 %vm983_vm0, %v2216_v43 }
 0xc7d   : > { %6950 = vmatmul.mubr.msk.bf16.vlgmr.msra.gmra.mrb[16].mxu0 %vm983_vm0, %v2217_v42 }
 0xc7e   : > { %6954 = vmatpush3.bf16.msra.mxu0 %v7767_v44  ;;  %6957 = vmatprep.mubr.msk.bf16.mxu0 %vm7925_vm3, %v7924_v46 }
 0xc7f   : > { %6955 = vmatprep.subr.bf16.mxu0 %v7924_v46 }
 0xc82   : > { %6956 = vmatpush3.bf16.msra.mxu0 %v2312_v5 }
 0xc85   : > { %6958 = vmatmul.mubr.msk.bf16.vlgmr.msra.gmra.mrb[20].mxu0 %vm1335_vm4, %v8242_v62  ;;  %v6308_v62 = vld [vmem:[%s9545_s6 + $0x2] ss:$0 sm:$0xff] }
 0xd50   : > { %v6951_v8 = vpop.f32.mrb[16].mxu0 }
 0xd51   : > { %v2283_v9 = vpop.f32.mrb[17].mxu0  ;;  %v2292_v50 = vadd.f32 %v6951_v8, %v6296_v49 }
 0xd52   : > { %v6952_v10 = vpop.f32.mrb[18].mxu0  ;;  %v2284_v55 = vadd.f32 %v6296_v49, %v2283_v9 }
 0xd53   : > { %v2286_v47 = vpop.f32.mrb[19].mxu0  ;;  %v2295_v56 = vadd.f32 %v6952_v10, %v6296_v49 }
 0xd54   : > { %v2287_v53 = vadd.f32 %v6296_v49, %v2286_v47 }
 0xd58   : > { %v2348_v52 = vpop.f32.mrb[20].mxu0 }
 0xd59   : > { %v2357_v48 = vrot.slane %v2348_v52, %v8252_v7  ;;  %v6959_v51 = vpop.f32.mrb[21].mxu0 }
 0xd5a   : > { %v2351_v57 = vpop.f32.mrb[22].mxu0 }
 0xd5b   : > { %v6960_v58 = vpop.f32.mrb[23].mxu0  ;;  %v2359_v54 = vadd.f32 %v2357_v48, %v2287_v53  ;;  %v2358_v59 = vadd.f32 %v2357_v48, %v2284_v55  ;;  %v2361_v60 = vadd.f32 %v2357_v48, %v2295_v56  ;;  %v2360_v61 = vadd.f32 %v2357_v48, %v2292_v50 }
 0xd5d   : > { %vm2363_vm1 = vcmp.ge.f32.partialorder %v2359_v54, 0.0  ;;  %v2375_v63 = vmul.f32 %v6308_v62, %v2359_v54  ;;  %vm2362_vm2 = vcmp.ge.f32.partialorder %v2358_v59, 0.0  ;;  %v2374_v0 = vmul.f32 %v6308_v62, %v2358_v59 }
 0xd5e   : > { %vm2365_vm4 = vcmp.ge.f32.partialorder %v2361_v60, 0.0  ;;  %v2377_v2 = vmul.f32 %v6308_v62, %v2361_v60  ;;  %vm2364_vm9 = vcmp.ge.f32.partialorder %v2360_v61, 0.0  ;;  %v2376_v4 = vmul.f32 %v6308_v62, %v2360_v61 }
 0xd5f   : > { %v2379_v6 = vsel %vm2363_vm1, %v2359_v54, %v2375_v63  ;;  %v2378_v11 = vsel %vm2362_vm2, %v2358_v59, %v2374_v0  ;;  %v6311_v0 = vld [vmem:[%s9546_s11 + $0x2] ss:$0 sm:$0xff] }
 0xd60   : > { %v2389_v12 = vsel %vm1412_vm5, %v2379_v6, 0.0  ;;  %v2386_v13 = vsel %vm1412_vm5, %v2378_v11, 0.0  ;;  %v2381_v14 = vsel %vm2365_vm4, %v2361_v60, %v2377_v2  ;;  %v2380_v15 = vsel %vm2364_vm9, %v2360_v61, %v2376_v4 }
 0xd61   : > { %2390 = vadd.xlane.f32.xlu1 %v2389_v12  ;;  %2387 = vadd.xlane.f32.xlu0 %v2386_v13  ;;  %v2395_v16 = vsel %vm1412_vm5, %v2381_v14, 0.0  ;;  %v2392_v17 = vsel %vm1412_vm5, %v2380_v15, 0.0  ;;  %v6312_v13 = vld [vmem:[%s9547_s0 + $0x2] ss:$0 sm:$0xff]  ;;  %vm9548_vm4 = vcmp.lt.s32.totalorder %v8282_v33, 30 }
 0xd62   : > { %v6355_v33 = vld [vmem:[%s9493_s15 + $0x3] ss:$0 sm:$0xff] }
 0xd65   : > { %2396 = vadd.xlane.f32.xlu1 %v2395_v16  ;;  %2393 = vadd.xlane.f32.xlu0 %v2392_v17 }
 0xdee   : > { %v2391_v18 = vpop.xlane.xlu1 %2390  ;;  %v2388_v19 = vpop.xlane.xlu0 %2387 }
 0xdef   : > { %v2398_v20 = vadd.f32 %v2391_v18, %v2388_v19 }
 0xdf2   : > { %v2394_v21 = vpop.xlane.xlu0 %2393  ;;  %v2397_v25 = vpop.xlane.xlu1 %2396 }
 0xdf3   : > { %v2399_v23 = vadd.f32 %v2398_v20, %v2394_v21 }
 0xdf5   : > { %v2400_v26 = vadd.f32 %v2399_v23, %v2397_v25 }
 0xdf7   : > { %v2401_v28 = vrot.slane %v2400_v26, 4 }
 0xdf9   : > { %v2402_v29 = vadd.f32 %v2401_v28, %v2400_v26 }
 0xdfb   : > { %v2403_v30 = vrot.slane %v2402_v29, 2 }
 0xdfd   : > { %v2404_v34 = vadd.f32 %v2403_v30, %v2402_v29 }
 0xdff   : > { %v2405_v36 = vrot.slane %v2404_v34, 1 }
 0xe01   : > { %v2406_v37 = vadd.f32 %v2405_v36, %v2404_v34 }
 0xe03   : > { %v2407_v38 = vmul.f32 0.0006510417, %v2406_v37 }
 0xe05   : > { %v2409_v40 = vsub.f32 %v2379_v6, %v2407_v38  ;;  %v2408_v41 = vsub.f32 %v2378_v11, %v2407_v38  ;;  %v2411_v39 = vsub.f32 %v2381_v14, %v2407_v38  ;;  %v2410_v42 = vsub.f32 %v2380_v15, %v2407_v38  ;;  %v6313_v11 = vld [vmem:[%s9491_s13 + $0x8] sm:$0x7] }
 0xe06   : > { %v2501_v18 = vrot.slane %v6313_v11, %v8270_v22  ;;  %v2493_v25 = vrot.slane %v6313_v11, %v8252_v7  ;;  %v2513_v26 = vrot.slane %v6313_v11, %v8279_v31 }
 0xe07   : > { %v2413_v43 = vmul.f32 %v2409_v40, %v2409_v40  ;;  %v2412_v44 = vmul.f32 %v2408_v41, %v2408_v41  ;;  %v2415_v8 = vmul.f32 %v2411_v39, %v2411_v39  ;;  %v2414_v9 = vmul.f32 %v2410_v42, %v2410_v42 }
 0xe09   : > { %v2419_v45 = vsel %vm1412_vm5, %v2413_v43, 0.0  ;;  %v2416_v5 = vsel %vm1412_vm5, %v2412_v44, 0.0  ;;  %v2425_v10 = vsel %vm1412_vm5, %v2415_v8, 0.0  ;;  %v2422_v47 = vsel %vm1412_vm5, %v2414_v9, 0.0 }
 0xe0a   : > { %2420 = vadd.xlane.f32.xlu1 %v2419_v45  ;;  %2417 = vadd.xlane.f32.xlu0 %v2416_v5 }
 0xe0e   : > { %2426 = vadd.xlane.f32.xlu1 %v2425_v10  ;;  %2423 = vadd.xlane.f32.xlu0 %v2422_v47 }
 0xe97   : > { %v2421_v49 = vpop.xlane.xlu1 %2420  ;;  %v2418_v50 = vpop.xlane.xlu0 %2417 }
 0xe98   : > { %v2428_v52 = vadd.f32 %v2421_v49, %v2418_v50 }
 0xe9b   : > { %v2424_v55 = vpop.xlane.xlu0 %2423  ;;  %v2427_v53 = vpop.xlane.xlu1 %2426 }
 0xe9c   : > { %v2429_v56 = vadd.f32 %v2428_v52, %v2424_v55 }
 0xe9e   : > { %v2430_v48 = vadd.f32 %v2429_v56, %v2427_v53  ;;  %v6315_v53 = vld [vmem:[%s9492_s14 + $0x2] ss:$0 sm:$0xff] }
 0xea0   : > { %v2431_v51 = vrot.slane %v2430_v48, 4 }
 0xea2   : > { %v2432_v57 = vadd.f32 %v2431_v51, %v2430_v48 }
 0xea4   : > { %v2433_v62 = vrot.slane %v2432_v57, 2 }
 0xea6   : > { %v2434_v58 = vadd.f32 %v2433_v62, %v2432_v57 }
 0xea8   : > { %v2435_v54 = vrot.slane %v2434_v58, 1 }
 0xeaa   : > { %v2436_v59 = vadd.f32 %v2435_v54, %v2434_v58 }
 0xeac   : > { %v2437_v60 = vmul.f32 0.0006510417, %v2436_v59 }
 0xeae   : > { %v2438_v61 = vadd.f32 1e-08, %v2437_v60 }
 0xeb0   : > { %7891 = vrsqrt.f32 %v2438_v61  ;;  %v6317_v61 = vld [vmem:[%s9493_s15 + $0x2] ss:$0 sm:$0xff] }
 0xeba   : > { %v7892_v63 = vpop.eup %7891 }
 0xebb   : > { %v2440_v2 = vmul.f32 %v7892_v63, %v2408_v41  ;;  %v2441_v4 = vmul.f32 %v7892_v63, %v2409_v40  ;;  %v2442_v6 = vmul.f32 %v7892_v63, %v2410_v42  ;;  %v2443_v12 = vmul.f32 %v7892_v63, %v2411_v39 }
 0xebd   : > { %v2450_v14 = vmul.f32 %v6311_v0, %v2440_v2  ;;  %v2451_v15 = vmul.f32 %v6311_v0, %v2441_v4  ;;  %v2452_v16 = vmul.f32 %v6311_v0, %v2442_v6  ;;  %v2453_v17 = vmul.f32 %v6311_v0, %v2443_v12 }
 0xebf   : > { %v2460_v19 = vadd.f32 %v6312_v13, %v2450_v14  ;;  %v2461_v20 = vadd.f32 %v6312_v13, %v2451_v15  ;;  %v2462_v21 = vadd.f32 %v6312_v13, %v2452_v16  ;;  %v2463_v23 = vadd.f32 %v6312_v13, %v2453_v17 }
 0xec1   : > { %v2466_v28 = vrot.slane %v2460_v19, 7  ;;  %v2467_v29 = vrot.slane %v2461_v20, 7  ;;  %v2479_v30 = vrot.slane %v2461_v20, 1  ;;  %v2480_v34 = vrot.slane %v2462_v21, 1 }
 0xec2   : > { %v2503_v36 = vmul.f32 %v2501_v18, %v2461_v20  ;;  %v2469_v37 = vrot.slane %v2463_v23, 7  ;;  %v2478_v38 = vrot.slane %v2460_v19, 1  ;;  %v2502_v40 = vmul.f32 %v2501_v18, %v2460_v19 }
 0xec3   : > { %v2472_v41 = vsel %vm1500_vm10, %v2466_v28, %v2467_v29  ;;  %v2483_v39 = vsel %vm1517_vm11, %v2479_v30, %v2480_v34  ;;  %v2468_v42 = vrot.slane %v2462_v21, 7  ;;  %v2481_v43 = vrot.slane %v2463_v23, 1 }
 0xec4   : > { %v2495_v44 = vmul.f32 %v2493_v25, %v2472_v41  ;;  %v2515_v45 = vmul.f32 %v2513_v26, %v2483_v39  ;;  %v2473_v5 = vsel %vm1500_vm10, %v2469_v37, %v2466_v28  ;;  %v2484_v8 = vsel %vm1517_vm11, %v2478_v38, %v2479_v30 }
 0xec5   : > { %v2474_v9 = vsel %vm1492_vm12, %v2473_v5, 0.0  ;;  %v2514_v10 = vmul.f32 %v2513_v26, %v2484_v8  ;;  %v2470_v47 = vsel %vm1500_vm10, %v2468_v42, %v2469_v37  ;;  %v2485_v49 = vsel %vm1517_vm11, %v2481_v43, %v2478_v38 }
 0xec6   : > { %v2507_v50 = vadd.f32 %v2503_v36, %v2495_v44  ;;  %v2494_v52 = vmul.f32 %v2493_v25, %v2474_v9  ;;  %v2489_v55 = vsel %vm1512_vm13, %v2485_v49, 0.0  ;;  %v2497_v56 = vmul.f32 %v2493_v25, %v2470_v47 }
 0xec7   : > { %v2505_v48 = vmul.f32 %v2501_v18, %v2463_v23  ;;  %v2517_v51 = vmul.f32 %v2513_v26, %v2489_v55  ;;  %v2471_v57 = vsel %vm1500_vm10, %v2467_v29, %v2468_v42  ;;  %v2482_v62 = vsel %vm1517_vm11, %v2480_v34, %v2481_v43 }
 0xec8   : > { %v2519_v58 = vadd.f32 %v2515_v45, %v2507_v50  ;;  %v2506_v54 = vadd.f32 %v2502_v40, %v2494_v52  ;;  %v2496_v59 = vmul.f32 %v2493_v25, %v2471_v57  ;;  %v2504_v60 = vmul.f32 %v2501_v18, %v2462_v21 }
 0xec9   : > { %v2509_v63 = vadd.f32 %v2505_v48, %v2497_v56  ;;  %v2516_v6 = vmul.f32 %v2513_v26, %v2482_v62 }
 0xeca   : > { %v2531_v0 = vadd.f32 %v6315_v53, %v2519_v58  ;;  %v2518_v2 = vadd.f32 %v2514_v10, %v2506_v54  ;;  %v2508_v4 = vadd.f32 %v2504_v60, %v2496_v59  ;;  %v7769_v58 = vld [vmem:[%s9496_s18 + $0x30] sm:$0xff]   ;;  %v7770_v54 = vld [vmem:[%s9496_s18 + $0x38] sm:$0xff]   ;;  %v7771_v59 = vld [vmem:[%s9496_s18 + $0x40] sm:$0xff]  }
 0xecb   : > { %v2521_v11 = vadd.f32 %v2517_v51, %v2509_v63  ;;  %6961 = vmatprep.subr.bf16.mxu1 %v7769_v58 }
 0xecc   : > { %vm2535_vm12 = vcmp.ge.f32.partialorder %v2531_v0, 0.0  ;;  %v2547_v12 = vmul.f32 %v6317_v61, %v2531_v0  ;;  %v2530_v13 = vadd.f32 %v6315_v53, %v2518_v2  ;;  %v2520_v14 = vadd.f32 %v2516_v6, %v2508_v4  ;;  %6962 = vmatpush3.bf16.msra.mxu1 %v7769_v58 }
 0xecd   : > { %v2533_v15 = vadd.f32 %v6315_v53, %v2521_v11  ;;  %6963 = vmatprep.subr.bf16.mxu1 %v7770_v54 }
 0xece   : > { %v2551_v16 = vsel %vm2535_vm12, %v2531_v0, %v2547_v12  ;;  %vm2534_vm10 = vcmp.ge.f32.partialorder %v2530_v13, 0.0  ;;  %v2546_v17 = vmul.f32 %v6317_v61, %v2530_v13  ;;  %v2532_v19 = vadd.f32 %v6315_v53, %v2520_v14 }
 0xecf   : > { %v2561_v18 = vsel %vm1412_vm5, %v2551_v16, 0.0  ;;  %vm2537_vm11 = vcmp.ge.f32.partialorder %v2533_v15, 0.0  ;;  %v2549_v20 = vmul.f32 %v6317_v61, %v2533_v15 }
 0xed0   : > { %2562 = vadd.xlane.f32.xlu1 %v2561_v18  ;;  %v2550_v21 = vsel %vm2534_vm10, %v2530_v13, %v2546_v17  ;;  %vm2536_vm13 = vcmp.ge.f32.partialorder %v2532_v19, 0.0  ;;  %v2548_v23 = vmul.f32 %v6317_v61, %v2532_v19  ;;  %6964 = vmatpush3.bf16.msra.mxu1 %v7770_v54 }
 0xed1   : > { %v2558_v25 = vsel %vm1412_vm5, %v2550_v21, 0.0  ;;  %v2553_v26 = vsel %vm2537_vm11, %v2533_v15, %v2549_v20  ;;  %6965 = vmatprep.subr.bf16.mxu1 %v7771_v59  ;;  %v6320_v20 = vld [vmem:[%s9494_s16 + $0x2] ss:$0 sm:$0xff] }
 0xed2   : > { %2559 = vadd.xlane.f32.xlu0 %v2558_v25  ;;  %v2552_v28 = vsel %vm2536_vm13, %v2532_v19, %v2548_v23  ;;  %v2567_v29 = vsel %vm1412_vm5, %v2553_v26, 0.0  ;;  %vm4674_vm13 = vcmask 64512  }
 0xed3   : > { %v2564_v30 = vsel %vm1412_vm5, %v2552_v28, 0.0 }
 0xed4   : > { %2568 = vadd.xlane.f32.xlu1 %v2567_v29  ;;  %6966 = vmatpush3.bf16.msra.mxu1 %v7771_v59 }
 0xed6   : > { %2565 = vadd.xlane.f32.xlu0 %v2564_v30 }
 0xf5d   : > { %v2563_v34 = vpop.xlane.xlu1 %2562 }
 0xf5f   : > { %v2560_v36 = vpop.xlane.xlu0 %2559 }
 0xf60   : > { %v2570_v37 = vadd.f32 %v2563_v34, %v2560_v36 }
 0xf61   : > { %v2569_v41 = vpop.xlane.xlu1 %2568 }
 0xf63   : > { %v2566_v38 = vpop.xlane.xlu0 %2565 }
 0xf64   : > { %v2571_v40 = vadd.f32 %v2570_v37, %v2566_v38 }
 0xf66   : > { %v2572_v39 = vadd.f32 %v2571_v40, %v2569_v41 }
 0xf68   : > { %v2573_v42 = vrot.slane %v2572_v39, 4 }
 0xf6a   : > { %v2574_v43 = vadd.f32 %v2573_v42, %v2572_v39 }
 0xf6c   : > { %v2575_v44 = vrot.slane %v2574_v43, 2 }
 0xf6e   : > { %v2576_v45 = vadd.f32 %v2575_v44, %v2574_v43  ;;  %v7772_v43 = vld [vmem:[%s9540_s30 + $0x30] sm:$0xff]   ;;  %v7773_v44 = vld [vmem:[%s9540_s30 + $0x38] sm:$0xff]  }
 0xf6f   : > { %6971 = vmatprep.subr.bf16.mxu0 %v7772_v43 }
 0xf70   : > { %v2577_v5 = vrot.slane %v2576_v45, 1  ;;  %6972 = vmatpush3.bf16.msra.mxu0 %v7772_v43 }
 0xf71   : > { %6973 = vmatprep.subr.bf16.mxu0 %v7773_v44 }
 0xf72   : > { %v2578_v8 = vadd.f32 %v2577_v5, %v2576_v45  ;;  %v6329_v5 = vld [vmem:[%s9497_s19 + $0x2] ss:$0 sm:$0xff] }
 0xf74   : > { %v2579_v9 = vmul.f32 0.0006510417, %v2578_v8  ;;  %6974 = vmatpush3.bf16.msra.mxu0 %v7773_v44 }
 0xf76   : > { %v2581_v10 = vsub.f32 %v2551_v16, %v2579_v9  ;;  %v2580_v47 = vsub.f32 %v2550_v21, %v2579_v9  ;;  %v2583_v49 = vsub.f32 %v2553_v26, %v2579_v9  ;;  %v2582_v50 = vsub.f32 %v2552_v28, %v2579_v9  ;;  %v6321_v28 = vld [vmem:[%s9495_s17 + $0x2] ss:$0 sm:$0xff] }
 0xf78   : > { %v2585_v52 = vmul.f32 %v2581_v10, %v2581_v10  ;;  %v2584_v55 = vmul.f32 %v2580_v47, %v2580_v47  ;;  %v2587_v48 = vmul.f32 %v2583_v49, %v2583_v49  ;;  %v2586_v51 = vmul.f32 %v2582_v50, %v2582_v50 }
 0xf7a   : > { %v2591_v56 = vsel %vm1412_vm5, %v2585_v52, 0.0  ;;  %v2588_v53 = vsel %vm1412_vm5, %v2584_v55, 0.0  ;;  %v2597_v57 = vsel %vm1412_vm5, %v2587_v48, 0.0  ;;  %v2594_v62 = vsel %vm1412_vm5, %v2586_v51, 0.0 }
 0xf7b   : > { %2592 = vadd.xlane.f32.xlu1 %v2591_v56  ;;  %2589 = vadd.xlane.f32.xlu0 %v2588_v53  ;;  %v6340_v53 = vld [vmem:[%s9544_s7 + $0x3] ss:$0 sm:$0xff]  ;;  %s7926_s7 = smov 28  }
 0xf7f   : > { %2598 = vadd.xlane.f32.xlu1 %v2597_v57  ;;  %2595 = vadd.xlane.f32.xlu0 %v2594_v62  ;;  %v6346_v57 = vld [vmem:[%s9545_s6 + $0x3] ss:$0 sm:$0xff]  ;;  %s7927_s6 = smov 8  }
0x1008   : > { %v2593_v60 = vpop.xlane.xlu1 %2592  ;;  %v2590_v61 = vpop.xlane.xlu0 %2589 }
0x1009   : > { %v2600_v63 = vadd.f32 %v2593_v60, %v2590_v61 }
0x100c   : > { %v2596_v0 = vpop.xlane.xlu0 %2595  ;;  %v2599_v4 = vpop.xlane.xlu1 %2598 }
0x100d   : > { %v2601_v2 = vadd.f32 %v2600_v63, %v2596_v0 }
0x100f   : > { %v2602_v6 = vadd.f32 %v2601_v2, %v2599_v4 }
0x1011   : > { %v2603_v11 = vrot.slane %v2602_v6, 4 }
0x1013   : > { %v2604_v12 = vadd.f32 %v2603_v11, %v2602_v6 }
0x1015   : > { %v2605_v13 = vrot.slane %v2604_v12, 2 }
0x1017   : > { %v2606_v14 = vadd.f32 %v2605_v13, %v2604_v12 }
0x1019   : > { %v2607_v15 = vrot.slane %v2606_v14, 1 }
0x101b   : > { %v2608_v16 = vadd.f32 %v2607_v15, %v2606_v14 }
0x101d   : > { %v2609_v17 = vmul.f32 0.0006510417, %v2608_v16 }
0x101f   : > { %v2610_v19 = vadd.f32 1e-08, %v2609_v17 }
0x1021   : > { %7893 = vrsqrt.f32 %v2610_v19 }
0x102b   : > { %v7894_v18 = vpop.eup %7893 }
0x102c   : > { %v2612_v21 = vmul.f32 %v7894_v18, %v2580_v47  ;;  %v2613_v23 = vmul.f32 %v7894_v18, %v2581_v10  ;;  %v2614_v25 = vmul.f32 %v7894_v18, %v2582_v50  ;;  %v2615_v26 = vmul.f32 %v7894_v18, %v2583_v49 }
0x102e   : > { %v2622_v29 = vmul.f32 %v6320_v20, %v2612_v21  ;;  %v2623_v30 = vmul.f32 %v6320_v20, %v2613_v23  ;;  %v2624_v34 = vmul.f32 %v6320_v20, %v2614_v25  ;;  %v2625_v36 = vmul.f32 %v6320_v20, %v2615_v26 }
0x1030   : > { %v2632_v37 = vadd.f32 %v6321_v28, %v2622_v29  ;;  %v2633_v38 = vadd.f32 %v6321_v28, %v2623_v30  ;;  %v2634_v40 = vadd.f32 %v6321_v28, %v2624_v34  ;;  %v2635_v41 = vadd.f32 %v6321_v28, %v2625_v36 }
0x1032   : > { %v2636_v39 = vpack.c.bf16 %v2633_v38, %v2632_v37  ;;  %v2637_v42 = vpack.c.bf16 %v2635_v41, %v2634_v40 }
0x1034   : > { %6967 = vmatprep.mubr.msk.bf16.mxu1 %vm1412_vm5, %v2636_v39 }
0x1035   : > { %6968 = vmatmul.mubr.msk.bf16.vlgmr.msra.gmra.mrb[16].mxu1 %vm1412_vm5, %v2637_v42 }
0x1108   : > { %v6969_v45 = vpop.f32.mrb[16].mxu1 }
0x1109   : > { %v2711_v8 = vpop.f32.mrb[17].mxu1  ;;  %v8567_v52 = vadd.f32 %v6969_v45, %v6329_v5 }
0x110a   : > { %v6970_v9 = vpop.f32.mrb[18].mxu1  ;;  %v8563_v49 = vadd.f32 %v6329_v5, %v2711_v8 }
0x110b   : > { %v8561_v10 = vadd.f32 %v6970_v9, %v6329_v5  ;;  %v2714_v47 = vpop.f32.mrb[19].mxu1 }
0x110c   : > { %v8565_v50 = vadd.f32 %v6329_v5, %v2714_v47 }
0x110d   : > { %v2727_v56 = vpack.c.bf16 %v8561_v10, %v8567_v52 }
0x110e   : > { %v2726_v55 = vpack.c.bf16 %v8565_v50, %v8563_v49 }
0x1110   : > { %6975 = vmatprep.mubr.msk.bf16.mxu0 %vm983_vm0, %v2726_v55 }
0x1111   : > { %6976 = vmatmul.mubr.msk.bf16.vlgmr.msra.gmra.mrb[24].mxu0 %vm983_vm0, %v2727_v56 }
0x11e4   : > { %v6977_v48 = vpop.f32.mrb[24].mxu0 }
0x11e5   : > { %v2802_v51 = vadd.f32 %v6977_v48, %v6340_v53  ;;  %v2793_v62 = vpop.f32.mrb[25].mxu0 }
0x11e6   : > { %v2794_v58 = vadd.f32 %v6340_v53, %v2793_v62  ;;  %v6978_v54 = vpop.f32.mrb[26].mxu0 }
0x11e7   : > { %v2805_v59 = vadd.f32 %v6978_v54, %v6340_v53  ;;  %v2796_v60 = vpop.f32.mrb[27].mxu0  ;;  %v2822_v61 = vmul.f32 %v6346_v57, %v2802_v51  ;;  %vm2810_vm15 = vcmp.ge.f32.partialorder %v2802_v51, 0.0 }
0x11e8   : > { %v2820_v63 = vmul.f32 %v6346_v57, %v2794_v58  ;;  %v2797_v0 = vadd.f32 %v6340_v53, %v2796_v60  ;;  %vm2808_vm14 = vcmp.ge.f32.partialorder %v2794_v58, 0.0 }
0x11e9   : > { %v2823_v2 = vmul.f32 %v6346_v57, %v2805_v59  ;;  %vm2811_vm2 = vcmp.ge.f32.partialorder %v2805_v59, 0.0  ;;  %v2826_v13 = vsel %vm2810_vm15, %v2802_v51, %v2822_v61  ;;  %vm3691_vm15 = vcmask 80896  }
0x11ea   : > { %v2821_v4 = vmul.f32 %v6346_v57, %v2797_v0  ;;  %v2824_v6 = vsel %vm2808_vm14, %v2794_v58, %v2820_v63  ;;  %vm2809_vm1 = vcmp.ge.f32.partialorder %v2797_v0, 0.0  ;;  %v2838_v16 = vsel %vm1412_vm5, %v2826_v13, 0.0 }
0x11eb   : > { %v2832_v11 = vsel %vm1412_vm5, %v2824_v6, 0.0  ;;  %v2827_v15 = vsel %vm2811_vm2, %v2805_v59, %v2823_v2  ;;  %vm5985_vm14 = vcmask 48128  }
0x11ec   : > { %2833 = vadd.xlane.f32.xlu0 %v2832_v11  ;;  %v2825_v12 = vsel %vm2809_vm1, %v2797_v0, %v2821_v4  ;;  %v2841_v17 = vsel %vm1412_vm5, %v2827_v15, 0.0  ;;  %v6349_v11 = vld [vmem:[%s9546_s11 + $0x3] ss:$0 sm:$0xff]  ;;  %vm3696_vm1 = vcmask 73728  }
0x11ed   : > { %v2835_v14 = vsel %vm1412_vm5, %v2825_v12, 0.0 }
0x11ee   : > { %2836 = vadd.xlane.f32.xlu1 %v2835_v14 }
0x11f0   : > { %2839 = vadd.xlane.f32.xlu0 %v2838_v16 }
0x11f2   : > { %2842 = vadd.xlane.f32.xlu1 %v2841_v17  ;;  %v6350_v17 = vld [vmem:[%s9547_s0 + $0x3] ss:$0 sm:$0xff]  ;;  %s7935_s0 = smov 86  }
0x1279   : > { %v2834_v19 = vpop.xlane.xlu0 %2833 }
0x127b   : > { %v2837_v18 = vpop.xlane.xlu1 %2836 }
0x127c   : > { %v2844_v20 = vadd.f32 %v2837_v18, %v2834_v19 }
0x127d   : > { %v2840_v21 = vpop.xlane.xlu0 %2839 }
0x127e   : > { %v2845_v23 = vadd.f32 %v2844_v20, %v2840_v21 }
0x127f   : > { %v2843_v25 = vpop.xlane.xlu1 %2842 }
0x1280   : > { %v2846_v26 = vadd.f32 %v2845_v23, %v2843_v25 }
0x1282   : > { %v2847_v28 = vrot.slane %v2846_v26, 4 }
0x1284   : > { %v2848_v29 = vadd.f32 %v2847_v28, %v2846_v26 }
0x1286   : > { %v2849_v30 = vrot.slane %v2848_v29, 2 }
0x1288   : > { %v2850_v34 = vadd.f32 %v2849_v30, %v2848_v29 }
0x128a   : > { %v2851_v36 = vrot.slane %v2850_v34, 1 }
0x128c   : > { %v2852_v37 = vadd.f32 %v2851_v36, %v2850_v34 }
0x128e   : > { %v2853_v38 = vmul.f32 0.0006510417, %v2852_v37 }
0x1290   : > { %v2855_v40 = vsub.f32 %v2825_v12, %v2853_v38  ;;  %v2854_v41 = vsub.f32 %v2824_v6, %v2853_v38  ;;  %v2857_v39 = vsub.f32 %v2827_v15, %v2853_v38  ;;  %v2856_v42 = vsub.f32 %v2826_v13, %v2853_v38  ;;  %v6351_v15 = vld [vmem:[%s9491_s13 + $0xc] sm:$0x7] }
0x1291   : > { %v2947_v23 = vrot.slane %v6351_v15, %v8270_v22  ;;  %v2939_v30 = vrot.slane %v6351_v15, %v8252_v7  ;;  %v2959_v34 = vrot.slane %v6351_v15, %v8279_v31 }
0x1292   : > { %v2859_v43 = vmul.f32 %v2855_v40, %v2855_v40  ;;  %v2858_v44 = vmul.f32 %v2854_v41, %v2854_v41  ;;  %v2861_v8 = vmul.f32 %v2857_v39, %v2857_v39  ;;  %v2860_v9 = vmul.f32 %v2856_v42, %v2856_v42 }
0x1294   : > { %v2865_v45 = vsel %vm1412_vm5, %v2859_v43, 0.0  ;;  %v2862_v5 = vsel %vm1412_vm5, %v2858_v44, 0.0  ;;  %v2871_v47 = vsel %vm1412_vm5, %v2861_v8, 0.0  ;;  %v2868_v55 = vsel %vm1412_vm5, %v2860_v9, 0.0 }
0x1295   : > { %2866 = vadd.xlane.f32.xlu1 %v2865_v45  ;;  %2863 = vadd.xlane.f32.xlu0 %v2862_v5 }
0x1299   : > { %2872 = vadd.xlane.f32.xlu1 %v2871_v47  ;;  %2869 = vadd.xlane.f32.xlu0 %v2868_v55 }
0x1322   : > { %v2867_v56 = vpop.xlane.xlu1 %2866  ;;  %v2864_v53 = vpop.xlane.xlu0 %2863 }
0x1323   : > { %v2874_v48 = vadd.f32 %v2867_v56, %v2864_v53 }
0x1326   : > { %v2870_v51 = vpop.xlane.xlu0 %2869  ;;  %v2873_v62 = vpop.xlane.xlu1 %2872 }
0x1327   : > { %v2875_v57 = vadd.f32 %v2874_v48, %v2870_v51 }
0x1329   : > { %v2876_v58 = vadd.f32 %v2875_v57, %v2873_v62 }
0x132b   : > { %v2877_v54 = vrot.slane %v2876_v58, 4 }
0x132d   : > { %v2878_v59 = vadd.f32 %v2877_v54, %v2876_v58  ;;  %v6353_v58 = vld [vmem:[%s9492_s14 + $0x3] ss:$0 sm:$0xff] }
0x132f   : > { %v2879_v60 = vrot.slane %v2878_v59, 2 }
0x1331   : > { %v2880_v61 = vadd.f32 %v2879_v60, %v2878_v59 }
0x1333   : > { %v2881_v63 = vrot.slane %v2880_v61, 1 }
0x1335   : > { %v2882_v0 = vadd.f32 %v2881_v63, %v2880_v61 }
0x1337   : > { %v2883_v2 = vmul.f32 0.0006510417, %v2882_v0 }
0x1339   : > { %v2884_v4 = vadd.f32 1e-08, %v2883_v2 }
0x133b   : > { %7895 = vrsqrt.f32 %v2884_v4 }
0x1345   : > { %v7896_v6 = vpop.eup %7895 }
0x1346   : > { %v2886_v12 = vmul.f32 %v7896_v6, %v2854_v41  ;;  %v2887_v13 = vmul.f32 %v7896_v6, %v2855_v40  ;;  %v2888_v14 = vmul.f32 %v7896_v6, %v2856_v42  ;;  %v2889_v16 = vmul.f32 %v7896_v6, %v2857_v39 }
0x1348   : > { %v2896_v19 = vmul.f32 %v6349_v11, %v2886_v12  ;;  %v2897_v18 = vmul.f32 %v6349_v11, %v2887_v13  ;;  %v2898_v20 = vmul.f32 %v6349_v11, %v2888_v14  ;;  %v2899_v21 = vmul.f32 %v6349_v11, %v2889_v16 }
0x134a   : > { %v2906_v25 = vadd.f32 %v6350_v17, %v2896_v19  ;;  %v2907_v26 = vadd.f32 %v6350_v17, %v2897_v18  ;;  %v2908_v28 = vadd.f32 %v6350_v17, %v2898_v20  ;;  %v2909_v29 = vadd.f32 %v6350_v17, %v2899_v21 }
0x134c   : > { %v2912_v36 = vrot.slane %v2906_v25, 6  ;;  %v2913_v37 = vrot.slane %v2907_v26, 6  ;;  %v2925_v38 = vrot.slane %v2907_v26, 2  ;;  %v2926_v40 = vrot.slane %v2908_v28, 2 }
0x134d   : > { %v2949_v41 = vmul.f32 %v2947_v23, %v2907_v26  ;;  %v2915_v39 = vrot.slane %v2909_v29, 6  ;;  %v2924_v42 = vrot.slane %v2906_v25, 2  ;;  %v2948_v43 = vmul.f32 %v2947_v23, %v2906_v25 }
0x134e   : > { %v2918_v44 = vsel %vm1950_vm6, %v2912_v36, %v2913_v37  ;;  %v2929_v22 = vsel %vm1967_vm7, %v2925_v38, %v2926_v40  ;;  %v2914_v45 = vrot.slane %v2908_v28, 6  ;;  %v2927_v5 = vrot.slane %v2909_v29, 2 }
0x134f   : > { %v2941_v8 = vmul.f32 %v2939_v30, %v2918_v44  ;;  %v2961_v7 = vmul.f32 %v2959_v34, %v2929_v22  ;;  %v2919_v31 = vsel %vm1950_vm6, %v2915_v39, %v2912_v36  ;;  %v2930_v9 = vsel %vm1967_vm7, %v2924_v42, %v2925_v38 }
0x1350   : > { %v2920_v47 = vsel %vm1942_vm8, %v2919_v31, 0.0  ;;  %v2960_v55 = vmul.f32 %v2959_v34, %v2930_v9  ;;  %v2916_v56 = vsel %vm1950_vm6, %v2914_v45, %v2915_v39  ;;  %v2931_v53 = vsel %vm1967_vm7, %v2927_v5, %v2924_v42 }
0x1351   : > { %v2953_v48 = vadd.f32 %v2949_v41, %v2941_v8  ;;  %v2940_v51 = vmul.f32 %v2939_v30, %v2920_v47  ;;  %v2935_v57 = vsel %vm9548_vm4, %v2931_v53, 0.0  ;;  %v2943_v62 = vmul.f32 %v2939_v30, %v2916_v56 }
0x1352   : > { %v2951_v54 = vmul.f32 %v2947_v23, %v2909_v29  ;;  %v2963_v59 = vmul.f32 %v2959_v34, %v2935_v57  ;;  %v2917_v60 = vsel %vm1950_vm6, %v2913_v37, %v2914_v45  ;;  %v2928_v61 = vsel %vm1967_vm7, %v2926_v40, %v2927_v5 }
0x1353   : > { %v2965_v63 = vadd.f32 %v2961_v7, %v2953_v48  ;;  %v2952_v0 = vadd.f32 %v2948_v43, %v2940_v51  ;;  %v2942_v2 = vmul.f32 %v2939_v30, %v2917_v60  ;;  %v2950_v4 = vmul.f32 %v2947_v23, %v2908_v28 }
0x1354   : > { %v2955_v6 = vadd.f32 %v2951_v54, %v2943_v62  ;;  %v2962_v14 = vmul.f32 %v2959_v34, %v2928_v61  ;;  %v7774_v61 = vld [vmem:[%s9496_s18 + $0x48] sm:$0xff]  }
0x1355   : > { %v2977_v11 = vadd.f32 %v6353_v58, %v2965_v63  ;;  %v2964_v12 = vadd.f32 %v2960_v55, %v2952_v0  ;;  %v2954_v13 = vadd.f32 %v2950_v4, %v2942_v2  ;;  %v7775_v63 = vld [vmem:[%s9496_s18 + $0x50] sm:$0xff]   ;;  %6979 = vmatprep.subr.bf16.mxu1 %v7774_v61  ;;  %v7776_v0 = vld [vmem:[%s9496_s18 + $0x58] sm:$0xff]  }
0x1356   : > { %v2967_v15 = vadd.f32 %v2963_v59, %v2955_v6  ;;  %6980 = vmatpush3.bf16.msra.mxu1 %v7774_v61  ;;  %v7790_v61 = vld [vmem:[%s9500_s22 + $0x4c] ss:$12 sps:$4 sm:$0xff]  }
0x1357   : > { %vm2981_vm8 = vcmp.ge.f32.partialorder %v2977_v11, 0.0  ;;  %v2993_v16 = vmul.f32 %v6355_v33, %v2977_v11  ;;  %v2976_v17 = vadd.f32 %v6353_v58, %v2964_v12  ;;  %v2966_v19 = vadd.f32 %v2962_v14, %v2954_v13  ;;  %6981 = vmatprep.subr.bf16.mxu1 %v7775_v63 }
0x1358   : > { %v2979_v3 = vadd.f32 %v6353_v58, %v2967_v15 }
0x1359   : > { %v2997_v18 = vsel %vm2981_vm8, %v2977_v11, %v2993_v16  ;;  %vm2980_vm6 = vcmp.ge.f32.partialorder %v2976_v17, 0.0  ;;  %v2992_v20 = vmul.f32 %v6355_v33, %v2976_v17  ;;  %v2978_v21 = vadd.f32 %v6353_v58, %v2966_v19 }
0x135a   : > { %v3007_v23 = vsel %vm1412_vm5, %v2997_v18, 0.0  ;;  %vm2983_vm7 = vcmp.ge.f32.partialorder %v2979_v3, 0.0  ;;  %v2995_v25 = vmul.f32 %v6355_v33, %v2979_v3  ;;  %6982 = vmatpush3.bf16.msra.mxu1 %v7775_v63  ;;  %v7788_v63 = vld [vmem:[%s9500_s22 + $0x48] ss:$12 sps:$4 sm:$0xff]  }
0x135b   : > { %3008 = vadd.xlane.f32.xlu1 %v3007_v23  ;;  %v2996_v26 = vsel %vm2980_vm6, %v2976_v17, %v2992_v20  ;;  %vm2982_vm9 = vcmp.ge.f32.partialorder %v2978_v21, 0.0  ;;  %v2994_v28 = vmul.f32 %v6355_v33, %v2978_v21  ;;  %6983 = vmatprep.subr.bf16.mxu1 %v7776_v0  ;;  %v6358_v23 = vld [vmem:[%s9494_s16 + $0x3] ss:$0 sm:$0xff] }
0x135c   : > { %v3004_v29 = vsel %vm1412_vm5, %v2996_v26, 0.0  ;;  %v2999_v30 = vsel %vm2983_vm7, %v2979_v3, %v2995_v25 }
0x135d   : > { %3005 = vadd.xlane.f32.xlu0 %v3004_v29  ;;  %v2998_v34 = vsel %vm2982_vm9, %v2978_v21, %v2994_v28  ;;  %v3013_v36 = vsel %vm1412_vm5, %v2999_v30, 0.0 }
0x135e   : > { %v3010_v37 = vsel %vm1412_vm5, %v2998_v34, 0.0  ;;  %6984 = vmatpush3.bf16.msra.mxu1 %v7776_v0  ;;  %v7793_v0 = vld [vmem:[%s9500_s22 + $0x64] ss:$12 sps:$4 sm:$0xff]  }
0x135f   : > { %3014 = vadd.xlane.f32.xlu1 %v3013_v36  ;;  %7189 = vmatprep.subr.bf16.mxu1 %v7924_v46 }
0x1361   : > { %3011 = vadd.xlane.f32.xlu0 %v3010_v37 }
0x13e8   : > { %v3009_v38 = vpop.xlane.xlu1 %3008 }
0x13ea   : > { %v3006_v40 = vpop.xlane.xlu0 %3005 }
0x13eb   : > { %v3016_v41 = vadd.f32 %v3009_v38, %v3006_v40 }
0x13ec   : > { %v3015_v43 = vpop.xlane.xlu1 %3014 }
0x13ee   : > { %v3012_v39 = vpop.xlane.xlu0 %3011 }
0x13ef   : > { %v3017_v42 = vadd.f32 %v3016_v41, %v3012_v39 }
0x13f1   : > { %v3018_v44 = vadd.f32 %v3017_v42, %v3015_v43 }
0x13f3   : > { %v3019_v22 = vrot.slane %v3018_v44, 4 }
0x13f5   : > { %v3020_v45 = vadd.f32 %v3019_v22, %v3018_v44  ;;  %v7777_v22 = vld [vmem:[%s9498_s20] sm:$0xff]  }
0x13f6   : > { %6989 = vmatprep.subr.bf16.mxu0 %v7777_v22 }
0x13f7   : > { %v3021_v5 = vrot.slane %v3020_v45, 2  ;;  %6990 = vmatpush3.bf16.msra.mxu0 %v7777_v22 }
0x13f9   : > { %v3022_v8 = vadd.f32 %v3021_v5, %v3020_v45  ;;  %v7778_v45 = vld [vmem:[%s9498_s20 + $0x8] sm:$0xff]   ;;  %v6367_v5 = vld [vmem:[%s9497_s19 + $0x3] ss:$0 sm:$0xff] }
0x13fa   : > { %6991 = vmatprep.subr.bf16.mxu0 %v7778_v45 }
0x13fb   : > { %v3023_v7 = vrot.slane %v3022_v8, 1  ;;  %6992 = vmatpush3.bf16.msra.mxu0 %v7778_v45 }
0x13fd   : > { %v3024_v31 = vadd.f32 %v3023_v7, %v3022_v8 }
0x13ff   : > { %v3025_v9 = vmul.f32 0.0006510417, %v3024_v31 }
0x1401   : > { %v3027_v47 = vsub.f32 %v2997_v18, %v3025_v9  ;;  %v3026_v55 = vsub.f32 %v2996_v26, %v3025_v9  ;;  %v3029_v56 = vsub.f32 %v2999_v30, %v3025_v9  ;;  %v3028_v53 = vsub.f32 %v2998_v34, %v3025_v9  ;;  %v6359_v30 = vld [vmem:[%s9495_s17 + $0x3] ss:$0 sm:$0xff] }
0x1403   : > { %v3031_v48 = vmul.f32 %v3027_v47, %v3027_v47  ;;  %v3030_v51 = vmul.f32 %v3026_v55, %v3026_v55  ;;  %v3033_v58 = vmul.f32 %v3029_v56, %v3029_v56  ;;  %v3032_v54 = vmul.f32 %v3028_v53, %v3028_v53 }
0x1405   : > { %v3037_v57 = vsel %vm1412_vm5, %v3031_v48, 0.0  ;;  %v3034_v62 = vsel %vm1412_vm5, %v3030_v51, 0.0  ;;  %v3043_v59 = vsel %vm1412_vm5, %v3033_v58, 0.0  ;;  %v3040_v60 = vsel %vm1412_vm5, %v3032_v54, 0.0 }
0x1406   : > { %3038 = vadd.xlane.f32.xlu1 %v3037_v57  ;;  %3035 = vadd.xlane.f32.xlu0 %v3034_v62 }
0x140a   : > { %3044 = vadd.xlane.f32.xlu1 %v3043_v59  ;;  %3041 = vadd.xlane.f32.xlu0 %v3040_v60  ;;  %v7781_v59 = vld [vmem:[%s9500_s22 + $0x4] ss:$12 sps:$4 sm:$0xff]  }
0x140b   : > { %3412 = vmatprep.subr.bf16.mxu0 %v7781_v59  ;;  %v7785_v60 = vld [vmem:[%s9500_s22 + $0x30] ss:$12 sps:$4 sm:$0xff]  }
0x1493   : > { %v3039_v2 = vpop.xlane.xlu1 %3038  ;;  %v3036_v4 = vpop.xlane.xlu0 %3035 }
0x1494   : > { %v3046_v33 = vadd.f32 %v3039_v2, %v3036_v4  ;;  %v7791_v2 = vld [vmem:[%s9500_s22 + $0x60] ss:$12 sps:$4 sm:$0xff]   ;;  %v7796_v4 = vld [vmem:[%s9500_s22 + $0x7c] ss:$12 sps:$4 sm:$0xff]  }
0x1497   : > { %v3042_v6 = vpop.xlane.xlu0 %3041  ;;  %v3045_v12 = vpop.xlane.xlu1 %3044 }
0x1498   : > { %v3047_v11 = vadd.f32 %v3046_v33, %v3042_v6  ;;  %v7794_v33 = vld [vmem:[%s9500_s22 + $0x78] ss:$12 sps:$4 sm:$0xff]   ;;  %v7797_v6 = vld [vmem:[%s9500_s22 + $0x8] ss:$12 sps:$4 sm:$0xff]  }
0x149a   : > { %v3048_v13 = vadd.f32 %v3047_v11, %v3045_v12  ;;  %v6373_v11 = vld [vmem:[%s9499_s21] ss:$0 sm:$0xff] }
0x149c   : > { %v3049_v14 = vrot.slane %v3048_v13, 4 }
0x149e   : > { %v3050_v15 = vadd.f32 %v3049_v14, %v3048_v13 }
0x14a0   : > { %v3051_v16 = vrot.slane %v3050_v15, 2 }
0x14a2   : > { %v3052_v17 = vadd.f32 %v3051_v16, %v3050_v15 }
0x14a4   : > { %v3053_v19 = vrot.slane %v3052_v17, 1 }
0x14a6   : > { %v3054_v3 = vadd.f32 %v3053_v19, %v3052_v17 }
0x14a8   : > { %v3055_v18 = vmul.f32 0.0006510417, %v3054_v3 }
0x14aa   : > { %v3056_v20 = vadd.f32 1e-08, %v3055_v18 }
0x14ac   : > { %7897 = vrsqrt.f32 %v3056_v20 }
0x14b6   : > { %v7898_v21 = vpop.eup %7897 }
0x14b7   : > { %v3058_v25 = vmul.f32 %v7898_v21, %v3026_v55  ;;  %v3059_v26 = vmul.f32 %v7898_v21, %v3027_v47  ;;  %v3060_v28 = vmul.f32 %v7898_v21, %v3028_v53  ;;  %v3061_v29 = vmul.f32 %v7898_v21, %v3029_v56 }
0x14b9   : > { %v3068_v34 = vmul.f32 %v6358_v23, %v3058_v25  ;;  %v3069_v36 = vmul.f32 %v6358_v23, %v3059_v26  ;;  %v3070_v37 = vmul.f32 %v6358_v23, %v3060_v28  ;;  %v3071_v38 = vmul.f32 %v6358_v23, %v3061_v29 }
0x14bb   : > { %v3078_v40 = vadd.f32 %v6359_v30, %v3068_v34  ;;  %v3079_v41 = vadd.f32 %v6359_v30, %v3069_v36  ;;  %v3080_v39 = vadd.f32 %v6359_v30, %v3070_v37  ;;  %v3081_v42 = vadd.f32 %v6359_v30, %v3071_v38 }
0x14bd   : > { %v3082_v43 = vpack.c.bf16 %v3079_v41, %v3078_v40  ;;  %v3083_v44 = vpack.c.bf16 %v3081_v42, %v3080_v39 }
0x14bf   : > { %6985 = vmatprep.mubr.msk.bf16.mxu1 %vm1412_vm5, %v3082_v43 }
0x14c0   : > { %6986 = vmatmul.mubr.msk.bf16.vlgmr.msra.gmra.mrb[20].mxu1 %vm1412_vm5, %v3083_v44  ;;  %vm9549_vm5 = vcmask 785408  }
0x14c1   : > { %7193 = vmatprep.mubr.msk.bf16.mxu1 %vm7925_vm3, %v7924_v46  ;;  %vm9550_vm12 = vmmov %vm9549_vm5 }
0x14c2   : > { %vm9551_vm10 = vmmov %vm9549_vm5 }
0x14c3   : > { %vm9552_vm11 = vmmov %vm9549_vm5 }
0x1593   : > { %v6987_v8 = vpop.f32.mrb[20].mxu1 }
0x1594   : > { %v3166_v7 = vadd.f32 %v6987_v8, %v6367_v5  ;;  %v3157_v31 = vpop.f32.mrb[21].mxu1  ;;  %v7798_v8 = vld [vmem:[%s9500_s22 + $0x20] ss:$12 sps:$4 sm:$0xff]  }
0x1595   : > { %v3158_v9 = vadd.f32 %v6367_v5, %v3157_v31  ;;  %v6988_v47 = vpop.f32.mrb[22].mxu1 }
0x1596   : > { %v3169_v55 = vadd.f32 %v6988_v47, %v6367_v5  ;;  %v3160_v56 = vpop.f32.mrb[23].mxu1  ;;  %v3174_v48 = vadd.f32 %v3166_v7, %v8567_v52  ;;  %v7787_v52 = vld [vmem:[%s9500_s22 + $0x34] ss:$12 sps:$4 sm:$0xff]  }
0x1597   : > { %v3161_v53 = vadd.f32 %v6367_v5, %v3160_v56  ;;  %v3172_v57 = vadd.f32 %v3158_v9, %v8563_v49  ;;  %v7784_v49 = vld [vmem:[%s9500_s22 + $0x1c] ss:$12 sps:$4 sm:$0xff]  }
0x1598   : > { %v3175_v51 = vadd.f32 %v3169_v55, %v8561_v10  ;;  %v7779_v10 = vld [vmem:[%s9500_s22] ss:$12 sps:$4 sm:$0xff]  }
0x1599   : > { %v3173_v62 = vadd.f32 %v3161_v53, %v8565_v50  ;;  %v7782_v50 = vld [vmem:[%s9500_s22 + $0x18] ss:$12 sps:$4 sm:$0xff]  }
0x159a   : > { %v3177_v58 = vpack.c.bf16 %v3175_v51, %v3174_v48 }
0x159b   : > { %v3176_v54 = vpack.c.bf16 %v3173_v62, %v3172_v57 }
0x159d   : > { %6993 = vmatprep.mubr.msk.bf16.mxu0 %vm983_vm0, %v3176_v54 }
0x159e   : > { %6994 = vmatmul.mubr.msk.bf16.vlgmr.msra.gmra.mrb[28].mxu0 %vm983_vm0, %v3177_v58 }
0x159f   : > { %3444 = vmatprep.mubr.bf16.mxu0 %v7923_v1  ;;  %3413 = vmatpush1.bf16.msra.mxu0 %v7779_v10 }
0x15a0   : > { %3414 = vmatprep.subr.bf16.mxu0 %v7784_v49 }
0x15a3   : > { %3415 = vmatpush1.bf16.msra.mxu0 %v7782_v50 }
0x15a4   : > { %3416 = vmatprep.subr.bf16.mxu0 %v7787_v52 }
0x15a7   : > { %3417 = vmatpush1.bf16.msra.mxu0 %v7785_v60 }
0x15a8   : > { %3418 = vmatprep.subr.bf16.mxu0 %v7790_v61 }
0x15ab   : > { %3419 = vmatpush1.bf16.msra.mxu0 %v7788_v63  ;;  %v7803_v63 = vld [vmem:[%s9503_s25] sm:$0xff]  }
0x15ac   : > { %3420 = vmatprep.subr.bf16.mxu0 %v7793_v0 }
0x15af   : > { %3421 = vmatpush1.bf16.msra.mxu0 %v7791_v2 }
0x15b0   : > { %3422 = vmatprep.subr.bf16.mxu0 %v7796_v4 }
0x15b3   : > { %3423 = vmatpush1.bf16.msra.mxu0 %v7794_v33 }
0x15b4   : > { %6997 = vmatprep.subr.bf16.mxu0 %v7797_v6 }
0x1671   : > { %v6995_v12 = vpop.f32.mrb[28].mxu0 }
0x1672   : > { %v3250_v13 = vadd.f32 %v6995_v12, %v6373_v11  ;;  %v3241_v14 = vpop.f32.mrb[29].mxu0 }
0x1673   : > { %v3242_v15 = vadd.f32 %v6373_v11, %v3241_v14  ;;  %v6996_v16 = vpop.f32.mrb[30].mxu0 }
0x1674   : > { %v6380_v17 = vmul.f32 -1.442695, %v3250_v13  ;;  %v3253_v19 = vadd.f32 %v6996_v16, %v6373_v11  ;;  %v3244_v3 = vpop.f32.mrb[31].mxu0 }
0x1675   : > { %v6378_v18 = vmul.f32 -1.442695, %v3242_v15  ;;  %v3245_v20 = vadd.f32 %v6373_v11, %v3244_v3 }
0x1676   : > { %7899 = vpow2.f32 %v6380_v17  ;;  %v6381_v21 = vmul.f32 -1.442695, %v3253_v19  ;;  %v7805_v17 = vld [vmem:[%s9501_s23 + $0x14] sm:$0xff]  }
0x1677   : > { %7901 = vpow2.f32 %v6378_v18  ;;  %v6379_v23 = vmul.f32 -1.442695, %v3245_v20  ;;  %v7806_v19 = vld [vmem:[%s9503_s25 + $0x10] sm:$0xff]  }
0x1678   : > { %7903 = vpow2.f32 %v6381_v21 }
0x1679   : > { %7905 = vpow2.f32 %v6379_v23  ;;  %v7807_v23 = vld [vmem:[%s9501_s23 + $0x1c] sm:$0xff]  }
0x1680   : > { %v7900_v25 = vpop.eup %7899 }
0x1681   : > { %v7902_v26 = vpop.eup %7901  ;;  %v3270_v28 = vadd.f32 1.0, %v7900_v25  ;;  %v7808_v25 = vld [vmem:[%s9503_s25 + $0x30] sm:$0xff]  }
0x1682   : > { %v7904_v29 = vpop.eup %7903  ;;  %v3268_v30 = vadd.f32 1.0, %v7902_v26 }
0x1683   : > { %v7906_v34 = vpop.eup %7905  ;;  %7907 = vrcp.f32 %v3270_v28  ;;  %v3271_v36 = vadd.f32 1.0, %v7904_v29 }
0x1684   : > { %7909 = vrcp.f32 %v3268_v30  ;;  %v3269_v37 = vadd.f32 1.0, %v7906_v34  ;;  %v7809_v34 = vld [vmem:[%s9501_s23 + $0x24] ss:$0 sps:$4 sm:$0x11]  }
0x1685   : > { %7911 = vrcp.f32 %v3271_v36  ;;  %v7810_v36 = vld [vmem:[%s9503_s25 + $0x38] sm:$0xff]  }
0x1686   : > { %7913 = vrcp.f32 %v3269_v37 }
0x168d   : > { %v7908_v38 = vpop.eup %7907 }
0x168e   : > { %v7910_v40 = vpop.eup %7909  ;;  %v3282_v42 = vmul.f32 %v7908_v38, %v8170_v32  ;;  %v7799_v32 = vld [vmem:[%s9500_s22 + $0x38] ss:$12 sps:$4 sm:$0xff]  }
0x168f   : > { %v7912_v41 = vpop.eup %7911  ;;  %v3280_v44 = vmul.f32 %v7910_v40, %v8162_v24  ;;  %v7800_v24 = vld [vmem:[%s9500_s22 + $0x50] ss:$12 sps:$4 sm:$0xff]  }
0x1690   : > { %v7914_v39 = vpop.eup %7913  ;;  %v3283_v43 = vmul.f32 %v7912_v41, %v8172_v35 }
0x1691   : > { %v3281_v22 = vmul.f32 %v7914_v39, %v8164_v27  ;;  %v7802_v27 = vld [vmem:[%s9500_s22 + $0x80] ss:$12 sps:$4 sm:$0xff]  }
0x1692   : > { %v3285_v45 = vpack.c.bf16 %v3283_v43, %v3282_v42  ;;  %v7811_v39 = vld [vmem:[%s9501_s23] sm:$0xff]  }
0x1693   : > { %v3284_v5 = vpack.c.bf16 %v3281_v22, %v3280_v44  ;;  %v7812_v42 = vld [vmem:[%s9503_s25 + $0x40] sm:$0xff]  }
0x1695   : > { %6400 = vmatmul.mubr.msk.bf16.vlgmr.msra.gmra.mrb[32].mxu0 %vm9549_vm5, %v3284_v5 }
0x1696   : > { %6998 = vmatpush3.bf16.msra.mxu0 %v7797_v6  ;;  %3454 = vmatprep.mubr.bf16.mxu0 %v7923_v1  ;;  %v7801_v1 = vld [vmem:[%s9500_s22 + $0x68] ss:$12 sps:$4 sm:$0xff]  }
0x1697   : > { %6999 = vmatprep.subr.bf16.mxu0 %v7798_v8  ;;  %v7804_v6 = vld [vmem:[%s9503_s25 + $0x8] sm:$0xff]  }
0x169a   : > { %7000 = vmatpush3.bf16.msra.mxu0 %v7798_v8  ;;  %v7814_v8 = vld [vmem:[%s9503_s25 + $0x48] sm:$0xff]  }
0x169b   : > { %7001 = vmatprep.subr.bf16.mxu0 %v7799_v32 }
0x169d   : > { %6401 = vmatmul.mubr.msk.bf16.gmra.mrb[36].mxu0 %vm9550_vm12, %v3285_v45 }
0x169e   : > { %7002 = vmatpush3.bf16.msra.mxu0 %v7799_v32  ;;  %7009 = vmatprep.mubr.msk.bf16.mxu0 %vm9551_vm10, %v3284_v5  ;;  %v7813_v5 = vld [vmem:[%s9501_s23 + $0x8] sm:$0xff]  }
0x169f   : > { %7003 = vmatprep.subr.bf16.mxu0 %v7800_v24 }
0x16a2   : > { %7004 = vmatpush3.bf16.msra.mxu0 %v7800_v24 }
0x16a3   : > { %7005 = vmatprep.subr.bf16.mxu0 %v7801_v1 }
0x16a6   : > { %7006 = vmatpush3.bf16.msra.mxu0 %v7801_v1 }
0x16a7   : > { %7007 = vmatprep.subr.bf16.mxu0 %v7802_v27 }
0x16aa   : > { %7008 = vmatpush3.bf16.msra.mxu0 %v7802_v27 }
0x16ab   : > { %7013 = vmatprep.subr.bf16.mxu0 %v7924_v46 }
0x16ad   : > { %7010 = vmatmul.mubr.msk.bf16.vlgmr.msra.gmra.mrb[40].mxu0 %vm9552_vm11, %v3285_v45 }
0x16ae   : > { %7017 = vmatprep.mubr.msk.bf16.mxu0 %vm7925_vm3, %v7924_v46 }
0x1768   : > { %v3446_v35 = vpop.f32.mrb[32].mxu0 }
0x1769   : > { %v3448_v7 = vpop.f32.mrb[33].mxu0 }
0x176a   : > { %v3450_v31 = vpop.f32.mrb[34].mxu0 }
0x176b   : > { %v8740_v9 = vpack.c.bf16 %v3450_v31, %v3446_v35  ;;  %v3452_v47 = vpop.f32.mrb[35].mxu0  ;;  %v7815_v35 = vld [vmem:[%s9501_s23 + $0x10] ss:$0 sps:$4 sm:$0x11]  }
0x176c   : > { %v8742_v55 = vpack.c.bf16 %v3452_v47, %v3448_v7  ;;  %v7816_v7 = vld [vmem:[%s9503_s25 + $0x50] sm:$0xff]  }
0x176d   : > { %4568 = vrot.lane.b32.xlu0 %v8740_v9, %s7926_s7 }
0x1770   : > { %v3456_v56 = vpop.f32.mrb[36].mxu0 }
0x1771   : > { %v3458_v53 = vpop.f32.mrb[37].mxu0 }
0x1772   : > { %v3460_v48 = vpop.f32.mrb[38].mxu0 }
0x1773   : > { %v8745_v51 = vpack.c.bf16 %v3460_v48, %v3456_v56  ;;  %v3462_v57 = vpop.f32.mrb[39].mxu0  ;;  %v7817_v56 = vld [vmem:[%s9502_s24 + $0x14] sm:$0xff]  }
0x1774   : > { %v8747_v62 = vpack.c.bf16 %v3462_v57, %v3458_v53  ;;  %v7818_v53 = vld [vmem:[%s9503_s25 + $0x58] sm:$0xff]  }
0x1775   : > { %4670 = vrot.lane.b32.xlu0 %v8745_v51, %s7927_s6  ;;  %4570 = vrot.lane.b32.xlu1 %v8745_v51, %s7926_s7  ;;  %s7936_s7 = smov 88  }
0x1779   : > { %4773 = vrot.lane.b32.xlu0 %v8742_v55, %s7928_s4  ;;  %4666 = vrot.lane.b32.xlu1 %v8740_v9, %s7927_s6 }
0x177d   : > { %4873 = vrot.lane.b32.xlu0 %v8742_v55, %s7929_s10  ;;  %4668 = vrot.lane.b32.xlu1 %v8742_v55, %s7927_s6 }
0x1780   : > { %v8755_v58 = vpop.f32.mrb[40].mxu0 }
0x1781   : > { %v8757_v54 = vpop.f32.mrb[41].mxu0  ;;  %3542 = vrot.lane.b32.xlu0 %v8740_v9, %s7930_s29  ;;  %4672 = vrot.lane.b32.xlu1 %v8747_v62, %s7927_s6  ;;  %s7937_s6 = smov 76  }
0x1782   : > { %v8761_v59 = vpop.f32.mrb[42].mxu0 }
0x1783   : > { %v5952_v10 = vpack.c.bf16 %v8761_v59, %v8755_v58  ;;  %v8765_v49 = vpop.f32.mrb[43].mxu0  ;;  %v7820_v58 = vld [vmem:[%s9503_s25 + $0x60] sm:$0xff]  }
0x1784   : > { %v5951_v50 = vpack.c.bf16 %v8765_v49, %v8757_v54  ;;  %v7821_v49 = vld [vmem:[%s9502_s24 + $0x24] ss:$0 sps:$4 sm:$0xff]  }
0x1785   : > { %3544 = vrot.lane.b32.xlu0 %v8745_v51, %s7930_s29  ;;  %4775 = vrot.lane.b32.xlu1 %v8747_v62, %s7928_s4  ;;  %s7938_s4 = smov 78   ;;  %s7940_s29 = smov 68  }
0x1789   : > { %5073 = vrot.lane.b32.xlu0 %v8742_v55, %s7931_s2  ;;  %4875 = vrot.lane.b32.xlu1 %v8747_v62, %s7929_s10  ;;  %s7939_s10 = smov 66  }
0x178d   : > { %3722 = vrot.lane.b32.xlu0 %v8740_v9, %s7932_s1  ;;  %4973 = vrot.lane.b32.xlu1 %v8742_v55, %s7933_s9 }
0x1791   : > { %3724 = vrot.lane.b32.xlu0 %v8745_v51, %s7932_s1  ;;  %4975 = vrot.lane.b32.xlu1 %v8747_v62, %s7933_s9  ;;  %s7942_s1 = smov 58   ;;  %s7943_s9 = smov 46  }
0x1795   : > { %3806 = vrot.lane.b32.xlu0 %v8740_v9, %s7934_s3  ;;  %5075 = vrot.lane.b32.xlu1 %v8747_v62, %s7931_s2  ;;  %s7941_s2 = smov 56  }
0x1799   : > { %3808 = vrot.lane.b32.xlu0 %v8745_v51, %s7934_s3  ;;  %5173 = vrot.lane.b32.xlu1 %v8742_v55, %s7935_s0  ;;  %s7944_s3 = smov 48  }
0x179d   : > { %3896 = vrot.lane.b32.xlu0 %v8740_v9, %s7936_s7  ;;  %5175 = vrot.lane.b32.xlu1 %v8747_v62, %s7935_s0  ;;  %s7945_s0 = smov 36  }
0x17a1   : > { %3898 = vrot.lane.b32.xlu0 %v8745_v51, %s7936_s7  ;;  %5273 = vrot.lane.b32.xlu1 %v8742_v55, %s7937_s6  ;;  %s7946_s7 = smov 38  }
0x17a5   : > { %3991 = vrot.lane.b32.xlu0 %v8740_v9, %s7938_s4  ;;  %5275 = vrot.lane.b32.xlu1 %v8747_v62, %s7937_s6  ;;  %s7947_s6 = smov 26  }
0x17a9   : > { %3993 = vrot.lane.b32.xlu0 %v8745_v51, %s7938_s4  ;;  %5373 = vrot.lane.b32.xlu1 %v8742_v55, %s7939_s10  ;;  %s7948_s4 = smov 6  }
0x17ad   : > { %4086 = vrot.lane.b32.xlu0 %v8740_v9, %s7940_s29  ;;  %5375 = vrot.lane.b32.xlu1 %v8747_v62, %s7939_s10  ;;  %s7949_s10 = smov 18  }
0x17b1   : > { %4088 = vrot.lane.b32.xlu0 %v8745_v51, %s7940_s29  ;;  %5473 = vrot.lane.b32.xlu1 %v8742_v55, %s7941_s2  ;;  %s7950_s29 = smov 16  }
0x17b5   : > { %4181 = vrot.lane.b32.xlu0 %v8740_v9, %s7942_s1  ;;  %5475 = vrot.lane.b32.xlu1 %v8747_v62, %s7941_s2 }
0x17b9   : > { %4183 = vrot.lane.b32.xlu0 %v8745_v51, %s7942_s1  ;;  %5573 = vrot.lane.b32.xlu1 %v8742_v55, %s7943_s9 }
0x17bd   : > { %4276 = vrot.lane.b32.xlu0 %v8740_v9, %s7944_s3  ;;  %5575 = vrot.lane.b32.xlu1 %v8747_v62, %s7943_s9 }
0x17c1   : > { %4278 = vrot.lane.b32.xlu0 %v8745_v51, %s7944_s3  ;;  %5673 = vrot.lane.b32.xlu1 %v8742_v55, %s7945_s0 }
0x17c5   : > { %4371 = vrot.lane.b32.xlu0 %v8740_v9, %s7946_s7  ;;  %5675 = vrot.lane.b32.xlu1 %v8747_v62, %s7945_s0  ;;  %s7699_s0 = smul.u32 40, %s9556_s5 }
0x17c9   : > { %4373 = vrot.lane.b32.xlu0 %v8745_v51, %s7946_s7  ;;  %5773 = vrot.lane.b32.xlu1 %v8742_v55, %s7947_s6 }
0x17cd   : > { %5977 = vrot.lane.b32.xlu0 %v8742_v55, %s7948_s4  ;;  %5775 = vrot.lane.b32.xlu1 %v8747_v62, %s7947_s6  ;;  %s884_s6 = scalar_lea.vmem %s9505_s27, %s7699_s0 }
0x17d1   : > { %4481 = vrot.lane.b32.xlu0 %v8740_v9, %s7949_s10  ;;  %5873 = vrot.lane.b32.xlu1 %v8742_v55, %s7950_s29 }
0x17d5   : > { %5875 = vrot.lane.b32.xlu1 %v8747_v62, %s7950_s29  ;;  %5983 = vrot.lane.b32.xlu0 %v5952_v10, %s7948_s4 }
0x17d9   : > { %5979 = vrot.lane.b32.xlu1 %v5951_v50, %s7948_s4  ;;  %v7822_v50 = vld [vmem:[%s9503_s25 + $0x68] sm:$0xff]  }
0x17dd   : > { %5981 = vrot.lane.b32.xlu1 %v8747_v62, %s7948_s4  ;;  %v7819_v62 = vld [vmem:[%s9502_s24 + $0x1c] sm:$0xff]   ;;  %s9338_s4 = scalar_lea.vmem %s9504_s26, %s7699_s0  ;;  %s7700_s0 = smul.u32 48, %s9556_s5 }
0x17df   : > { %v4569_v52 = vpop.permute.xlu0 %4568  ;;  %s889_s2 = scalar_lea.vmem %s9506_s28, %s7700_s0 }
0x17e0   : > { %7190 = vmatpush3.bf16.msra.mxu1 %v4569_v52 }
0x17e1   : > { %4483 = vrot.lane.b32.xlu1 %v8745_v51, %s7949_s10  ;;  %7191 = vmatprep.subr.bf16.mxu1 %v7924_v46 }
0x17e7   : > { %v4671_v60 = vpop.permute.xlu0 %4670  ;;  %v4571_v61 = vpop.permute.xlu1 %4570 }
0x17e8   : > { %7192 = vmatpush3.bf16.msra.mxu1 %v4571_v61 }
0x17e9   : > { %7205 = vmatprep.subr.bf16.mxu1 %v7924_v46 }
0x17eb   : > { %v4774_v0 = vpop.permute.xlu0 %4773  ;;  %7194 = vmatmul.mubr.msk.bf16.vlgmr.msra.gmra.mrb[24].mxu1 %vm983_vm0, %v7803_v63  ;;  %v4667_v2 = vpop.permute.xlu1 %4666 }
0x17ec   : > { %7197 = vmatprep.mubr.msk.bf16.mxu1 %vm7925_vm3, %v7924_v46 }
0x17ef   : > { %v8823_v4 = vpop.permute.xlu0 %4873  ;;  %v4669_v33 = vpop.permute.xlu1 %4668 }
0x17f0   : > { %v4675_v11 = vsel %vm4674_vm13, %v4667_v2, %v4669_v33  ;;  %v7824_v2 = vld [vmem:[%s9503_s25 + $0x70] sm:$0xff]  }
0x17f1   : > { %7206 = vmatpush3.bf16.msra.mxu1 %v4675_v11  ;;  %v7825_v11 = vld [vmem:[%s9502_s24 + $0x8] sm:$0xff]  }
0x17f2   : > { %7207 = vmatprep.subr.bf16.mxu1 %v7924_v46 }
0x17f3   : > { %v3543_v12 = vpop.permute.xlu0 %3542  ;;  %7198 = vmatmul.mubr.msk.bf16.gmra.mrb[28].mxu1 %vm983_vm0, %v7804_v6  ;;  %v4673_v13 = vpop.permute.xlu1 %4672 }
0x17f4   : > { %v4676_v14 = vsel %vm4674_vm13, %v4671_v60, %v4673_v13  ;;  %7014 = vmatpush3.bf16.msra.mxu0 %v3543_v12  ;;  %7201 = vmatprep.mubr.msk.bf16.mxu1 %vm7925_vm3, %v7924_v46  ;;  %v7826_v12 = vld [vmem:[%s9503_s25 + $0x78] sm:$0xff]  }
0x17f5   : > { %7208 = vmatpush3.bf16.msra.mxu1 %v4676_v14  ;;  %7015 = vmatprep.subr.bf16.mxu0 %v7924_v46 }
0x17f6   : > { %7221 = vmatprep.subr.bf16.mxu1 %v7924_v46 }
0x17f7   : > { %v3545_v15 = vpop.permute.xlu0 %3544  ;;  %v4776_v16 = vpop.permute.xlu1 %4775 }
0x17f8   : > { %7016 = vmatpush3.bf16.msra.mxu0 %v3545_v15 }
0x17f9   : > { %7029 = vmatprep.subr.bf16.mxu0 %v7924_v46 }
0x17fb   : > { %7018 = vmatmul.mubr.msk.bf16.vlgmr.msra.gmra.mrb[44].mxu0 %vm983_vm0, %v7805_v17  ;;  %v8842_v3 = vpop.permute.xlu0 %5073  ;;  %7202 = vmatmul.mubr.msk.bf16.gmra.mrb[32].mxu1 %vm983_vm0, %v7806_v19  ;;  %v4876_v18 = vpop.permute.xlu1 %4875  ;;  %v7828_v17 = vld [vmem:[%s9503_s25 + $0x80] sm:$0xff]   ;;  %v7829_v19 = vld [vmem:[%s9502_s24 + $0x28] sm:$0xff]  }
0x17fc   : > { %7030 = vmatpush3.bf16.msra.mxu0 %v8740_v9  ;;  %7021 = vmatprep.mubr.msk.bf16.mxu0 %vm7925_vm3, %v7924_v46 }
0x17fd   : > { %7031 = vmatprep.subr.bf16.mxu0 %v7924_v46  ;;  %7209 = vmatprep.mubr.msk.bf16.mxu1 %vm7925_vm3, %v7924_v46 }
0x17ff   : > { %v3723_v20 = vpop.permute.xlu0 %3722  ;;  %v8851_v21 = vpop.permute.xlu1 %4973 }
0x1800   : > { %7032 = vmatpush3.bf16.msra.mxu0 %v8745_v51 }
0x1801   : > { %7045 = vmatprep.subr.bf16.mxu0 %v7924_v46 }
0x1803   : > { %7022 = vmatmul.mubr.msk.bf16.gmra.mrb[48].mxu0 %vm983_vm0, %v7807_v23  ;;  %v3725_v26 = vpop.permute.xlu0 %3724  ;;  %7210 = vmatmul.mubr.msk.bf16.vlgmr.msra.gmra.mrb[24].mxu1 %vm983_vm0, %v7808_v25  ;;  %v8863_v28 = vpop.permute.xlu1 %4975  ;;  %v7834_v23 = vld [vmem:[%s9503_s25 + $0x98] sm:$0xff]  }
0x1804   : > { %7222 = vmatpush3.bf16.msra.mxu1 %v4774_v0  ;;  %7025 = vmatprep.mubr.msk.bf16.mxu0 %vm7925_vm3, %v7924_v46  ;;  %v7823_v0 = vld [vmem:[%s9502_s24] sm:$0xff]  }
0x1805   : > { %7223 = vmatprep.subr.bf16.mxu1 %v7924_v46  ;;  %7213 = vmatprep.mubr.msk.bf16.mxu1 %vm7925_vm3, %v7924_v46  ;;  %v7835_v25 = vld [vmem:[%s9502_s24 + $0x3c] sm:$0xff]  }
0x1807   : > { %v3807_v29 = vpop.permute.xlu0 %3806  ;;  %v8870_v30 = vpop.permute.xlu1 %5075 }
0x1808   : > { %7224 = vmatpush3.bf16.msra.mxu1 %v4776_v16  ;;  %v7827_v16 = vld [vmem:[%s9502_s24 + $0x10] ss:$0 sps:$4 sm:$0xff]  }
0x1809   : > { %7237 = vmatprep.subr.bf16.mxu1 %v7924_v46 }
0x180b   : > { %7026 = vmatmul.mubr.msk.bf16.gmra.mrb[52].mxu0 %vm983_vm0, %v7809_v34  ;;  %v3809_v37 = vpop.permute.xlu0 %3808  ;;  %7214 = vmatmul.mubr.msk.bf16.gmra.mrb[28].mxu1 %vm983_vm0, %v7810_v36  ;;  %v8881_v38 = vpop.permute.xlu1 %5173  ;;  %v7840_v34 = vld [vmem:[%s9503_s25 + $0xb0] sm:$0xff]  }
0x180c   : > { %7033 = vmatprep.mubr.msk.bf16.mxu0 %vm7925_vm3, %v7924_v46  ;;  %7217 = vmatprep.mubr.msk.bf16.mxu1 %vm7925_vm3, %v7924_v46  ;;  %v7841_v36 = vld [vmem:[%s9502_s24 + $0x50] sm:$0xff]  }
0x180f   : > { %v8887_v40 = vpop.permute.xlu0 %3896  ;;  %v8889_v41 = vpop.permute.xlu1 %5175 }
0x1813   : > { %7034 = vmatmul.mubr.msk.bf16.vlgmr.msra.gmra.mrb[44].mxu0 %vm983_vm0, %v7811_v39  ;;  %v8898_v43 = vpop.permute.xlu0 %3898  ;;  %7218 = vmatmul.mubr.msk.bf16.gmra.mrb[32].mxu1 %vm983_vm0, %v7812_v42  ;;  %v8901_v44 = vpop.permute.xlu1 %5273  ;;  %v7846_v39 = vld [vmem:[%s9503_s25 + $0xc8] sm:$0xff]  }
0x1814   : > { %7046 = vmatpush3.bf16.msra.mxu0 %v3723_v20  ;;  %7037 = vmatprep.mubr.msk.bf16.mxu0 %vm7925_vm3, %v7924_v46  ;;  %v7832_v20 = vld [vmem:[%s9503_s25 + $0x90] sm:$0xff]   ;;  %v7847_v42 = vld [vmem:[%s9502_s24 + $0x64] sm:$0xff]  }
0x1815   : > { %7047 = vmatprep.subr.bf16.mxu0 %v7924_v46  ;;  %7225 = vmatprep.mubr.msk.bf16.mxu1 %vm7925_vm3, %v7924_v46 }
0x1817   : > { %v8908_v22 = vpop.permute.xlu0 %3991  ;;  %v8910_v45 = vpop.permute.xlu1 %5275 }
0x1818   : > { %7048 = vmatpush3.bf16.msra.mxu0 %v3725_v26  ;;  %v7836_v26 = vld [vmem:[%s9503_s25 + $0xa0] sm:$0xff]  }
0x1819   : > { %7061 = vmatprep.subr.bf16.mxu0 %v7924_v46 }
0x181b   : > { %7038 = vmatmul.mubr.msk.bf16.gmra.mrb[48].mxu0 %vm983_vm0, %v7813_v5  ;;  %v8920_v32 = vpop.permute.xlu0 %3993  ;;  %7226 = vmatmul.mubr.msk.bf16.vlgmr.msra.gmra.mrb[24].mxu1 %vm983_vm0, %v7814_v8  ;;  %v8923_v24 = vpop.permute.xlu1 %5373  ;;  %v7852_v5 = vld [vmem:[%s9503_s25 + $0xe0] sm:$0xff]   ;;  %v7853_v8 = vld [vmem:[%s9502_s24 + $0x78] sm:$0xff]  }
0x181c   : > { %7238 = vmatpush3.bf16.msra.mxu1 %v8823_v4  ;;  %7041 = vmatprep.mubr.msk.bf16.mxu0 %vm7925_vm3, %v7924_v46 }
0x181d   : > { %7239 = vmatprep.subr.bf16.mxu1 %v7924_v46  ;;  %7229 = vmatprep.mubr.msk.bf16.mxu1 %vm7925_vm3, %v7924_v46 }
0x181f   : > { %v8931_v1 = vpop.permute.xlu0 %4086  ;;  %v8933_v27 = vpop.permute.xlu1 %5375 }
0x1820   : > { %7240 = vmatpush3.bf16.msra.mxu1 %v4876_v18  ;;  %v7831_v18 = vld [vmem:[%s9502_s24 + $0x30] sm:$0xff]  }
0x1821   : > { %7253 = vmatprep.subr.bf16.mxu1 %v7924_v46 }
0x1823   : > { %7042 = vmatmul.mubr.msk.bf16.gmra.mrb[52].mxu0 %vm983_vm0, %v7815_v35  ;;  %v8943_v31 = vpop.permute.xlu0 %4088  ;;  %7230 = vmatmul.mubr.msk.bf16.gmra.mrb[28].mxu1 %vm983_vm0, %v7816_v7  ;;  %v8946_v9 = vpop.permute.xlu1 %5473  ;;  %v7858_v35 = vld [vmem:[%s9503_s25 + $0xf8] sm:$0xff]   ;;  %v7859_v7 = vld [vmem:[%s9502_s24 + $0x8c] sm:$0xff]  }
0x1824   : > { %7049 = vmatprep.mubr.msk.bf16.mxu0 %vm7925_vm3, %v7924_v46  ;;  %7233 = vmatprep.mubr.msk.bf16.mxu1 %vm7925_vm3, %v7924_v46 }
0x1827   : > { %v8952_v47 = vpop.permute.xlu0 %4181  ;;  %v8954_v55 = vpop.permute.xlu1 %5475 }
0x182b   : > { %7050 = vmatmul.mubr.msk.bf16.vlgmr.msra.gmra.mrb[56].mxu0 %vm983_vm0, %v7817_v56  ;;  %7234 = vmatmul.mubr.msk.bf16.gmra.mrb[32].mxu1 %vm983_vm0, %v7818_v53  ;;  %v8964_v48 = vpop.permute.xlu1 %5573  ;;  %v8968_v51 = vpop.permute.xlu0 %4183  ;;  %v7861_v56 = vld [vmem:[%s9502_s24 + $0x94] sm:$0xff]   ;;  %v7862_v53 = vld [vmem:[%s9503_s25 + $0x108] sm:$0xff]  }
0x182c   : > { %7062 = vmatpush3.bf16.msra.mxu0 %v3807_v29  ;;  %7053 = vmatprep.mubr.msk.bf16.mxu0 %vm7925_vm3, %v7924_v46  ;;  %v7838_v29 = vld [vmem:[%s9503_s25 + $0xa8] sm:$0xff]  }
0x182d   : > { %7063 = vmatprep.subr.bf16.mxu0 %v7924_v46  ;;  %7241 = vmatprep.mubr.msk.bf16.mxu1 %vm7925_vm3, %v7924_v46 }
0x182f   : > { %v8973_v57 = vpop.permute.xlu1 %5575  ;;  %v8982_v54 = vpop.permute.xlu0 %4276 }
0x1830   : > { %7064 = vmatpush3.bf16.msra.mxu0 %v3809_v37  ;;  %v7842_v37 = vld [vmem:[%s9503_s25 + $0xb8] sm:$0xff]  }
0x1831   : > { %7077 = vmatprep.subr.bf16.mxu0 %v7924_v46 }
0x1833   : > { %7054 = vmatmul.mubr.msk.bf16.gmra.mrb[60].mxu0 %vm983_vm0, %v7819_v62  ;;  %7242 = vmatmul.mubr.msk.bf16.vlgmr.msra.gmra.mrb[24].mxu1 %vm983_vm0, %v7820_v58  ;;  %v8986_v59 = vpop.permute.xlu1 %5673  ;;  %v9003_v52 = vpop.permute.xlu0 %4278  ;;  %v7865_v62 = vld [vmem:[%s9503_s25 + $0x118] sm:$0xff]  }
0x1834   : > { %7254 = vmatpush3.bf16.msra.mxu1 %v8851_v21  ;;  %7057 = vmatprep.mubr.msk.bf16.mxu0 %vm7925_vm3, %v7924_v46  ;;  %v7833_v21 = vld [vmem:[%s9502_s24 + $0x38] ss:$0 sps:$4 sm:$0xff]  }
0x1835   : > { %7255 = vmatprep.subr.bf16.mxu1 %v7924_v46  ;;  %7245 = vmatprep.mubr.msk.bf16.mxu1 %vm7925_vm3, %v7924_v46 }
0x1837   : > { %v8994_v10 = vpop.permute.xlu1 %5675  ;;  %v9014_v61 = vpop.permute.xlu0 %4371 }
0x1838   : > { %7256 = vmatpush3.bf16.msra.mxu1 %v8863_v28  ;;  %v7837_v28 = vld [vmem:[%s9502_s24 + $0x44] sm:$0xff]  }
0x1839   : > { %7269 = vmatprep.subr.bf16.mxu1 %v7924_v46 }
0x183b   : > { %7058 = vmatmul.mubr.msk.bf16.gmra.mrb[64].mxu0 %vm983_vm0, %v7821_v49  ;;  %7246 = vmatmul.mubr.msk.bf16.gmra.mrb[28].mxu1 %vm983_vm0, %v7822_v50  ;;  %v9008_v60 = vpop.permute.xlu1 %5773  ;;  %v9031_v33 = vpop.permute.xlu0 %4373  ;;  %v7866_v50 = vld [vmem:[%s9503_s25 + $0x120] sm:$0xff]  }
0x183c   : > { %7065 = vmatprep.mubr.msk.bf16.mxu0 %vm7925_vm3, %v7924_v46  ;;  %7249 = vmatprep.mubr.msk.bf16.mxu1 %vm7925_vm3, %v7924_v46 }
0x183f   : > { %v9016_v63 = vpop.permute.xlu1 %5775  ;;  %v5978_v13 = vpop.permute.xlu0 %5977 }
0x1843   : > { %7066 = vmatmul.mubr.msk.bf16.vlgmr.msra.gmra.mrb[56].mxu0 %vm983_vm0, %v7823_v0  ;;  %7250 = vmatmul.mubr.msk.bf16.gmra.mrb[32].mxu1 %vm983_vm0, %v7824_v2  ;;  %v9026_v4 = vpop.permute.xlu1 %5873 }
0x1844   : > { %7078 = vmatpush3.bf16.msra.mxu0 %v8887_v40  ;;  %7069 = vmatprep.mubr.msk.bf16.mxu0 %vm7925_vm3, %v7924_v46  ;;  %v7844_v40 = vld [vmem:[%s9503_s25 + $0xc0] sm:$0xff]  }
0x1845   : > { %7079 = vmatprep.subr.bf16.mxu0 %v7924_v46  ;;  %7257 = vmatprep.mubr.msk.bf16.mxu1 %vm7925_vm3, %v7924_v46 }
0x1847   : > { %v9036_v6 = vpop.permute.xlu1 %5875 }
0x1848   : > { %7080 = vmatpush3.bf16.msra.mxu0 %v8898_v43  ;;  %v7848_v43 = vld [vmem:[%s9503_s25 + $0xd0] sm:$0xff]  }
0x1849   : > { %7093 = vmatprep.subr.bf16.mxu0 %v7924_v46 }
0x184b   : > { %7070 = vmatmul.mubr.msk.bf16.gmra.mrb[60].mxu0 %vm983_vm0, %v7825_v11  ;;  %7258 = vmatmul.mubr.msk.bf16.vlgmr.msra.gmra.mrb[24].mxu1 %vm983_vm0, %v7826_v12  ;;  %v5980_v14 = vpop.permute.xlu1 %5979  ;;  %v7867_v11 = vld [vmem:[%s9503_s25 + $0x128] sm:$0xff]  }
0x184c   : > { %7270 = vmatpush3.bf16.msra.mxu1 %v8842_v3  ;;  %v9050_v15 = vsel %vm5985_vm14, %v5978_v13, %v5980_v14  ;;  %7073 = vmatprep.mubr.msk.bf16.mxu0 %vm7925_vm3, %v7924_v46  ;;  %v7830_v3 = vld [vmem:[%s9503_s25 + $0x88] sm:$0xff]  }
0x184d   : > { %7271 = vmatprep.subr.bf16.mxu1 %v7924_v46  ;;  %7261 = vmatprep.mubr.msk.bf16.mxu1 %vm7925_vm3, %v7924_v46 }
0x1850   : > { %7272 = vmatpush3.bf16.msra.mxu1 %v8870_v30  ;;  %v7839_v30 = vld [vmem:[%s9502_s24 + $0x4c] ss:$0 sps:$4 sm:$0xff]  }
0x1851   : > { %7285 = vmatprep.subr.bf16.mxu1 %v7924_v46 }
0x1853   : > { %7074 = vmatmul.mubr.msk.bf16.gmra.mrb[64].mxu0 %vm983_vm0, %v7827_v16  ;;  %7262 = vmatmul.mubr.msk.bf16.gmra.mrb[28].mxu1 %vm983_vm0, %v7828_v17  ;;  %v7868_v16 = vld [vmem:[%s9503_s25 + $0x130] sm:$0xff]   ;;  %v7870_v17 = vld [vmem:[%s9503_s25 + $0x140] sm:$0xff]  }
0x1854   : > { %7081 = vmatprep.mubr.msk.bf16.mxu0 %vm7925_vm3, %v7924_v46  ;;  %7265 = vmatprep.mubr.msk.bf16.mxu1 %vm7925_vm3, %v7924_v46 }
0x185b   : > { %7082 = vmatmul.mubr.msk.bf16.vlgmr.msra.gmra.mrb[56].mxu0 %vm983_vm0, %v7829_v19  ;;  %7266 = vmatmul.mubr.msk.bf16.gmra.mrb[32].mxu1 %vm983_vm0, %v7830_v3 }
0x185c   : > { %7094 = vmatpush3.bf16.msra.mxu0 %v8908_v22  ;;  %7085 = vmatprep.mubr.msk.bf16.mxu0 %vm7925_vm3, %v7924_v46  ;;  %v7850_v22 = vld [vmem:[%s9503_s25 + $0xd8] sm:$0xff]  }
0x185d   : > { %7095 = vmatprep.subr.bf16.mxu0 %v7924_v46  ;;  %7273 = vmatprep.mubr.msk.bf16.mxu1 %vm7925_vm3, %v7924_v46 }
0x1860   : > { %7096 = vmatpush3.bf16.msra.mxu0 %v8920_v32  ;;  %v7854_v32 = vld [vmem:[%s9503_s25 + $0xe8] sm:$0xff]  }
0x1861   : > { %7109 = vmatprep.subr.bf16.mxu0 %v7924_v46 }
0x1863   : > { %7086 = vmatmul.mubr.msk.bf16.gmra.mrb[60].mxu0 %vm983_vm0, %v7831_v18  ;;  %7274 = vmatmul.mubr.msk.bf16.vlgmr.msra.gmra.mrb[24].mxu1 %vm983_vm0, %v7832_v20  ;;  %v7873_v18 = vld [vmem:[%s9503_s25 + $0x158] sm:$0xff]   ;;  %v7876_v20 = vld [vmem:[%s9503_s25 + $0x168] sm:$0xff]  }
0x1864   : > { %7286 = vmatpush3.bf16.msra.mxu1 %v8881_v38  ;;  %7089 = vmatprep.mubr.msk.bf16.mxu0 %vm7925_vm3, %v7924_v46  ;;  %v7843_v38 = vld [vmem:[%s9502_s24 + $0x58] sm:$0xff]  }
0x1865   : > { %7287 = vmatprep.subr.bf16.mxu1 %v7924_v46  ;;  %7277 = vmatprep.mubr.msk.bf16.mxu1 %vm7925_vm3, %v7924_v46 }
0x1868   : > { %7288 = vmatpush3.bf16.msra.mxu1 %v8889_v41  ;;  %v7845_v41 = vld [vmem:[%s9502_s24 + $0x60] ss:$0 sps:$4 sm:$0xff]  }
0x1869   : > { %7301 = vmatprep.subr.bf16.mxu1 %v7924_v46 }
0x186b   : > { %7090 = vmatmul.mubr.msk.bf16.gmra.mrb[64].mxu0 %vm983_vm0, %v7833_v21  ;;  %7278 = vmatmul.mubr.msk.bf16.gmra.mrb[28].mxu1 %vm983_vm0, %v7834_v23  ;;  %v7878_v21 = vld [vmem:[%s9503_s25 + $0x170] sm:$0xff]   ;;  %v7880_v23 = vld [vmem:[%s9503_s25 + $0x178] sm:$0xff]  }
0x186c   : > { %7097 = vmatprep.mubr.msk.bf16.mxu0 %vm7925_vm3, %v7924_v46  ;;  %7281 = vmatprep.mubr.msk.bf16.mxu1 %vm7925_vm3, %v7924_v46 }
0x1873   : > { %7098 = vmatmul.mubr.msk.bf16.vlgmr.msra.gmra.mrb[56].mxu0 %vm983_vm0, %v7835_v25  ;;  %7282 = vmatmul.mubr.msk.bf16.gmra.mrb[32].mxu1 %vm983_vm0, %v7836_v26 }
0x1874   : > { %7110 = vmatpush3.bf16.msra.mxu0 %v8931_v1  ;;  %7101 = vmatprep.mubr.msk.bf16.mxu0 %vm7925_vm3, %v7924_v46  ;;  %v7856_v1 = vld [vmem:[%s9503_s25 + $0xf0] sm:$0xff]  }
0x1875   : > { %7111 = vmatprep.subr.bf16.mxu0 %v7924_v46  ;;  %7289 = vmatprep.mubr.msk.bf16.mxu1 %vm7925_vm3, %v7924_v46 }
0x1878   : > { %7112 = vmatpush3.bf16.msra.mxu0 %v8943_v31  ;;  %v7860_v31 = vld [vmem:[%s9503_s25 + $0x100] sm:$0xff]  }
0x1879   : > { %7125 = vmatprep.subr.bf16.mxu0 %v7924_v46 }
0x187b   : > { %7102 = vmatmul.mubr.msk.bf16.gmra.mrb[60].mxu0 %vm983_vm0, %v7837_v28  ;;  %7290 = vmatmul.mubr.msk.bf16.vlgmr.msra.gmra.mrb[24].mxu1 %vm983_vm0, %v7838_v29 }
0x187c   : > { %7302 = vmatpush3.bf16.msra.mxu1 %v8901_v44  ;;  %7105 = vmatprep.mubr.msk.bf16.mxu0 %vm7925_vm3, %v7924_v46  ;;  %v7849_v44 = vld [vmem:[%s9502_s24 + $0x6c] sm:$0xff]  }
0x187d   : > { %7303 = vmatprep.subr.bf16.mxu1 %v7924_v46  ;;  %7293 = vmatprep.mubr.msk.bf16.mxu1 %vm7925_vm3, %v7924_v46 }
0x1880   : > { %7304 = vmatpush3.bf16.msra.mxu1 %v8910_v45  ;;  %v7851_v45 = vld [vmem:[%s9502_s24 + $0x74] ss:$0 sps:$4 sm:$0xff]  }
0x1881   : > { %7317 = vmatprep.subr.bf16.mxu1 %v7924_v46 }
0x1883   : > { %7106 = vmatmul.mubr.msk.bf16.gmra.mrb[64].mxu0 %vm983_vm0, %v7839_v30  ;;  %7294 = vmatmul.mubr.msk.bf16.gmra.mrb[28].mxu1 %vm983_vm0, %v7840_v34 }
0x1884   : > { %7113 = vmatprep.mubr.msk.bf16.mxu0 %vm7925_vm3, %v7924_v46  ;;  %7297 = vmatprep.mubr.msk.bf16.mxu1 %vm7925_vm3, %v7924_v46 }
0x188b   : > { %7114 = vmatmul.mubr.msk.bf16.vlgmr.msra.gmra.mrb[56].mxu0 %vm983_vm0, %v7841_v36  ;;  %7298 = vmatmul.mubr.msk.bf16.gmra.mrb[32].mxu1 %vm983_vm0, %v7842_v37 }
0x188c   : > { %7126 = vmatpush3.bf16.msra.mxu0 %v8952_v47  ;;  %7117 = vmatprep.mubr.msk.bf16.mxu0 %vm7925_vm3, %v7924_v46  ;;  %v4482_v47 = vpop.permute.xlu0 %4481 }
0x188d   : > { %7127 = vmatprep.subr.bf16.mxu0 %v7924_v46  ;;  %7305 = vmatprep.mubr.msk.bf16.mxu1 %vm7925_vm3, %v7924_v46 }
0x1890   : > { %7128 = vmatpush3.bf16.msra.mxu0 %v8968_v51  ;;  %v7864_v51 = vld [vmem:[%s9503_s25 + $0x110] sm:$0xff]   ;;  %v5984_v19 = vpop.permute.xlu0 %5983 }
0x1891   : > { %7141 = vmatprep.subr.bf16.mxu0 %v7924_v46 }
0x1893   : > { %7118 = vmatmul.mubr.msk.bf16.gmra.mrb[60].mxu0 %vm983_vm0, %v7843_v38  ;;  %7306 = vmatmul.mubr.msk.bf16.vlgmr.msra.gmra.mrb[24].mxu1 %vm983_vm0, %v7844_v40 }
0x1894   : > { %7318 = vmatpush3.bf16.msra.mxu1 %v8923_v24  ;;  %7121 = vmatprep.mubr.msk.bf16.mxu0 %vm7925_vm3, %v7924_v46  ;;  %v7855_v24 = vld [vmem:[%s9502_s24 + $0x80] sm:$0xff]  }
0x1895   : > { %7319 = vmatprep.subr.bf16.mxu1 %v7924_v46  ;;  %7309 = vmatprep.mubr.msk.bf16.mxu1 %vm7925_vm3, %v7924_v46 }
0x1898   : > { %7320 = vmatpush3.bf16.msra.mxu1 %v8933_v27  ;;  %v7857_v27 = vld [vmem:[%s9502_s24 + $0x88] ss:$0 sps:$4 sm:$0xff]  }
0x1899   : > { %7333 = vmatprep.subr.bf16.mxu1 %v7924_v46 }
0x189b   : > { %7122 = vmatmul.mubr.msk.bf16.gmra.mrb[64].mxu0 %vm983_vm0, %v7845_v41  ;;  %7310 = vmatmul.mubr.msk.bf16.gmra.mrb[28].mxu1 %vm983_vm0, %v7846_v39 }
0x189c   : > { %7129 = vmatprep.mubr.msk.bf16.mxu0 %vm7925_vm3, %v7924_v46  ;;  %7313 = vmatprep.mubr.msk.bf16.mxu1 %vm7925_vm3, %v7924_v46 }
0x18a3   : > { %7130 = vmatmul.mubr.msk.bf16.vlgmr.msra.gmra.mrb[56].mxu0 %vm983_vm0, %v7847_v42  ;;  %7314 = vmatmul.mubr.msk.bf16.gmra.mrb[32].mxu1 %vm983_vm0, %v7848_v43 }
0x18a4   : > { %7142 = vmatpush3.bf16.msra.mxu0 %v8982_v54  ;;  %7133 = vmatprep.mubr.msk.bf16.mxu0 %vm7925_vm3, %v7924_v46  ;;  %v7875_v54 = vld [vmem:[%s9503_s25 + $0x18] sm:$0xff]  }
0x18a5   : > { %7143 = vmatprep.subr.bf16.mxu0 %v7924_v46  ;;  %7321 = vmatprep.mubr.msk.bf16.mxu1 %vm7925_vm3, %v7924_v46 }
0x18a8   : > { %7144 = vmatpush3.bf16.msra.mxu0 %v9003_v52 }
0x18a9   : > { %7157 = vmatprep.subr.bf16.mxu0 %v7924_v46 }
0x18ab   : > { %7134 = vmatmul.mubr.msk.bf16.gmra.mrb[60].mxu0 %vm983_vm0, %v7849_v44  ;;  %7322 = vmatmul.mubr.msk.bf16.vlgmr.msra.gmra.mrb[24].mxu1 %vm983_vm0, %v7850_v22 }
0x18ac   : > { %7334 = vmatpush3.bf16.msra.mxu1 %v8946_v9  ;;  %7137 = vmatprep.mubr.msk.bf16.mxu0 %vm7925_vm3, %v7924_v46  ;;  %v9297_v9 = vpop.permute.xlu1 %5981 }
0x18ad   : > { %7335 = vmatprep.subr.bf16.mxu1 %v7924_v46  ;;  %7325 = vmatprep.mubr.msk.bf16.mxu1 %vm7925_vm3, %v7924_v46  ;;  %v5987_v3 = vsel %vm5985_vm14, %v9297_v9, %v5984_v19 }
0x18b0   : > { %7336 = vmatpush3.bf16.msra.mxu1 %v8954_v55  ;;  %v4484_v55 = vpop.permute.xlu1 %4483 }
0x18b1   : > { %7349 = vmatprep.subr.bf16.mxu1 %v7924_v46 }
0x18b3   : > { %7138 = vmatmul.mubr.msk.bf16.gmra.mrb[64].mxu0 %vm983_vm0, %v7851_v45  ;;  %7326 = vmatmul.mubr.msk.bf16.gmra.mrb[28].mxu1 %vm983_vm0, %v7852_v5 }
0x18b4   : > { %7145 = vmatprep.mubr.msk.bf16.mxu0 %vm7925_vm3, %v7924_v46  ;;  %7329 = vmatprep.mubr.msk.bf16.mxu1 %vm7925_vm3, %v7924_v46 }
0x18bb   : > { %7146 = vmatmul.mubr.msk.bf16.vlgmr.msra.gmra.mrb[56].mxu0 %vm983_vm0, %v7853_v8  ;;  %7330 = vmatmul.mubr.msk.bf16.gmra.mrb[32].mxu1 %vm983_vm0, %v7854_v32 }
0x18bc   : > { %7158 = vmatpush3.bf16.msra.mxu0 %v9014_v61  ;;  %7149 = vmatprep.mubr.msk.bf16.mxu0 %vm7925_vm3, %v7924_v46  ;;  %v7877_v61 = vld [vmem:[%s9503_s25 + $0x20] sm:$0xff]  }
0x18bd   : > { %7159 = vmatprep.subr.bf16.mxu0 %v7924_v46  ;;  %7337 = vmatprep.mubr.msk.bf16.mxu1 %vm7925_vm3, %v7924_v46 }
0x18c0   : > { %7160 = vmatpush3.bf16.msra.mxu0 %v9031_v33 }
0x18c1   : > { %7173 = vmatprep.subr.bf16.mxu0 %v7924_v46 }
0x18c3   : > { %7150 = vmatmul.mubr.msk.bf16.gmra.mrb[60].mxu0 %vm983_vm0, %v7855_v24  ;;  %7338 = vmatmul.mubr.msk.bf16.vlgmr.msra.gmra.mrb[24].mxu1 %vm983_vm0, %v7856_v1 }
0x18c4   : > { %7350 = vmatpush3.bf16.msra.mxu1 %v8964_v48  ;;  %7153 = vmatprep.mubr.msk.bf16.mxu0 %vm7925_vm3, %v7924_v46  ;;  %v7863_v48 = vld [vmem:[%s9502_s24 + $0x9c] ss:$0 sps:$4 sm:$0xff]  }
0x18c5   : > { %7351 = vmatprep.subr.bf16.mxu1 %v7924_v46  ;;  %7341 = vmatprep.mubr.msk.bf16.mxu1 %vm7925_vm3, %v7924_v46 }
0x18c8   : > { %7352 = vmatpush3.bf16.msra.mxu1 %v8973_v57 }
0x18c9   : > { %7365 = vmatprep.subr.bf16.mxu1 %v7924_v46 }
0x18cb   : > { %7154 = vmatmul.mubr.msk.bf16.gmra.mrb[64].mxu0 %vm983_vm0, %v7857_v27  ;;  %7342 = vmatmul.mubr.msk.bf16.gmra.mrb[28].mxu1 %vm983_vm0, %v7858_v35 }
0x18cc   : > { %7161 = vmatprep.mubr.msk.bf16.mxu0 %vm7925_vm3, %v7924_v46  ;;  %7345 = vmatprep.mubr.msk.bf16.mxu1 %vm7925_vm3, %v7924_v46 }
0x18d3   : > { %7162 = vmatmul.mubr.msk.bf16.vlgmr.msra.gmra.mrb[56].mxu0 %vm983_vm0, %v7859_v7  ;;  %7346 = vmatmul.mubr.msk.bf16.gmra.mrb[32].mxu1 %vm983_vm0, %v7860_v31 }
0x18d4   : > { %7174 = vmatpush3.bf16.msra.mxu0 %v4482_v47  ;;  %7165 = vmatprep.mubr.msk.bf16.mxu0 %vm7925_vm3, %v7924_v46 }
0x18d5   : > { %7175 = vmatprep.subr.bf16.mxu0 %v7924_v46  ;;  %7353 = vmatprep.mubr.msk.bf16.mxu1 %vm7925_vm3, %v7924_v46 }
0x18d8   : > { %7176 = vmatpush3.bf16.msra.mxu0 %v4484_v55 }
0x18db   : > { %7166 = vmatmul.mubr.msk.bf16.gmra.mrb[60].mxu0 %vm983_vm0, %v7861_v56  ;;  %7354 = vmatmul.mubr.msk.bf16.vlgmr.msra.gmra.mrb[24].mxu1 %vm983_vm0, %v7862_v53 }
0x18dc   : > { %7366 = vmatpush3.bf16.msra.mxu1 %v8986_v59  ;;  %7169 = vmatprep.mubr.msk.bf16.mxu0 %vm7925_vm3, %v7924_v46 }
0x18dd   : > { %7367 = vmatprep.subr.bf16.mxu1 %v7924_v46  ;;  %7357 = vmatprep.mubr.msk.bf16.mxu1 %vm7925_vm3, %v7924_v46 }
0x18e0   : > { %7368 = vmatpush3.bf16.msra.mxu1 %v8994_v10 }
0x18e1   : > { %7381 = vmatprep.subr.bf16.mxu1 %v7924_v46 }
0x18e3   : > { %7170 = vmatmul.mubr.msk.bf16.gmra.mrb[64].mxu0 %vm983_vm0, %v7863_v48  ;;  %7358 = vmatmul.mubr.msk.bf16.gmra.mrb[28].mxu1 %vm983_vm0, %v7864_v51 }
0x18e4   : > { %7361 = vmatprep.mubr.msk.bf16.mxu1 %vm7925_vm3, %v7924_v46  ;;  %7177 = vmatprep.mubr.msk.bf16.mxu0 %vm7925_vm3, %v7924_v46 }
0x18e6   : > { %v3669_v57 = vpop.f32.mrb[44].mxu0 }
0x18e7   : > { %3692 = vst.msk [vmem:[%s9338_s4] sm:$0xff] %vm3691_vm15, %v3669_v57  ;;  %v7035_v58 = vpop.f32.mrb[45].mxu0 }
0x18e8   : > { %v3672_v59 = vpop.f32.mrb[46].mxu0 }
0x18e9   : > { %3693 = vst.msk [vmem:[%s9338_s4 + $0x8] sm:$0xff] %vm3691_vm15, %v3672_v59  ;;  %v7036_v10 = vpop.f32.mrb[47].mxu0 }
0x18eb   : > { %7362 = vmatmul.mubr.msk.bf16.gmra.mrb[32].mxu1 %vm983_vm0, %v7865_v62  ;;  %7178 = vmatmul.mubr.msk.bf16.vlgmr.msra.gmra.mrb[68].mxu0 %vm983_vm0, %v7875_v54 }
0x18ec   : > { %7369 = vmatprep.mubr.msk.bf16.mxu1 %vm7925_vm3, %v7924_v46  ;;  %7181 = vmatprep.mubr.msk.bf16.mxu0 %vm7925_vm3, %v7924_v46 }
0x18ee   : > { %v3677_v49 = vpop.f32.mrb[48].mxu0 }
0x18ef   : > { %3694 = vst.msk [vmem:[%s9338_s4 + $0x10] sm:$0xff] %vm3691_vm15, %v3677_v49  ;;  %v7039_v52 = vpop.f32.mrb[49].mxu0 }
0x18f0   : > { %v3680_v0 = vpop.f32.mrb[50].mxu0 }
0x18f1   : > { %3695 = vst.msk [vmem:[%s9338_s4 + $0x18] sm:$0xff] %vm3691_vm15, %v3680_v0  ;;  %v7040_v2 = vpop.f32.mrb[51].mxu0 }
0x18f3   : > { %7370 = vmatmul.mubr.msk.bf16.vlgmr.msra.gmra.mrb[24].mxu1 %vm983_vm0, %v7866_v50  ;;  %7182 = vmatmul.mubr.msk.bf16.gmra.mrb[72].mxu0 %vm983_vm0, %v7877_v61 }
0x18f4   : > { %7382 = vmatpush3.bf16.msra.mxu1 %v9008_v60  ;;  %7373 = vmatprep.mubr.msk.bf16.mxu1 %vm7925_vm3, %v7924_v46  ;;  %v7879_v60 = vld [vmem:[%s9503_s25 + $0x28] sm:$0xff]  }
0x18f5   : > { %7383 = vmatprep.subr.bf16.mxu1 %v7924_v46  ;;  %7185 = vmatprep.mubr.msk.bf16.mxu0 %vm7925_vm3, %v7924_v46 }
0x18f6   : > { %v3685_v33 = vpop.f32.mrb[52].mxu0 }
0x18f7   : > { %3697 = vst.msk [vmem:[%s9338_s4 + $0x20] sm:$0x1] %vm3696_vm1, %v3685_v33  ;;  %v7043_v12 = vpop.f32.mrb[53].mxu0 }
0x18f8   : > { %7384 = vmatpush3.bf16.msra.mxu1 %v9016_v63  ;;  %v3688_v13 = vpop.f32.mrb[54].mxu0  ;;  %v7869_v63 = vld [vmem:[%s9503_s25 + $0x138] sm:$0xff]  }
0x18f9   : > { %7397 = vmatprep.subr.bf16.mxu1 %v7924_v46  ;;  %v7044_v14 = vpop.f32.mrb[55].mxu0 }
0x18fb   : > { %7374 = vmatmul.mubr.msk.bf16.gmra.mrb[28].mxu1 %vm983_vm0, %v7867_v11  ;;  %7186 = vmatmul.mubr.msk.bf16.gmra.mrb[76].mxu0 %vm983_vm0, %v7879_v60 }
0x18fc   : > { %7377 = vmatprep.mubr.msk.bf16.mxu1 %vm7925_vm3, %v7924_v46 }
0x1903   : > { %7378 = vmatmul.mubr.msk.bf16.gmra.mrb[32].mxu1 %vm983_vm0, %v7868_v16 }
0x1904   : > { %7385 = vmatprep.mubr.msk.bf16.mxu1 %vm7925_vm3, %v7924_v46 }
0x190b   : > { %7386 = vmatmul.mubr.msk.bf16.vlgmr.msra.gmra.mrb[24].mxu1 %vm983_vm0, %v7869_v63 }
0x190c   : > { %7398 = vmatpush3.bf16.msra.mxu1 %v9026_v4  ;;  %7389 = vmatprep.mubr.msk.bf16.mxu1 %vm7925_vm3, %v7924_v46  ;;  %v7871_v4 = vld [vmem:[%s9503_s25 + $0x148] sm:$0xff]  }
0x190d   : > { %7399 = vmatprep.subr.bf16.mxu1 %v7924_v46 }
0x1910   : > { %7400 = vmatpush3.bf16.msra.mxu1 %v9036_v6  ;;  %v7872_v6 = vld [vmem:[%s9503_s25 + $0x150] sm:$0xff]  }
0x1911   : > { %7413 = vmatprep.subr.bf16.mxu1 %v7924_v46 }
0x1913   : > { %7390 = vmatmul.mubr.msk.bf16.gmra.mrb[28].mxu1 %vm983_vm0, %v7870_v17 }
0x1914   : > { %7393 = vmatprep.mubr.msk.bf16.mxu1 %vm7925_vm3, %v7924_v46 }
0x191b   : > { %7394 = vmatmul.mubr.msk.bf16.gmra.mrb[32].mxu1 %vm983_vm0, %v7871_v4 }
0x191c   : > { %7401 = vmatprep.mubr.msk.bf16.mxu1 %vm7925_vm3, %v7924_v46 }
0x1923   : > { %7402 = vmatmul.mubr.msk.bf16.vlgmr.msra.gmra.mrb[24].mxu1 %vm983_vm0, %v7872_v6 }
0x1924   : > { %7414 = vmatpush3.bf16.msra.mxu1 %v9050_v15  ;;  %7405 = vmatprep.mubr.msk.bf16.mxu1 %vm7925_vm3, %v7924_v46  ;;  %v7874_v15 = vld [vmem:[%s9503_s25 + $0x160] sm:$0xff]  }
0x1925   : > { %7415 = vmatprep.subr.bf16.mxu1 %v7924_v46 }
0x1928   : > { %7416 = vmatpush3.bf16.msra.mxu1 %v5987_v3 }
0x192b   : > { %7406 = vmatmul.mubr.msk.bf16.gmra.mrb[28].mxu1 %vm983_vm0, %v7873_v18 }
0x192c   : > { %7409 = vmatprep.mubr.msk.bf16.mxu1 %vm7925_vm3, %v7924_v46 }
0x1933   : > { %7410 = vmatmul.mubr.msk.bf16.gmra.mrb[32].mxu1 %vm983_vm0, %v7874_v15 }
0x1934   : > { %7417 = vmatprep.mubr.msk.bf16.mxu1 %vm7925_vm3, %v7924_v46 }
0x193b   : > { %7418 = vmatmul.mubr.msk.bf16.vlgmr.msra.gmra.mrb[24].mxu1 %vm983_vm0, %v7876_v20 }
0x193c   : > { %7421 = vmatprep.mubr.msk.bf16.mxu1 %vm7925_vm3, %v7924_v46 }
0x1943   : > { %7422 = vmatmul.mubr.msk.bf16.gmra.mrb[28].mxu1 %vm983_vm0, %v7878_v21 }
0x1944   : > { %7425 = vmatprep.mubr.msk.bf16.mxu1 %vm7925_vm3, %v7924_v46 }
0x194b   : > { %7426 = vmatmul.mubr.msk.bf16.gmra.mrb[32].mxu1 %vm983_vm0, %v7880_v23  ;;  %vm4451_vm0 = vcmask 79872  }
0x19a6   : > { %v4420_v25 = vpop.f32.mrb[56].mxu0 }
0x19a7   : > { %4447 = vst.msk [vmem:[%s884_s6] sm:$0xff] %vm3691_vm15, %v4420_v25  ;;  %v7163_v26 = vpop.f32.mrb[57].mxu0 }
0x19a8   : > { %v4423_v28 = vpop.f32.mrb[58].mxu0 }
0x19a9   : > { %4448 = vst.msk [vmem:[%s884_s6 + $0x8] sm:$0xff] %vm3691_vm15, %v4423_v28  ;;  %v7164_v29 = vpop.f32.mrb[59].mxu0 }
0x19ae   : > { %v4428_v46 = vpop.f32.mrb[60].mxu0 }
0x19af   : > { %4449 = vst.msk [vmem:[%s884_s6 + $0x10] sm:$0xff] %vm3691_vm15, %v4428_v46  ;;  %v7167_v30 = vpop.f32.mrb[61].mxu0 }
0x19b0   : > { %v4431_v34 = vpop.f32.mrb[62].mxu0 }
0x19b1   : > { %4450 = vst.msk [vmem:[%s884_s6 + $0x18] sm:$0xff] %vm3691_vm15, %v4431_v34  ;;  %v7168_v36 = vpop.f32.mrb[63].mxu0 }
0x19b6   : > { %v4436_v37 = vpop.f32.mrb[64].mxu0 }
0x19b7   : > { %4452 = vst.msk [vmem:[%s884_s6 + $0x20] sm:$0x7f] %vm4451_vm0, %v4436_v37  ;;  %v7171_v38 = vpop.f32.mrb[65].mxu0 }
0x19b8   : > { %v4439_v40 = vpop.f32.mrb[66].mxu0 }
0x19b9   : > { %v7172_v41 = vpop.f32.mrb[67].mxu0 }
0x19be   : > { %v4530_v39 = vpop.f32.mrb[68].mxu0 }
0x19bf   : > { %v7179_v42 = vpop.f32.mrb[69].mxu0 }
0x19c0   : > { %v4533_v43 = vpop.f32.mrb[70].mxu0 }
0x19c1   : > { %v7180_v44 = vpop.f32.mrb[71].mxu0 }
0x19c6   : > { %v4538_v22 = vpop.f32.mrb[72].mxu0 }
0x19c7   : > { %v7183_v45 = vpop.f32.mrb[73].mxu0 }
0x19c8   : > { %v4541_v5 = vpop.f32.mrb[74].mxu0 }
0x19c9   : > { %v7184_v8 = vpop.f32.mrb[75].mxu0 }
0x19ce   : > { %v4546_v32 = vpop.f32.mrb[76].mxu0 }
0x19cf   : > { %v7187_v24 = vpop.f32.mrb[77].mxu0 }
0x19d0   : > { %v4549_v1 = vpop.f32.mrb[78].mxu0 }
0x19d1   : > { %v7188_v27 = vpop.f32.mrb[79].mxu0 }
0x1a0e   : > { %v6033_v35 = vpop.f32.mrb[24].mxu1 }
0x1a0f   : > { %v7429_v7 = vadd.f32 %v6033_v35, %v4530_v39  ;;  %v7419_v31 = vpop.f32.mrb[25].mxu1 }
0x1a10   : > { %v6036_v9 = vpop.f32.mrb[26].mxu1 }
0x1a11   : > { %6062 = vst.msk [vmem:[%s889_s2] sm:$0xff] %vm3691_vm15, %v7429_v7  ;;  %v7430_v47 = vadd.f32 %v6036_v9, %v4533_v43  ;;  %v7420_v55 = vpop.f32.mrb[27].mxu1 }
0x1a13   : > { %6063 = vst.msk [vmem:[%s889_s2 + $0x8] sm:$0xff] %vm3691_vm15, %v7430_v47 }
0x1a16   : > { %v6041_v56 = vpop.f32.mrb[28].mxu1 }
0x1a17   : > { %v7431_v53 = vadd.f32 %v6041_v56, %v4538_v22  ;;  %v7423_v48 = vpop.f32.mrb[29].mxu1 }
0x1a18   : > { %v6044_v51 = vpop.f32.mrb[30].mxu1 }
0x1a19   : > { %6064 = vst.msk [vmem:[%s889_s2 + $0x10] sm:$0xff] %vm3691_vm15, %v7431_v53  ;;  %v7432_v57 = vadd.f32 %v6044_v51, %v4541_v5  ;;  %v7424_v62 = vpop.f32.mrb[31].mxu1 }
0x1a1b   : > { %6065 = vst.msk [vmem:[%s889_s2 + $0x18] sm:$0xff] %vm3691_vm15, %v7432_v57 }
0x1a1e   : > { %v6049_v58 = vpop.f32.mrb[32].mxu1 }
0x1a1f   : > { %v7433_v54 = vadd.f32 %v6049_v58, %v4546_v32  ;;  %v7427_v59 = vpop.f32.mrb[33].mxu1 }
0x1a20   : > { %v6052_v10 = vpop.f32.mrb[34].mxu1 }
0x1a21   : > { %6066 = vst.msk [vmem:[%s889_s2 + $0x20] sm:$0xff] %vm3691_vm15, %v7433_v54  ;;  %v7434_v49 = vadd.f32 %v6052_v10, %v4549_v1  ;;  %v7428_v50 = vpop.f32.mrb[35].mxu1 }
0x1a23   : > { %6067 = vst.msk [vmem:[%s889_s2 + $0x28] sm:$0x7f] %vm4451_vm0, %v7434_v49 }
0x1a24 PF: > { %s39_s8 = sadd.s32 1, %s7921_s8  }
0x1a25   : > { %p36_p5 = scmp.ge.s32.totalorder %s39_s8, 4  }
0x1a27   :  { %38 = sbr.rel (!%p36_p5) target bundleno = 14 (0xe), region = 241 }

</bundles_post_ra>
